<compile_context>
chip_gen: v7x
topology: tpu7x:2x2x1
jax: 0.10.0
libtpu: 0.0.40
codegen_flags: <defaults>
</compile_context>

<pallas_src>
import jax
import jax.numpy as jnp
from jax.experimental import pallas as pl
from jax.experimental.pallas import tpu as pltpu

NEG_SLOPE = 0.01          # PyTorch F.leaky_relu default negative_slope
C_IN = 5                  # input channels
C_MID = 32                # conv output channels
K = 5                     # conv kernel length (5,1) / (1,5)
S = 10                    # spatial size (H = W = 10)
S1 = S - K + 1            # 6  : spatial extent after the first conv
S2 = S1 - K + 1           # 2  : spatial extent after the second conv
P = S2 * S                # 20 : output positions per branch
FC1_IN = 2 * P * C_MID    # 1280
FC1_OUT = 512
FC2_OUT = 256
N_ACT = 10


def _leaky(v):
    return jnp.where(v > 0, v, NEG_SLOPE * v)


# ------------------------------ fused kernel ------------------------------- #

def actor2_fused_kernel(x1_ref, x2_ref,
                        w11_ref, b11_ref, w12_ref, b12_ref,
                        w21_ref, b21_ref, w22_ref, b22_ref,
                        w1_ref, b1_ref, w2_ref, b2_ref, w3_ref, b3_ref,
                        o_ref, h_scr, f_scr):
    """x1_ref rows = (h*S + w)*B + b, x2_ref rows = (w*S + h)*B + b, cols = C_IN."""
    B = o_ref.shape[0]
    bf16 = jnp.bfloat16

    def conv_branch(x_ref, wa_ref, ba_ref, wb_ref, bb_ref, f_row0):
        # conv A: C_IN -> C_MID, kernel K along the major spatial dim of x_ref.
        acc = jnp.zeros((S1 * S * B, C_MID), jnp.float32)
        for k in range(K):
            lhs = x_ref[pl.ds(k * S * B, S1 * S * B), :].astype(bf16)
            acc = acc + jnp.dot(lhs, wa_ref[pl.ds(k * C_IN, C_IN), :],
                                preferred_element_type=jnp.float32)
        h_scr[...] = _leaky(acc + ba_ref[...])

        # conv B: C_MID -> C_MID, kernel K along the same spatial dim.
        acc = jnp.zeros((S2 * S * B, C_MID), jnp.float32)
        for k in range(K):
            lhs = h_scr[pl.ds(k * S * B, S2 * S * B), :].astype(bf16)
            acc = acc + jnp.dot(lhs, wb_ref[pl.ds(k * C_MID, C_MID), :],
                                preferred_element_type=jnp.float32)
        f_scr[pl.ds(f_row0, S2 * S * B), :] = _leaky(acc + bb_ref[...])

    conv_branch(x1_ref, w11_ref, b11_ref, w12_ref, b12_ref, 0)       # (5,1) branch
    conv_branch(x2_ref, w21_ref, b21_ref, w22_ref, b22_ref, P * B)   # (1,5) branch

    # fc1 = sum over the 2*P spatial positions of (B, C_MID) @ (C_MID, 512).
    # The torch NCHW-flatten + cat ordering is baked into w1's row permutation.
    acc = jnp.zeros((B, FC1_OUT), jnp.float32)
    for p in range(2 * P):
        lhs = f_scr[pl.ds(p * B, B), :].astype(bf16)
        acc = acc + jnp.dot(lhs, w1_ref[pl.ds(p * C_MID, C_MID), :],
                            preferred_element_type=jnp.float32)
    h1 = _leaky(acc + b1_ref[...]).astype(bf16)

    h2 = _leaky(jnp.dot(h1, w2_ref[...], preferred_element_type=jnp.float32)
                + b2_ref[...]).astype(bf16)
    logits = jnp.dot(h2, w3_ref[...], preferred_element_type=jnp.float32) + b3_ref[...]

    m = jnp.max(logits, axis=-1, keepdims=True)
    e = jnp.exp(logits - m)
    s = jnp.sum(e, axis=-1, keepdims=True)
    o_ref[...] = e * pl.reciprocal(s, approx=True)


_VMEM = pl.BlockSpec(memory_space=pltpu.MemorySpace.VMEM)


@jax.jit
def actor2_forward(kp, x):
    # x: (B, 5, 10, 10) NCHW float32
    B = x.shape[0]
    # Channel-last, spatially-major layouts (tiny wrapper transposes of a ~4KB
    # array; the 5x patch duplication itself happens inside the kernel).
    x1 = jnp.transpose(x, (2, 3, 0, 1)).reshape(S * S * B, C_IN)   # row=(h*S+w)*B+b
    x2 = jnp.transpose(x, (3, 2, 0, 1)).reshape(S * S * B, C_IN)   # row=(w*S+h)*B+b

    args = (x1, x2,
            kp["w11"], kp["b11"], kp["w12"], kp["b12"],
            kp["w21"], kp["b21"], kp["w22"], kp["b22"],
            kp["w1"], kp["b1"], kp["w2"], kp["b2"], kp["w3"], kp["b3"])

    return pl.pallas_call(
        actor2_fused_kernel,
        out_shape=jax.ShapeDtypeStruct((B, N_ACT), jnp.float32),
        in_specs=[_VMEM] * len(args),
        out_specs=_VMEM,
        scratch_shapes=[pltpu.VMEM((S1 * S * B, C_MID), jnp.float32),   # h_scr
                        pltpu.VMEM((2 * P * B, C_MID), jnp.float32)],   # f_scr
    )(*args)
    # TODO(synk): for large batches add a grid over B with
    # dimension_semantics=("parallel",) to use both v7x TensorCores; at B=2 a
    # single ungridded call is optimal.


# --------------------------- parameter handling ----------------------------- #

def init_params(key):
    """Random params in PyTorch layout: conv (O,C,KH,KW), linear (out,in)."""
    def dense(k, shape, fan_in):
        kw, kb = jax.random.split(k)
        w = jax.random.normal(kw, shape, jnp.float32) / jnp.sqrt(jnp.float32(fan_in))
        b = 0.01 * jax.random.normal(kb, (shape[0],), jnp.float32)
        return w, b

    ks = jax.random.split(key, 7)
    return {
        "conv1_1": dense(ks[0], (C_MID, C_IN, K, 1), C_IN * K),
        "conv1_2": dense(ks[1], (C_MID, C_MID, K, 1), C_MID * K),
        "conv2_1": dense(ks[2], (C_MID, C_IN, 1, K), C_IN * K),
        "conv2_2": dense(ks[3], (C_MID, C_MID, 1, K), C_MID * K),
        "fc1": dense(ks[4], (FC1_OUT, FC1_IN), FC1_IN),
        "fc2": dense(ks[5], (FC2_OUT, FC1_OUT), FC1_OUT),
        "head": dense(ks[6], (N_ACT, FC2_OUT), FC2_OUT),
    }


def prepare_params(p):
    """Torch-layout params -> kernel-ready matrices (bf16 weights, f32 biases).

    Conv weights become (K*C_in, C_out) matmul matrices with row = k*C_in + c.
    fc1 rows are permuted so the kernel's position-major (pos, channel) feature
    layout matches torch's NCHW .view(B, -1) + cat order (zero numerical cost).
    """
    def conv_h(w):  # (O, C, K, 1) -> (K*C, O)
        o, c, k, _ = w.shape
        return jnp.transpose(w[:, :, :, 0], (2, 1, 0)).reshape(k * c, o)

    def conv_w(w):  # (O, C, 1, K) -> (K*C, O)
        o, c, _, k = w.shape
        return jnp.transpose(w[:, :, 0, :], (2, 1, 0)).reshape(k * c, o)

    w1t = p["fc1"][0].T                                    # (1280, 512), torch row order
    # branch 1: torch rows ordered (c, h, w) over (C_MID, S2, S); kernel wants ((h*S+w), c)
    w1a = w1t[:C_MID * P].reshape(C_MID, S2, S, FC1_OUT)
    w1a = jnp.transpose(w1a, (1, 2, 0, 3)).reshape(C_MID * P, FC1_OUT)
    # branch 2: torch rows ordered (c, h, w) over (C_MID, S, S2); kernel wants ((w*S+h), c)
    w1b = w1t[C_MID * P:].reshape(C_MID, S, S2, FC1_OUT)
    w1b = jnp.transpose(w1b, (2, 1, 0, 3)).reshape(C_MID * P, FC1_OUT)

    bf16 = jnp.bfloat16
    row = lambda b: b.reshape(1, -1).astype(jnp.float32)
    return {
        "w11": conv_h(p["conv1_1"][0]).astype(bf16), "b11": row(p["conv1_1"][1]),
        "w12": conv_h(p["conv1_2"][0]).astype(bf16), "b12": row(p["conv1_2"][1]),
        "w21": conv_w(p["conv2_1"][0]).astype(bf16), "b21": row(p["conv2_1"][1]),
        "w22": conv_w(p["conv2_2"][0]).astype(bf16), "b22": row(p["conv2_2"][1]),
        "w1": jnp.concatenate([w1a, w1b], axis=0).astype(bf16), "b1": row(p["fc1"][1]),
        "w2": p["fc2"][0].T.astype(bf16), "b2": row(p["fc2"][1]),
        "w3": p["head"][0].T.astype(bf16), "b3": row(p["head"][1]),
    }


# ----------------------------- pure-JAX reference --------------------------- #

def reference_forward(p, x):
    lr = lambda v: jnp.where(v > 0, v, NEG_SLOPE * v)

    def conv(z, w, b):
        y = jax.lax.conv_general_dilated(
            z, w, window_strides=(1, 1), padding="VALID",
            dimension_numbers=("NCHW", "OIHW", "NCHW"))
        return y + b.reshape(1, -1, 1, 1)

    x11 = lr(conv(x, *p["conv1_1"]))
    x12 = lr(conv(x11, *p["conv1_2"]))
    x21 = lr(conv(x, *p["conv2_1"]))
    x22 = lr(conv(x21, *p["conv2_2"]))
    B = x.shape[0]
    feat = jnp.concatenate([x12.reshape(B, -1), x22.reshape(B, -1)], axis=1)
    h1 = lr(feat @ p["fc1"][0].T + p["fc1"][1])
    h2 = lr(h1 @ p["fc2"][0].T + p["fc2"][1])
    return jax.nn.softmax(h2 @ p["head"][0].T + p["head"][1], axis=1)


# TODO(synk): parse_config(config_path) / self.domain_node are not used in
# forward(); they have no numerical effect and are omitted.

if __name__ == "__main__":
    key = jax.random.PRNGKey(0)
    k_params, k_x = jax.random.split(key)

    params = init_params(k_params)
    kparams = prepare_params(params)

    # fc1 in_features = 1280 = 32*((H-8)*W + H*(W-8)) forces H = W = 10.
    x = jax.random.normal(k_x, (2, C_IN, S, S), jnp.float32)

    probs = jax.block_until_ready(actor2_forward(kparams, x))

    assert probs.shape == (2, N_ACT)
    assert bool(jnp.all(probs >= 0.0))
    assert bool(jnp.all(jnp.abs(jnp.sum(probs, axis=1) - 1.0) < 5e-3))

    ref = reference_forward(params, x)
    err = float(jnp.max(jnp.abs(probs - ref)))
    assert err < 5e-2, f"max |probs - ref| = {err}"

    print("KERNEL_OK")
</pallas_src>

<mosaic_0001>
module attributes {stable_mosaic.version = 11 : i64} {
  func.func @actor2_fused_kernel(%arg0: memref<200x5xf32, #tpu.memory_space<vmem>>, %arg1: memref<200x5xf32, #tpu.memory_space<vmem>>, %arg2: memref<25x32xbf16, #tpu.memory_space<vmem>>, %arg3: memref<1x32xf32, #tpu.memory_space<vmem>>, %arg4: memref<160x32xbf16, #tpu.memory_space<vmem>>, %arg5: memref<1x32xf32, #tpu.memory_space<vmem>>, %arg6: memref<25x32xbf16, #tpu.memory_space<vmem>>, %arg7: memref<1x32xf32, #tpu.memory_space<vmem>>, %arg8: memref<160x32xbf16, #tpu.memory_space<vmem>>, %arg9: memref<1x32xf32, #tpu.memory_space<vmem>>, %arg10: memref<1280x512xbf16, #tpu.memory_space<vmem>>, %arg11: memref<1x512xf32, #tpu.memory_space<vmem>>, %arg12: memref<512x256xbf16, #tpu.memory_space<vmem>>, %arg13: memref<1x256xf32, #tpu.memory_space<vmem>>, %arg14: memref<256x10xbf16, #tpu.memory_space<vmem>>, %arg15: memref<1x10xf32, #tpu.memory_space<vmem>>, %arg16: memref<2x10xf32, #tpu.memory_space<vmem>>, %arg17: memref<120x32xf32, #tpu.memory_space<vmem>>, %arg18: memref<80x32xf32, #tpu.memory_space<vmem>>) attributes {dimension_semantics = [], scalar_prefetch = 0 : i64, scratch_operands = 2 : i64, tpu.core_type = #tpu.core_type<tc>} {
    %cst = arith.constant 0.000000e+00 : f32
    %0 = vector.broadcast %cst : f32 to vector<120x32xf32>
    %c0 = arith.constant 0 : index
    %c0_0 = arith.constant 0 : index
    %1 = vector.load %arg0[%c0, %c0_0] : memref<200x5xf32, #tpu.memory_space<vmem>>, vector<120x5xf32>
    %2 = arith.truncf %1 : vector<120x5xf32> to vector<120x5xbf16>
    %c0_1 = arith.constant 0 : index
    %c0_2 = arith.constant 0 : index
    %3 = vector.load %arg2[%c0_1, %c0_2] : memref<25x32xbf16, #tpu.memory_space<vmem>>, vector<5x32xbf16>
    %cst_3 = arith.constant dense<0.000000e+00> : vector<120x32xf32>
    %4 = tpu.matmul %2, %3, %cst_3 {dimension_numbers = #tpu.dot_dimension_numbers<[1], [0], [0], [1], [0, 0, 1, 1], [], []>} : vector<120x5xbf16>, vector<5x32xbf16>, vector<120x32xf32> -> vector<120x32xf32>
    %5 = arith.addf %0, %4 : vector<120x32xf32>
    %c20 = arith.constant 20 : index
    %c0_4 = arith.constant 0 : index
    %6 = vector.load %arg0[%c20, %c0_4] : memref<200x5xf32, #tpu.memory_space<vmem>>, vector<120x5xf32>
    %7 = arith.truncf %6 : vector<120x5xf32> to vector<120x5xbf16>
    %c5 = arith.constant 5 : index
    %c0_5 = arith.constant 0 : index
    %8 = vector.load %arg2[%c5, %c0_5] : memref<25x32xbf16, #tpu.memory_space<vmem>>, vector<5x32xbf16>
    %cst_6 = arith.constant dense<0.000000e+00> : vector<120x32xf32>
    %9 = tpu.matmul %7, %8, %cst_6 {dimension_numbers = #tpu.dot_dimension_numbers<[1], [0], [0], [1], [0, 0, 1, 1], [], []>} : vector<120x5xbf16>, vector<5x32xbf16>, vector<120x32xf32> -> vector<120x32xf32>
    %10 = arith.addf %5, %9 : vector<120x32xf32>
    %c40 = arith.constant 40 : index
    %c0_7 = arith.constant 0 : index
    %11 = vector.load %arg0[%c40, %c0_7] : memref<200x5xf32, #tpu.memory_space<vmem>>, vector<120x5xf32>
    %12 = arith.truncf %11 : vector<120x5xf32> to vector<120x5xbf16>
    %c10 = arith.constant 10 : index
    %c0_8 = arith.constant 0 : index
    %13 = vector.load %arg2[%c10, %c0_8] : memref<25x32xbf16, #tpu.memory_space<vmem>>, vector<5x32xbf16>
    %cst_9 = arith.constant dense<0.000000e+00> : vector<120x32xf32>
    %14 = tpu.matmul %12, %13, %cst_9 {dimension_numbers = #tpu.dot_dimension_numbers<[1], [0], [0], [1], [0, 0, 1, 1], [], []>} : vector<120x5xbf16>, vector<5x32xbf16>, vector<120x32xf32> -> vector<120x32xf32>
    %15 = arith.addf %10, %14 : vector<120x32xf32>
    %c60 = arith.constant 60 : index
    %c0_10 = arith.constant 0 : index
    %16 = vector.load %arg0[%c60, %c0_10] : memref<200x5xf32, #tpu.memory_space<vmem>>, vector<120x5xf32>
    %17 = arith.truncf %16 : vector<120x5xf32> to vector<120x5xbf16>
    %c15 = arith.constant 15 : index
    %c0_11 = arith.constant 0 : index
    %18 = vector.load %arg2[%c15, %c0_11] : memref<25x32xbf16, #tpu.memory_space<vmem>>, vector<5x32xbf16>
    %cst_12 = arith.constant dense<0.000000e+00> : vector<120x32xf32>
    %19 = tpu.matmul %17, %18, %cst_12 {dimension_numbers = #tpu.dot_dimension_numbers<[1], [0], [0], [1], [0, 0, 1, 1], [], []>} : vector<120x5xbf16>, vector<5x32xbf16>, vector<120x32xf32> -> vector<120x32xf32>
    %20 = arith.addf %15, %19 : vector<120x32xf32>
    %c80 = arith.constant 80 : index
    %c0_13 = arith.constant 0 : index
    %21 = vector.load %arg0[%c80, %c0_13] : memref<200x5xf32, #tpu.memory_space<vmem>>, vector<120x5xf32>
    %22 = arith.truncf %21 : vector<120x5xf32> to vector<120x5xbf16>
    %c20_14 = arith.constant 20 : index
    %c0_15 = arith.constant 0 : index
    %23 = vector.load %arg2[%c20_14, %c0_15] : memref<25x32xbf16, #tpu.memory_space<vmem>>, vector<5x32xbf16>
    %cst_16 = arith.constant dense<0.000000e+00> : vector<120x32xf32>
    %24 = tpu.matmul %22, %23, %cst_16 {dimension_numbers = #tpu.dot_dimension_numbers<[1], [0], [0], [1], [0, 0, 1, 1], [], []>} : vector<120x5xbf16>, vector<5x32xbf16>, vector<120x32xf32> -> vector<120x32xf32>
    %25 = arith.addf %20, %24 : vector<120x32xf32>
    %c0_17 = arith.constant 0 : index
    %c0_18 = arith.constant 0 : index
    %26 = vector.load %arg3[%c0_17, %c0_18] : memref<1x32xf32, #tpu.memory_space<vmem>>, vector<1x32xf32>
    %27 = vector.broadcast %26 : vector<1x32xf32> to vector<120x32xf32>
    %28 = arith.addf %25, %27 : vector<120x32xf32>
    %cst_19 = arith.constant 0.000000e+00 : f32
    %29 = vector.broadcast %cst_19 : f32 to vector<120x32xf32>
    %30 = arith.cmpf ogt, %28, %29 : vector<120x32xf32>
    %cst_20 = arith.constant 0.00999999977 : f32
    %31 = vector.broadcast %cst_20 : f32 to vector<120x32xf32>
    %32 = arith.mulf %31, %28 : vector<120x32xf32>
    %33 = arith.select %30, %28, %32 : vector<120x32xi1>, vector<120x32xf32>
    %c0_21 = arith.constant 0 : index
    %c0_22 = arith.constant 0 : index
    %34 = vector.load %arg17[%c0_21, %c0_22] : memref<120x32xf32, #tpu.memory_space<vmem>>, vector<120x32xf32>
    tpu.vector_store %arg17[%c0_21, %c0_22], %33 {strides = array<i32>} : memref<120x32xf32, #tpu.memory_space<vmem>>, vector<120x32xf32>,
    %cst_23 = arith.constant 0.000000e+00 : f32
    %35 = vector.broadcast %cst_23 : f32 to vector<40x32xf32>
    %c0_24 = arith.constant 0 : index
    %c0_25 = arith.constant 0 : index
    %36 = vector.load %arg17[%c0_24, %c0_25] : memref<120x32xf32, #tpu.memory_space<vmem>>, vector<40x32xf32>
    %37 = arith.truncf %36 : vector<40x32xf32> to vector<40x32xbf16>
    %c0_26 = arith.constant 0 : index
    %c0_27 = arith.constant 0 : index
    %38 = vector.load %arg4[%c0_26, %c0_27] : memref<160x32xbf16, #tpu.memory_space<vmem>>, vector<32x32xbf16>
    %cst_28 = arith.constant dense<0.000000e+00> : vector<40x32xf32>
    %39 = tpu.matmul %37, %38, %cst_28 {dimension_numbers = #tpu.dot_dimension_numbers<[1], [0], [0], [1], [0, 0, 1, 1], [], []>} : vector<40x32xbf16>, vector<32x32xbf16>, vector<40x32xf32> -> vector<40x32xf32>
    %40 = arith.addf %35, %39 : vector<40x32xf32>
    %c20_29 = arith.constant 20 : index
    %c0_30 = arith.constant 0 : index
    %41 = vector.load %arg17[%c20_29, %c0_30] : memref<120x32xf32, #tpu.memory_space<vmem>>, vector<40x32xf32>
    %42 = arith.truncf %41 : vector<40x32xf32> to vector<40x32xbf16>
    %c32 = arith.constant 32 : index
    %c0_31 = arith.constant 0 : index
    %43 = vector.load %arg4[%c32, %c0_31] : memref<160x32xbf16, #tpu.memory_space<vmem>>, vector<32x32xbf16>
    %cst_32 = arith.constant dense<0.000000e+00> : vector<40x32xf32>
    %44 = tpu.matmul %42, %43, %cst_32 {dimension_numbers = #tpu.dot_dimension_numbers<[1], [0], [0], [1], [0, 0, 1, 1], [], []>} : vector<40x32xbf16>, vector<32x32xbf16>, vector<40x32xf32> -> vector<40x32xf32>
    %45 = arith.addf %40, %44 : vector<40x32xf32>
    %c40_33 = arith.constant 40 : index
    %c0_34 = arith.constant 0 : index
    %46 = vector.load %arg17[%c40_33, %c0_34] : memref<120x32xf32, #tpu.memory_space<vmem>>, vector<40x32xf32>
    %47 = arith.truncf %46 : vector<40x32xf32> to vector<40x32xbf16>
    %c64 = arith.constant 64 : index
    %c0_35 = arith.constant 0 : index
    %48 = vector.load %arg4[%c64, %c0_35] : memref<160x32xbf16, #tpu.memory_space<vmem>>, vector<32x32xbf16>
    %cst_36 = arith.constant dense<0.000000e+00> : vector<40x32xf32>
    %49 = tpu.matmul %47, %48, %cst_36 {dimension_numbers = #tpu.dot_dimension_numbers<[1], [0], [0], [1], [0, 0, 1, 1], [], []>} : vector<40x32xbf16>, vector<32x32xbf16>, vector<40x32xf32> -> vector<40x32xf32>
    %50 = arith.addf %45, %49 : vector<40x32xf32>
    %c60_37 = arith.constant 60 : index
    %c0_38 = arith.constant 0 : index
    %51 = vector.load %arg17[%c60_37, %c0_38] : memref<120x32xf32, #tpu.memory_space<vmem>>, vector<40x32xf32>
    %52 = arith.truncf %51 : vector<40x32xf32> to vector<40x32xbf16>
    %c96 = arith.constant 96 : index
    %c0_39 = arith.constant 0 : index
    %53 = vector.load %arg4[%c96, %c0_39] : memref<160x32xbf16, #tpu.memory_space<vmem>>, vector<32x32xbf16>
    %cst_40 = arith.constant dense<0.000000e+00> : vector<40x32xf32>
    %54 = tpu.matmul %52, %53, %cst_40 {dimension_numbers = #tpu.dot_dimension_numbers<[1], [0], [0], [1], [0, 0, 1, 1], [], []>} : vector<40x32xbf16>, vector<32x32xbf16>, vector<40x32xf32> -> vector<40x32xf32>
    %55 = arith.addf %50, %54 : vector<40x32xf32>
    %c80_41 = arith.constant 80 : index
    %c0_42 = arith.constant 0 : index
    %56 = vector.load %arg17[%c80_41, %c0_42] : memref<120x32xf32, #tpu.memory_space<vmem>>, vector<40x32xf32>
    %57 = arith.truncf %56 : vector<40x32xf32> to vector<40x32xbf16>
    %c128 = arith.constant 128 : index
    %c0_43 = arith.constant 0 : index
    %58 = vector.load %arg4[%c128, %c0_43] : memref<160x32xbf16, #tpu.memory_space<vmem>>, vector<32x32xbf16>
    %cst_44 = arith.constant dense<0.000000e+00> : vector<40x32xf32>
    %59 = tpu.matmul %57, %58, %cst_44 {dimension_numbers = #tpu.dot_dimension_numbers<[1], [0], [0], [1], [0, 0, 1, 1], [], []>} : vector<40x32xbf16>, vector<32x32xbf16>, vector<40x32xf32> -> vector<40x32xf32>
    %60 = arith.addf %55, %59 : vector<40x32xf32>
    %c0_45 = arith.constant 0 : index
    %c0_46 = arith.constant 0 : index
    %61 = vector.load %arg5[%c0_45, %c0_46] : memref<1x32xf32, #tpu.memory_space<vmem>>, vector<1x32xf32>
    %62 = vector.broadcast %61 : vector<1x32xf32> to vector<40x32xf32>
    %63 = arith.addf %60, %62 : vector<40x32xf32>
    %cst_47 = arith.constant 0.000000e+00 : f32
    %64 = vector.broadcast %cst_47 : f32 to vector<40x32xf32>
    %65 = arith.cmpf ogt, %63, %64 : vector<40x32xf32>
    %cst_48 = arith.constant 0.00999999977 : f32
    %66 = vector.broadcast %cst_48 : f32 to vector<40x32xf32>
    %67 = arith.mulf %66, %63 : vector<40x32xf32>
    %68 = arith.select %65, %63, %67 : vector<40x32xi1>, vector<40x32xf32>
    %c0_49 = arith.constant 0 : index
    %c0_50 = arith.constant 0 : index
    %69 = vector.load %arg18[%c0_49, %c0_50] : memref<80x32xf32, #tpu.memory_space<vmem>>, vector<40x32xf32>
    tpu.vector_store %arg18[%c0_49, %c0_50], %68 {strides = array<i32>} : memref<80x32xf32, #tpu.memory_space<vmem>>, vector<40x32xf32>,
    %cst_51 = arith.constant 0.000000e+00 : f32
    %70 = vector.broadcast %cst_51 : f32 to vector<120x32xf32>
    %c0_52 = arith.constant 0 : index
    %c0_53 = arith.constant 0 : index
    %71 = vector.load %arg1[%c0_52, %c0_53] : memref<200x5xf32, #tpu.memory_space<vmem>>, vector<120x5xf32>
    %72 = arith.truncf %71 : vector<120x5xf32> to vector<120x5xbf16>
    %c0_54 = arith.constant 0 : index
    %c0_55 = arith.constant 0 : index
    %73 = vector.load %arg6[%c0_54, %c0_55] : memref<25x32xbf16, #tpu.memory_space<vmem>>, vector<5x32xbf16>
    %cst_56 = arith.constant dense<0.000000e+00> : vector<120x32xf32>
    %74 = tpu.matmul %72, %73, %cst_56 {dimension_numbers = #tpu.dot_dimension_numbers<[1], [0], [0], [1], [0, 0, 1, 1], [], []>} : vector<120x5xbf16>, vector<5x32xbf16>, vector<120x32xf32> -> vector<120x32xf32>
    %75 = arith.addf %70, %74 : vector<120x32xf32>
    %c20_57 = arith.constant 20 : index
    %c0_58 = arith.constant 0 : index
    %76 = vector.load %arg1[%c20_57, %c0_58] : memref<200x5xf32, #tpu.memory_space<vmem>>, vector<120x5xf32>
    %77 = arith.truncf %76 : vector<120x5xf32> to vector<120x5xbf16>
    %c5_59 = arith.constant 5 : index
    %c0_60 = arith.constant 0 : index
    %78 = vector.load %arg6[%c5_59, %c0_60] : memref<25x32xbf16, #tpu.memory_space<vmem>>, vector<5x32xbf16>
    %cst_61 = arith.constant dense<0.000000e+00> : vector<120x32xf32>
    %79 = tpu.matmul %77, %78, %cst_61 {dimension_numbers = #tpu.dot_dimension_numbers<[1], [0], [0], [1], [0, 0, 1, 1], [], []>} : vector<120x5xbf16>, vector<5x32xbf16>, vector<120x32xf32> -> vector<120x32xf32>
    %80 = arith.addf %75, %79 : vector<120x32xf32>
    %c40_62 = arith.constant 40 : index
    %c0_63 = arith.constant 0 : index
    %81 = vector.load %arg1[%c40_62, %c0_63] : memref<200x5xf32, #tpu.memory_space<vmem>>, vector<120x5xf32>
    %82 = arith.truncf %81 : vector<120x5xf32> to vector<120x5xbf16>
    %c10_64 = arith.constant 10 : index
    %c0_65 = arith.constant 0 : index
    %83 = vector.load %arg6[%c10_64, %c0_65] : memref<25x32xbf16, #tpu.memory_space<vmem>>, vector<5x32xbf16>
    %cst_66 = arith.constant dense<0.000000e+00> : vector<120x32xf32>
    %84 = tpu.matmul %82, %83, %cst_66 {dimension_numbers = #tpu.dot_dimension_numbers<[1], [0], [0], [1], [0, 0, 1, 1], [], []>} : vector<120x5xbf16>, vector<5x32xbf16>, vector<120x32xf32> -> vector<120x32xf32>
    %85 = arith.addf %80, %84 : vector<120x32xf32>
    %c60_67 = arith.constant 60 : index
    %c0_68 = arith.constant 0 : index
    %86 = vector.load %arg1[%c60_67, %c0_68] : memref<200x5xf32, #tpu.memory_space<vmem>>, vector<120x5xf32>
    %87 = arith.truncf %86 : vector<120x5xf32> to vector<120x5xbf16>
    %c15_69 = arith.constant 15 : index
    %c0_70 = arith.constant 0 : index
    %88 = vector.load %arg6[%c15_69, %c0_70] : memref<25x32xbf16, #tpu.memory_space<vmem>>, vector<5x32xbf16>
    %cst_71 = arith.constant dense<0.000000e+00> : vector<120x32xf32>
    %89 = tpu.matmul %87, %88, %cst_71 {dimension_numbers = #tpu.dot_dimension_numbers<[1], [0], [0], [1], [0, 0, 1, 1], [], []>} : vector<120x5xbf16>, vector<5x32xbf16>, vector<120x32xf32> -> vector<120x32xf32>
    %90 = arith.addf %85, %89 : vector<120x32xf32>
    %c80_72 = arith.constant 80 : index
    %c0_73 = arith.constant 0 : index
    %91 = vector.load %arg1[%c80_72, %c0_73] : memref<200x5xf32, #tpu.memory_space<vmem>>, vector<120x5xf32>
    %92 = arith.truncf %91 : vector<120x5xf32> to vector<120x5xbf16>
    %c20_74 = arith.constant 20 : index
    %c0_75 = arith.constant 0 : index
    %93 = vector.load %arg6[%c20_74, %c0_75] : memref<25x32xbf16, #tpu.memory_space<vmem>>, vector<5x32xbf16>
    %cst_76 = arith.constant dense<0.000000e+00> : vector<120x32xf32>
    %94 = tpu.matmul %92, %93, %cst_76 {dimension_numbers = #tpu.dot_dimension_numbers<[1], [0], [0], [1], [0, 0, 1, 1], [], []>} : vector<120x5xbf16>, vector<5x32xbf16>, vector<120x32xf32> -> vector<120x32xf32>
    %95 = arith.addf %90, %94 : vector<120x32xf32>
    %c0_77 = arith.constant 0 : index
    %c0_78 = arith.constant 0 : index
    %96 = vector.load %arg7[%c0_77, %c0_78] : memref<1x32xf32, #tpu.memory_space<vmem>>, vector<1x32xf32>
    %97 = vector.broadcast %96 : vector<1x32xf32> to vector<120x32xf32>
    %98 = arith.addf %95, %97 : vector<120x32xf32>
    %cst_79 = arith.constant 0.000000e+00 : f32
    %99 = vector.broadcast %cst_79 : f32 to vector<120x32xf32>
    %100 = arith.cmpf ogt, %98, %99 : vector<120x32xf32>
    %cst_80 = arith.constant 0.00999999977 : f32
    %101 = vector.broadcast %cst_80 : f32 to vector<120x32xf32>
    %102 = arith.mulf %101, %98 : vector<120x32xf32>
    %103 = arith.select %100, %98, %102 : vector<120x32xi1>, vector<120x32xf32>
    %c0_81 = arith.constant 0 : index
    %c0_82 = arith.constant 0 : index
    %104 = vector.load %arg17[%c0_81, %c0_82] : memref<120x32xf32, #tpu.memory_space<vmem>>, vector<120x32xf32>
    tpu.vector_store %arg17[%c0_81, %c0_82], %103 {strides = array<i32>} : memref<120x32xf32, #tpu.memory_space<vmem>>, vector<120x32xf32>,
    %cst_83 = arith.constant 0.000000e+00 : f32
    %105 = vector.broadcast %cst_83 : f32 to vector<40x32xf32>
    %c0_84 = arith.constant 0 : index
    %c0_85 = arith.constant 0 : index
    %106 = vector.load %arg17[%c0_84, %c0_85] : memref<120x32xf32, #tpu.memory_space<vmem>>, vector<40x32xf32>
    %107 = arith.truncf %106 : vector<40x32xf32> to vector<40x32xbf16>
    %c0_86 = arith.constant 0 : index
    %c0_87 = arith.constant 0 : index
    %108 = vector.load %arg8[%c0_86, %c0_87] : memref<160x32xbf16, #tpu.memory_space<vmem>>, vector<32x32xbf16>
    %cst_88 = arith.constant dense<0.000000e+00> : vector<40x32xf32>
    %109 = tpu.matmul %107, %108, %cst_88 {dimension_numbers = #tpu.dot_dimension_numbers<[1], [0], [0], [1], [0, 0, 1, 1], [], []>} : vector<40x32xbf16>, vector<32x32xbf16>, vector<40x32xf32> -> vector<40x32xf32>
    %110 = arith.addf %105, %109 : vector<40x32xf32>
    %c20_89 = arith.constant 20 : index
    %c0_90 = arith.constant 0 : index
    %111 = vector.load %arg17[%c20_89, %c0_90] : memref<120x32xf32, #tpu.memory_space<vmem>>, vector<40x32xf32>
    %112 = arith.truncf %111 : vector<40x32xf32> to vector<40x32xbf16>
    %c32_91 = arith.constant 32 : index
    %c0_92 = arith.constant 0 : index
    %113 = vector.load %arg8[%c32_91, %c0_92] : memref<160x32xbf16, #tpu.memory_space<vmem>>, vector<32x32xbf16>
    %cst_93 = arith.constant dense<0.000000e+00> : vector<40x32xf32>
    %114 = tpu.matmul %112, %113, %cst_93 {dimension_numbers = #tpu.dot_dimension_numbers<[1], [0], [0], [1], [0, 0, 1, 1], [], []>} : vector<40x32xbf16>, vector<32x32xbf16>, vector<40x32xf32> -> vector<40x32xf32>
    %115 = arith.addf %110, %114 : vector<40x32xf32>
    %c40_94 = arith.constant 40 : index
    %c0_95 = arith.constant 0 : index
    %116 = vector.load %arg17[%c40_94, %c0_95] : memref<120x32xf32, #tpu.memory_space<vmem>>, vector<40x32xf32>
    %117 = arith.truncf %116 : vector<40x32xf32> to vector<40x32xbf16>
    %c64_96 = arith.constant 64 : index
    %c0_97 = arith.constant 0 : index
    %118 = vector.load %arg8[%c64_96, %c0_97] : memref<160x32xbf16, #tpu.memory_space<vmem>>, vector<32x32xbf16>
    %cst_98 = arith.constant dense<0.000000e+00> : vector<40x32xf32>
    %119 = tpu.matmul %117, %118, %cst_98 {dimension_numbers = #tpu.dot_dimension_numbers<[1], [0], [0], [1], [0, 0, 1, 1], [], []>} : vector<40x32xbf16>, vector<32x32xbf16>, vector<40x32xf32> -> vector<40x32xf32>
    %120 = arith.addf %115, %119 : vector<40x32xf32>
    %c60_99 = arith.constant 60 : index
    %c0_100 = arith.constant 0 : index
    %121 = vector.load %arg17[%c60_99, %c0_100] : memref<120x32xf32, #tpu.memory_space<vmem>>, vector<40x32xf32>
    %122 = arith.truncf %121 : vector<40x32xf32> to vector<40x32xbf16>
    %c96_101 = arith.constant 96 : index
    %c0_102 = arith.constant 0 : index
    %123 = vector.load %arg8[%c96_101, %c0_102] : memref<160x32xbf16, #tpu.memory_space<vmem>>, vector<32x32xbf16>
    %cst_103 = arith.constant dense<0.000000e+00> : vector<40x32xf32>
    %124 = tpu.matmul %122, %123, %cst_103 {dimension_numbers = #tpu.dot_dimension_numbers<[1], [0], [0], [1], [0, 0, 1, 1], [], []>} : vector<40x32xbf16>, vector<32x32xbf16>, vector<40x32xf32> -> vector<40x32xf32>
    %125 = arith.addf %120, %124 : vector<40x32xf32>
    %c80_104 = arith.constant 80 : index
    %c0_105 = arith.constant 0 : index
    %126 = vector.load %arg17[%c80_104, %c0_105] : memref<120x32xf32, #tpu.memory_space<vmem>>, vector<40x32xf32>
    %127 = arith.truncf %126 : vector<40x32xf32> to vector<40x32xbf16>
    %c128_106 = arith.constant 128 : index
    %c0_107 = arith.constant 0 : index
    %128 = vector.load %arg8[%c128_106, %c0_107] : memref<160x32xbf16, #tpu.memory_space<vmem>>, vector<32x32xbf16>
    %cst_108 = arith.constant dense<0.000000e+00> : vector<40x32xf32>
    %129 = tpu.matmul %127, %128, %cst_108 {dimension_numbers = #tpu.dot_dimension_numbers<[1], [0], [0], [1], [0, 0, 1, 1], [], []>} : vector<40x32xbf16>, vector<32x32xbf16>, vector<40x32xf32> -> vector<40x32xf32>
    %130 = arith.addf %125, %129 : vector<40x32xf32>
    %c0_109 = arith.constant 0 : index
    %c0_110 = arith.constant 0 : index
    %131 = vector.load %arg9[%c0_109, %c0_110] : memref<1x32xf32, #tpu.memory_space<vmem>>, vector<1x32xf32>
    %132 = vector.broadcast %131 : vector<1x32xf32> to vector<40x32xf32>
    %133 = arith.addf %130, %132 : vector<40x32xf32>
    %cst_111 = arith.constant 0.000000e+00 : f32
    %134 = vector.broadcast %cst_111 : f32 to vector<40x32xf32>
    %135 = arith.cmpf ogt, %133, %134 : vector<40x32xf32>
    %cst_112 = arith.constant 0.00999999977 : f32
    %136 = vector.broadcast %cst_112 : f32 to vector<40x32xf32>
    %137 = arith.mulf %136, %133 : vector<40x32xf32>
    %138 = arith.select %135, %133, %137 : vector<40x32xi1>, vector<40x32xf32>
    %c40_113 = arith.constant 40 : index
    %c0_114 = arith.constant 0 : index
    %139 = vector.load %arg18[%c40_113, %c0_114] : memref<80x32xf32, #tpu.memory_space<vmem>>, vector<40x32xf32>
    tpu.vector_store %arg18[%c40_113, %c0_114], %138 {strides = array<i32>} : memref<80x32xf32, #tpu.memory_space<vmem>>, vector<40x32xf32>,
    %cst_115 = arith.constant 0.000000e+00 : f32
    %140 = vector.broadcast %cst_115 : f32 to vector<2x512xf32>
    %c0_116 = arith.constant 0 : index
    %c0_117 = arith.constant 0 : index
    %141 = vector.load %arg18[%c0_116, %c0_117] : memref<80x32xf32, #tpu.memory_space<vmem>>, vector<2x32xf32>
    %142 = arith.truncf %141 : vector<2x32xf32> to vector<2x32xbf16>
    %c0_118 = arith.constant 0 : index
    %c0_119 = arith.constant 0 : index
    %143 = vector.load %arg10[%c0_118, %c0_119] : memref<1280x512xbf16, #tpu.memory_space<vmem>>, vector<32x512xbf16>
    %cst_120 = arith.constant dense<0.000000e+00> : vector<2x512xf32>
    %144 = tpu.matmul %142, %143, %cst_120 {dimension_numbers = #tpu.dot_dimension_numbers<[1], [0], [0], [1], [0, 0, 1, 1], [], []>} : vector<2x32xbf16>, vector<32x512xbf16>, vector<2x512xf32> -> vector<2x512xf32>
    %145 = arith.addf %140, %144 : vector<2x512xf32>
    %c2 = arith.constant 2 : index
    %c0_121 = arith.constant 0 : index
    %146 = vector.load %arg18[%c2, %c0_121] : memref<80x32xf32, #tpu.memory_space<vmem>>, vector<2x32xf32>
    %147 = arith.truncf %146 : vector<2x32xf32> to vector<2x32xbf16>
    %c32_122 = arith.constant 32 : index
    %c0_123 = arith.constant 0 : index
    %148 = vector.load %arg10[%c32_122, %c0_123] : memref<1280x512xbf16, #tpu.memory_space<vmem>>, vector<32x512xbf16>
    %cst_124 = arith.constant dense<0.000000e+00> : vector<2x512xf32>
    %149 = tpu.matmul %147, %148, %cst_124 {dimension_numbers = #tpu.dot_dimension_numbers<[1], [0], [0], [1], [0, 0, 1, 1], [], []>} : vector<2x32xbf16>, vector<32x512xbf16>, vector<2x512xf32> -> vector<2x512xf32>
    %150 = arith.addf %145, %149 : vector<2x512xf32>
    %c4 = arith.constant 4 : index
    %c0_125 = arith.constant 0 : index
    %151 = vector.load %arg18[%c4, %c0_125] : memref<80x32xf32, #tpu.memory_space<vmem>>, vector<2x32xf32>
    %152 = arith.truncf %151 : vector<2x32xf32> to vector<2x32xbf16>
    %c64_126 = arith.constant 64 : index
    %c0_127 = arith.constant 0 : index
    %153 = vector.load %arg10[%c64_126, %c0_127] : memref<1280x512xbf16, #tpu.memory_space<vmem>>, vector<32x512xbf16>
    %cst_128 = arith.constant dense<0.000000e+00> : vector<2x512xf32>
    %154 = tpu.matmul %152, %153, %cst_128 {dimension_numbers = #tpu.dot_dimension_numbers<[1], [0], [0], [1], [0, 0, 1, 1], [], []>} : vector<2x32xbf16>, vector<32x512xbf16>, vector<2x512xf32> -> vector<2x512xf32>
    %155 = arith.addf %150, %154 : vector<2x512xf32>
    %c6 = arith.constant 6 : index
    %c0_129 = arith.constant 0 : index
    %156 = vector.load %arg18[%c6, %c0_129] : memref<80x32xf32, #tpu.memory_space<vmem>>, vector<2x32xf32>
    %157 = arith.truncf %156 : vector<2x32xf32> to vector<2x32xbf16>
    %c96_130 = arith.constant 96 : index
    %c0_131 = arith.constant 0 : index
    %158 = vector.load %arg10[%c96_130, %c0_131] : memref<1280x512xbf16, #tpu.memory_space<vmem>>, vector<32x512xbf16>
    %cst_132 = arith.constant dense<0.000000e+00> : vector<2x512xf32>
    %159 = tpu.matmul %157, %158, %cst_132 {dimension_numbers = #tpu.dot_dimension_numbers<[1], [0], [0], [1], [0, 0, 1, 1], [], []>} : vector<2x32xbf16>, vector<32x512xbf16>, vector<2x512xf32> -> vector<2x512xf32>
    %160 = arith.addf %155, %159 : vector<2x512xf32>
    %c8 = arith.constant 8 : index
    %c0_133 = arith.constant 0 : index
    %161 = vector.load %arg18[%c8, %c0_133] : memref<80x32xf32, #tpu.memory_space<vmem>>, vector<2x32xf32>
    %162 = arith.truncf %161 : vector<2x32xf32> to vector<2x32xbf16>
    %c128_134 = arith.constant 128 : index
    %c0_135 = arith.constant 0 : index
    %163 = vector.load %arg10[%c128_134, %c0_135] : memref<1280x512xbf16, #tpu.memory_space<vmem>>, vector<32x512xbf16>
    %cst_136 = arith.constant dense<0.000000e+00> : vector<2x512xf32>
    %164 = tpu.matmul %162, %163, %cst_136 {dimension_numbers = #tpu.dot_dimension_numbers<[1], [0], [0], [1], [0, 0, 1, 1], [], []>} : vector<2x32xbf16>, vector<32x512xbf16>, vector<2x512xf32> -> vector<2x512xf32>
    %165 = arith.addf %160, %164 : vector<2x512xf32>
    %c10_137 = arith.constant 10 : index
    %c0_138 = arith.constant 0 : index
    %166 = vector.load %arg18[%c10_137, %c0_138] : memref<80x32xf32, #tpu.memory_space<vmem>>, vector<2x32xf32>
    %167 = arith.truncf %166 : vector<2x32xf32> to vector<2x32xbf16>
    %c160 = arith.constant 160 : index
    %c0_139 = arith.constant 0 : index
    %168 = vector.load %arg10[%c160, %c0_139] : memref<1280x512xbf16, #tpu.memory_space<vmem>>, vector<32x512xbf16>
    %cst_140 = arith.constant dense<0.000000e+00> : vector<2x512xf32>
    %169 = tpu.matmul %167, %168, %cst_140 {dimension_numbers = #tpu.dot_dimension_numbers<[1], [0], [0], [1], [0, 0, 1, 1], [], []>} : vector<2x32xbf16>, vector<32x512xbf16>, vector<2x512xf32> -> vector<2x512xf32>
    %170 = arith.addf %165, %169 : vector<2x512xf32>
    %c12 = arith.constant 12 : index
    %c0_141 = arith.constant 0 : index
    %171 = vector.load %arg18[%c12, %c0_141] : memref<80x32xf32, #tpu.memory_space<vmem>>, vector<2x32xf32>
    %172 = arith.truncf %171 : vector<2x32xf32> to vector<2x32xbf16>
    %c192 = arith.constant 192 : index
    %c0_142 = arith.constant 0 : index
    %173 = vector.load %arg10[%c192, %c0_142] : memref<1280x512xbf16, #tpu.memory_space<vmem>>, vector<32x512xbf16>
    %cst_143 = arith.constant dense<0.000000e+00> : vector<2x512xf32>
    %174 = tpu.matmul %172, %173, %cst_143 {dimension_numbers = #tpu.dot_dimension_numbers<[1], [0], [0], [1], [0, 0, 1, 1], [], []>} : vector<2x32xbf16>, vector<32x512xbf16>, vector<2x512xf32> -> vector<2x512xf32>
    %175 = arith.addf %170, %174 : vector<2x512xf32>
    %c14 = arith.constant 14 : index
    %c0_144 = arith.constant 0 : index
    %176 = vector.load %arg18[%c14, %c0_144] : memref<80x32xf32, #tpu.memory_space<vmem>>, vector<2x32xf32>
    %177 = arith.truncf %176 : vector<2x32xf32> to vector<2x32xbf16>
    %c224 = arith.constant 224 : index
    %c0_145 = arith.constant 0 : index
    %178 = vector.load %arg10[%c224, %c0_145] : memref<1280x512xbf16, #tpu.memory_space<vmem>>, vector<32x512xbf16>
    %cst_146 = arith.constant dense<0.000000e+00> : vector<2x512xf32>
    %179 = tpu.matmul %177, %178, %cst_146 {dimension_numbers = #tpu.dot_dimension_numbers<[1], [0], [0], [1], [0, 0, 1, 1], [], []>} : vector<2x32xbf16>, vector<32x512xbf16>, vector<2x512xf32> -> vector<2x512xf32>
    %180 = arith.addf %175, %179 : vector<2x512xf32>
    %c16 = arith.constant 16 : index
    %c0_147 = arith.constant 0 : index
    %181 = vector.load %arg18[%c16, %c0_147] : memref<80x32xf32, #tpu.memory_space<vmem>>, vector<2x32xf32>
    %182 = arith.truncf %181 : vector<2x32xf32> to vector<2x32xbf16>
    %c256 = arith.constant 256 : index
    %c0_148 = arith.constant 0 : index
    %183 = vector.load %arg10[%c256, %c0_148] : memref<1280x512xbf16, #tpu.memory_space<vmem>>, vector<32x512xbf16>
    %cst_149 = arith.constant dense<0.000000e+00> : vector<2x512xf32>
    %184 = tpu.matmul %182, %183, %cst_149 {dimension_numbers = #tpu.dot_dimension_numbers<[1], [0], [0], [1], [0, 0, 1, 1], [], []>} : vector<2x32xbf16>, vector<32x512xbf16>, vector<2x512xf32> -> vector<2x512xf32>
    %185 = arith.addf %180, %184 : vector<2x512xf32>
    %c18 = arith.constant 18 : index
    %c0_150 = arith.constant 0 : index
    %186 = vector.load %arg18[%c18, %c0_150] : memref<80x32xf32, #tpu.memory_space<vmem>>, vector<2x32xf32>
    %187 = arith.truncf %186 : vector<2x32xf32> to vector<2x32xbf16>
    %c288 = arith.constant 288 : index
    %c0_151 = arith.constant 0 : index
    %188 = vector.load %arg10[%c288, %c0_151] : memref<1280x512xbf16, #tpu.memory_space<vmem>>, vector<32x512xbf16>
    %cst_152 = arith.constant dense<0.000000e+00> : vector<2x512xf32>
    %189 = tpu.matmul %187, %188, %cst_152 {dimension_numbers = #tpu.dot_dimension_numbers<[1], [0], [0], [1], [0, 0, 1, 1], [], []>} : vector<2x32xbf16>, vector<32x512xbf16>, vector<2x512xf32> -> vector<2x512xf32>
    %190 = arith.addf %185, %189 : vector<2x512xf32>
    %c20_153 = arith.constant 20 : index
    %c0_154 = arith.constant 0 : index
    %191 = vector.load %arg18[%c20_153, %c0_154] : memref<80x32xf32, #tpu.memory_space<vmem>>, vector<2x32xf32>
    %192 = arith.truncf %191 : vector<2x32xf32> to vector<2x32xbf16>
    %c320 = arith.constant 320 : index
    %c0_155 = arith.constant 0 : index
    %193 = vector.load %arg10[%c320, %c0_155] : memref<1280x512xbf16, #tpu.memory_space<vmem>>, vector<32x512xbf16>
    %cst_156 = arith.constant dense<0.000000e+00> : vector<2x512xf32>
    %194 = tpu.matmul %192, %193, %cst_156 {dimension_numbers = #tpu.dot_dimension_numbers<[1], [0], [0], [1], [0, 0, 1, 1], [], []>} : vector<2x32xbf16>, vector<32x512xbf16>, vector<2x512xf32> -> vector<2x512xf32>
    %195 = arith.addf %190, %194 : vector<2x512xf32>
    %c22 = arith.constant 22 : index
    %c0_157 = arith.constant 0 : index
    %196 = vector.load %arg18[%c22, %c0_157] : memref<80x32xf32, #tpu.memory_space<vmem>>, vector<2x32xf32>
    %197 = arith.truncf %196 : vector<2x32xf32> to vector<2x32xbf16>
    %c352 = arith.constant 352 : index
    %c0_158 = arith.constant 0 : index
    %198 = vector.load %arg10[%c352, %c0_158] : memref<1280x512xbf16, #tpu.memory_space<vmem>>, vector<32x512xbf16>
    %cst_159 = arith.constant dense<0.000000e+00> : vector<2x512xf32>
    %199 = tpu.matmul %197, %198, %cst_159 {dimension_numbers = #tpu.dot_dimension_numbers<[1], [0], [0], [1], [0, 0, 1, 1], [], []>} : vector<2x32xbf16>, vector<32x512xbf16>, vector<2x512xf32> -> vector<2x512xf32>
    %200 = arith.addf %195, %199 : vector<2x512xf32>
    %c24 = arith.constant 24 : index
    %c0_160 = arith.constant 0 : index
    %201 = vector.load %arg18[%c24, %c0_160] : memref<80x32xf32, #tpu.memory_space<vmem>>, vector<2x32xf32>
    %202 = arith.truncf %201 : vector<2x32xf32> to vector<2x32xbf16>
    %c384 = arith.constant 384 : index
    %c0_161 = arith.constant 0 : index
    %203 = vector.load %arg10[%c384, %c0_161] : memref<1280x512xbf16, #tpu.memory_space<vmem>>, vector<32x512xbf16>
    %cst_162 = arith.constant dense<0.000000e+00> : vector<2x512xf32>
    %204 = tpu.matmul %202, %203, %cst_162 {dimension_numbers = #tpu.dot_dimension_numbers<[1], [0], [0], [1], [0, 0, 1, 1], [], []>} : vector<2x32xbf16>, vector<32x512xbf16>, vector<2x512xf32> -> vector<2x512xf32>
    %205 = arith.addf %200, %204 : vector<2x512xf32>
    %c26 = arith.constant 26 : index
    %c0_163 = arith.constant 0 : index
    %206 = vector.load %arg18[%c26, %c0_163] : memref<80x32xf32, #tpu.memory_space<vmem>>, vector<2x32xf32>
    %207 = arith.truncf %206 : vector<2x32xf32> to vector<2x32xbf16>
    %c416 = arith.constant 416 : index
    %c0_164 = arith.constant 0 : index
    %208 = vector.load %arg10[%c416, %c0_164] : memref<1280x512xbf16, #tpu.memory_space<vmem>>, vector<32x512xbf16>
    %cst_165 = arith.constant dense<0.000000e+00> : vector<2x512xf32>
    %209 = tpu.matmul %207, %208, %cst_165 {dimension_numbers = #tpu.dot_dimension_numbers<[1], [0], [0], [1], [0, 0, 1, 1], [], []>} : vector<2x32xbf16>, vector<32x512xbf16>, vector<2x512xf32> -> vector<2x512xf32>
    %210 = arith.addf %205, %209 : vector<2x512xf32>
    %c28 = arith.constant 28 : index
    %c0_166 = arith.constant 0 : index
    %211 = vector.load %arg18[%c28, %c0_166] : memref<80x32xf32, #tpu.memory_space<vmem>>, vector<2x32xf32>
    %212 = arith.truncf %211 : vector<2x32xf32> to vector<2x32xbf16>
    %c448 = arith.constant 448 : index
    %c0_167 = arith.constant 0 : index
    %213 = vector.load %arg10[%c448, %c0_167] : memref<1280x512xbf16, #tpu.memory_space<vmem>>, vector<32x512xbf16>
    %cst_168 = arith.constant dense<0.000000e+00> : vector<2x512xf32>
    %214 = tpu.matmul %212, %213, %cst_168 {dimension_numbers = #tpu.dot_dimension_numbers<[1], [0], [0], [1], [0, 0, 1, 1], [], []>} : vector<2x32xbf16>, vector<32x512xbf16>, vector<2x512xf32> -> vector<2x512xf32>
    %215 = arith.addf %210, %214 : vector<2x512xf32>
    %c30 = arith.constant 30 : index
    %c0_169 = arith.constant 0 : index
    %216 = vector.load %arg18[%c30, %c0_169] : memref<80x32xf32, #tpu.memory_space<vmem>>, vector<2x32xf32>
    %217 = arith.truncf %216 : vector<2x32xf32> to vector<2x32xbf16>
    %c480 = arith.constant 480 : index
    %c0_170 = arith.constant 0 : index
    %218 = vector.load %arg10[%c480, %c0_170] : memref<1280x512xbf16, #tpu.memory_space<vmem>>, vector<32x512xbf16>
    %cst_171 = arith.constant dense<0.000000e+00> : vector<2x512xf32>
    %219 = tpu.matmul %217, %218, %cst_171 {dimension_numbers = #tpu.dot_dimension_numbers<[1], [0], [0], [1], [0, 0, 1, 1], [], []>} : vector<2x32xbf16>, vector<32x512xbf16>, vector<2x512xf32> -> vector<2x512xf32>
    %220 = arith.addf %215, %219 : vector<2x512xf32>
    %c32_172 = arith.constant 32 : index
    %c0_173 = arith.constant 0 : index
    %221 = vector.load %arg18[%c32_172, %c0_173] : memref<80x32xf32, #tpu.memory_space<vmem>>, vector<2x32xf32>
    %222 = arith.truncf %221 : vector<2x32xf32> to vector<2x32xbf16>
    %c512 = arith.constant 512 : index
    %c0_174 = arith.constant 0 : index
    %223 = vector.load %arg10[%c512, %c0_174] : memref<1280x512xbf16, #tpu.memory_space<vmem>>, vector<32x512xbf16>
    %cst_175 = arith.constant dense<0.000000e+00> : vector<2x512xf32>
    %224 = tpu.matmul %222, %223, %cst_175 {dimension_numbers = #tpu.dot_dimension_numbers<[1], [0], [0], [1], [0, 0, 1, 1], [], []>} : vector<2x32xbf16>, vector<32x512xbf16>, vector<2x512xf32> -> vector<2x512xf32>
    %225 = arith.addf %220, %224 : vector<2x512xf32>
    %c34 = arith.constant 34 : index
    %c0_176 = arith.constant 0 : index
    %226 = vector.load %arg18[%c34, %c0_176] : memref<80x32xf32, #tpu.memory_space<vmem>>, vector<2x32xf32>
    %227 = arith.truncf %226 : vector<2x32xf32> to vector<2x32xbf16>
    %c544 = arith.constant 544 : index
    %c0_177 = arith.constant 0 : index
    %228 = vector.load %arg10[%c544, %c0_177] : memref<1280x512xbf16, #tpu.memory_space<vmem>>, vector<32x512xbf16>
    %cst_178 = arith.constant dense<0.000000e+00> : vector<2x512xf32>
    %229 = tpu.matmul %227, %228, %cst_178 {dimension_numbers = #tpu.dot_dimension_numbers<[1], [0], [0], [1], [0, 0, 1, 1], [], []>} : vector<2x32xbf16>, vector<32x512xbf16>, vector<2x512xf32> -> vector<2x512xf32>
    %230 = arith.addf %225, %229 : vector<2x512xf32>
    %c36 = arith.constant 36 : index
    %c0_179 = arith.constant 0 : index
    %231 = vector.load %arg18[%c36, %c0_179] : memref<80x32xf32, #tpu.memory_space<vmem>>, vector<2x32xf32>
    %232 = arith.truncf %231 : vector<2x32xf32> to vector<2x32xbf16>
    %c576 = arith.constant 576 : index
    %c0_180 = arith.constant 0 : index
    %233 = vector.load %arg10[%c576, %c0_180] : memref<1280x512xbf16, #tpu.memory_space<vmem>>, vector<32x512xbf16>
    %cst_181 = arith.constant dense<0.000000e+00> : vector<2x512xf32>
    %234 = tpu.matmul %232, %233, %cst_181 {dimension_numbers = #tpu.dot_dimension_numbers<[1], [0], [0], [1], [0, 0, 1, 1], [], []>} : vector<2x32xbf16>, vector<32x512xbf16>, vector<2x512xf32> -> vector<2x512xf32>
    %235 = arith.addf %230, %234 : vector<2x512xf32>
    %c38 = arith.constant 38 : index
    %c0_182 = arith.constant 0 : index
    %236 = vector.load %arg18[%c38, %c0_182] : memref<80x32xf32, #tpu.memory_space<vmem>>, vector<2x32xf32>
    %237 = arith.truncf %236 : vector<2x32xf32> to vector<2x32xbf16>
    %c608 = arith.constant 608 : index
    %c0_183 = arith.constant 0 : index
    %238 = vector.load %arg10[%c608, %c0_183] : memref<1280x512xbf16, #tpu.memory_space<vmem>>, vector<32x512xbf16>
    %cst_184 = arith.constant dense<0.000000e+00> : vector<2x512xf32>
    %239 = tpu.matmul %237, %238, %cst_184 {dimension_numbers = #tpu.dot_dimension_numbers<[1], [0], [0], [1], [0, 0, 1, 1], [], []>} : vector<2x32xbf16>, vector<32x512xbf16>, vector<2x512xf32> -> vector<2x512xf32>
    %240 = arith.addf %235, %239 : vector<2x512xf32>
    %c40_185 = arith.constant 40 : index
    %c0_186 = arith.constant 0 : index
    %241 = vector.load %arg18[%c40_185, %c0_186] : memref<80x32xf32, #tpu.memory_space<vmem>>, vector<2x32xf32>
    %242 = arith.truncf %241 : vector<2x32xf32> to vector<2x32xbf16>
    %c640 = arith.constant 640 : index
    %c0_187 = arith.constant 0 : index
    %243 = vector.load %arg10[%c640, %c0_187] : memref<1280x512xbf16, #tpu.memory_space<vmem>>, vector<32x512xbf16>
    %cst_188 = arith.constant dense<0.000000e+00> : vector<2x512xf32>
    %244 = tpu.matmul %242, %243, %cst_188 {dimension_numbers = #tpu.dot_dimension_numbers<[1], [0], [0], [1], [0, 0, 1, 1], [], []>} : vector<2x32xbf16>, vector<32x512xbf16>, vector<2x512xf32> -> vector<2x512xf32>
    %245 = arith.addf %240, %244 : vector<2x512xf32>
    %c42 = arith.constant 42 : index
    %c0_189 = arith.constant 0 : index
    %246 = vector.load %arg18[%c42, %c0_189] : memref<80x32xf32, #tpu.memory_space<vmem>>, vector<2x32xf32>
    %247 = arith.truncf %246 : vector<2x32xf32> to vector<2x32xbf16>
    %c672 = arith.constant 672 : index
    %c0_190 = arith.constant 0 : index
    %248 = vector.load %arg10[%c672, %c0_190] : memref<1280x512xbf16, #tpu.memory_space<vmem>>, vector<32x512xbf16>
    %cst_191 = arith.constant dense<0.000000e+00> : vector<2x512xf32>
    %249 = tpu.matmul %247, %248, %cst_191 {dimension_numbers = #tpu.dot_dimension_numbers<[1], [0], [0], [1], [0, 0, 1, 1], [], []>} : vector<2x32xbf16>, vector<32x512xbf16>, vector<2x512xf32> -> vector<2x512xf32>
    %250 = arith.addf %245, %249 : vector<2x512xf32>
    %c44 = arith.constant 44 : index
    %c0_192 = arith.constant 0 : index
    %251 = vector.load %arg18[%c44, %c0_192] : memref<80x32xf32, #tpu.memory_space<vmem>>, vector<2x32xf32>
    %252 = arith.truncf %251 : vector<2x32xf32> to vector<2x32xbf16>
    %c704 = arith.constant 704 : index
    %c0_193 = arith.constant 0 : index
    %253 = vector.load %arg10[%c704, %c0_193] : memref<1280x512xbf16, #tpu.memory_space<vmem>>, vector<32x512xbf16>
    %cst_194 = arith.constant dense<0.000000e+00> : vector<2x512xf32>
    %254 = tpu.matmul %252, %253, %cst_194 {dimension_numbers = #tpu.dot_dimension_numbers<[1], [0], [0], [1], [0, 0, 1, 1], [], []>} : vector<2x32xbf16>, vector<32x512xbf16>, vector<2x512xf32> -> vector<2x512xf32>
    %255 = arith.addf %250, %254 : vector<2x512xf32>
    %c46 = arith.constant 46 : index
    %c0_195 = arith.constant 0 : index
    %256 = vector.load %arg18[%c46, %c0_195] : memref<80x32xf32, #tpu.memory_space<vmem>>, vector<2x32xf32>
    %257 = arith.truncf %256 : vector<2x32xf32> to vector<2x32xbf16>
    %c736 = arith.constant 736 : index
    %c0_196 = arith.constant 0 : index
    %258 = vector.load %arg10[%c736, %c0_196] : memref<1280x512xbf16, #tpu.memory_space<vmem>>, vector<32x512xbf16>
    %cst_197 = arith.constant dense<0.000000e+00> : vector<2x512xf32>
    %259 = tpu.matmul %257, %258, %cst_197 {dimension_numbers = #tpu.dot_dimension_numbers<[1], [0], [0], [1], [0, 0, 1, 1], [], []>} : vector<2x32xbf16>, vector<32x512xbf16>, vector<2x512xf32> -> vector<2x512xf32>
    %260 = arith.addf %255, %259 : vector<2x512xf32>
    %c48 = arith.constant 48 : index
    %c0_198 = arith.constant 0 : index
    %261 = vector.load %arg18[%c48, %c0_198] : memref<80x32xf32, #tpu.memory_space<vmem>>, vector<2x32xf32>
    %262 = arith.truncf %261 : vector<2x32xf32> to vector<2x32xbf16>
    %c768 = arith.constant 768 : index
    %c0_199 = arith.constant 0 : index
    %263 = vector.load %arg10[%c768, %c0_199] : memref<1280x512xbf16, #tpu.memory_space<vmem>>, vector<32x512xbf16>
    %cst_200 = arith.constant dense<0.000000e+00> : vector<2x512xf32>
    %264 = tpu.matmul %262, %263, %cst_200 {dimension_numbers = #tpu.dot_dimension_numbers<[1], [0], [0], [1], [0, 0, 1, 1], [], []>} : vector<2x32xbf16>, vector<32x512xbf16>, vector<2x512xf32> -> vector<2x512xf32>
    %265 = arith.addf %260, %264 : vector<2x512xf32>
    %c50 = arith.constant 50 : index
    %c0_201 = arith.constant 0 : index
    %266 = vector.load %arg18[%c50, %c0_201] : memref<80x32xf32, #tpu.memory_space<vmem>>, vector<2x32xf32>
    %267 = arith.truncf %266 : vector<2x32xf32> to vector<2x32xbf16>
    %c800 = arith.constant 800 : index
    %c0_202 = arith.constant 0 : index
    %268 = vector.load %arg10[%c800, %c0_202] : memref<1280x512xbf16, #tpu.memory_space<vmem>>, vector<32x512xbf16>
    %cst_203 = arith.constant dense<0.000000e+00> : vector<2x512xf32>
    %269 = tpu.matmul %267, %268, %cst_203 {dimension_numbers = #tpu.dot_dimension_numbers<[1], [0], [0], [1], [0, 0, 1, 1], [], []>} : vector<2x32xbf16>, vector<32x512xbf16>, vector<2x512xf32> -> vector<2x512xf32>
    %270 = arith.addf %265, %269 : vector<2x512xf32>
    %c52 = arith.constant 52 : index
    %c0_204 = arith.constant 0 : index
    %271 = vector.load %arg18[%c52, %c0_204] : memref<80x32xf32, #tpu.memory_space<vmem>>, vector<2x32xf32>
    %272 = arith.truncf %271 : vector<2x32xf32> to vector<2x32xbf16>
    %c832 = arith.constant 832 : index
    %c0_205 = arith.constant 0 : index
    %273 = vector.load %arg10[%c832, %c0_205] : memref<1280x512xbf16, #tpu.memory_space<vmem>>, vector<32x512xbf16>
    %cst_206 = arith.constant dense<0.000000e+00> : vector<2x512xf32>
    %274 = tpu.matmul %272, %273, %cst_206 {dimension_numbers = #tpu.dot_dimension_numbers<[1], [0], [0], [1], [0, 0, 1, 1], [], []>} : vector<2x32xbf16>, vector<32x512xbf16>, vector<2x512xf32> -> vector<2x512xf32>
    %275 = arith.addf %270, %274 : vector<2x512xf32>
    %c54 = arith.constant 54 : index
    %c0_207 = arith.constant 0 : index
    %276 = vector.load %arg18[%c54, %c0_207] : memref<80x32xf32, #tpu.memory_space<vmem>>, vector<2x32xf32>
    %277 = arith.truncf %276 : vector<2x32xf32> to vector<2x32xbf16>
    %c864 = arith.constant 864 : index
    %c0_208 = arith.constant 0 : index
    %278 = vector.load %arg10[%c864, %c0_208] : memref<1280x512xbf16, #tpu.memory_space<vmem>>, vector<32x512xbf16>
    %cst_209 = arith.constant dense<0.000000e+00> : vector<2x512xf32>
    %279 = tpu.matmul %277, %278, %cst_209 {dimension_numbers = #tpu.dot_dimension_numbers<[1], [0], [0], [1], [0, 0, 1, 1], [], []>} : vector<2x32xbf16>, vector<32x512xbf16>, vector<2x512xf32> -> vector<2x512xf32>
    %280 = arith.addf %275, %279 : vector<2x512xf32>
    %c56 = arith.constant 56 : index
    %c0_210 = arith.constant 0 : index
    %281 = vector.load %arg18[%c56, %c0_210] : memref<80x32xf32, #tpu.memory_space<vmem>>, vector<2x32xf32>
    %282 = arith.truncf %281 : vector<2x32xf32> to vector<2x32xbf16>
    %c896 = arith.constant 896 : index
    %c0_211 = arith.constant 0 : index
    %283 = vector.load %arg10[%c896, %c0_211] : memref<1280x512xbf16, #tpu.memory_space<vmem>>, vector<32x512xbf16>
    %cst_212 = arith.constant dense<0.000000e+00> : vector<2x512xf32>
    %284 = tpu.matmul %282, %283, %cst_212 {dimension_numbers = #tpu.dot_dimension_numbers<[1], [0], [0], [1], [0, 0, 1, 1], [], []>} : vector<2x32xbf16>, vector<32x512xbf16>, vector<2x512xf32> -> vector<2x512xf32>
    %285 = arith.addf %280, %284 : vector<2x512xf32>
    %c58 = arith.constant 58 : index
    %c0_213 = arith.constant 0 : index
    %286 = vector.load %arg18[%c58, %c0_213] : memref<80x32xf32, #tpu.memory_space<vmem>>, vector<2x32xf32>
    %287 = arith.truncf %286 : vector<2x32xf32> to vector<2x32xbf16>
    %c928 = arith.constant 928 : index
    %c0_214 = arith.constant 0 : index
    %288 = vector.load %arg10[%c928, %c0_214] : memref<1280x512xbf16, #tpu.memory_space<vmem>>, vector<32x512xbf16>
    %cst_215 = arith.constant dense<0.000000e+00> : vector<2x512xf32>
    %289 = tpu.matmul %287, %288, %cst_215 {dimension_numbers = #tpu.dot_dimension_numbers<[1], [0], [0], [1], [0, 0, 1, 1], [], []>} : vector<2x32xbf16>, vector<32x512xbf16>, vector<2x512xf32> -> vector<2x512xf32>
    %290 = arith.addf %285, %289 : vector<2x512xf32>
    %c60_216 = arith.constant 60 : index
    %c0_217 = arith.constant 0 : index
    %291 = vector.load %arg18[%c60_216, %c0_217] : memref<80x32xf32, #tpu.memory_space<vmem>>, vector<2x32xf32>
    %292 = arith.truncf %291 : vector<2x32xf32> to vector<2x32xbf16>
    %c960 = arith.constant 960 : index
    %c0_218 = arith.constant 0 : index
    %293 = vector.load %arg10[%c960, %c0_218] : memref<1280x512xbf16, #tpu.memory_space<vmem>>, vector<32x512xbf16>
    %cst_219 = arith.constant dense<0.000000e+00> : vector<2x512xf32>
    %294 = tpu.matmul %292, %293, %cst_219 {dimension_numbers = #tpu.dot_dimension_numbers<[1], [0], [0], [1], [0, 0, 1, 1], [], []>} : vector<2x32xbf16>, vector<32x512xbf16>, vector<2x512xf32> -> vector<2x512xf32>
    %295 = arith.addf %290, %294 : vector<2x512xf32>
    %c62 = arith.constant 62 : index
    %c0_220 = arith.constant 0 : index
    %296 = vector.load %arg18[%c62, %c0_220] : memref<80x32xf32, #tpu.memory_space<vmem>>, vector<2x32xf32>
    %297 = arith.truncf %296 : vector<2x32xf32> to vector<2x32xbf16>
    %c992 = arith.constant 992 : index
    %c0_221 = arith.constant 0 : index
    %298 = vector.load %arg10[%c992, %c0_221] : memref<1280x512xbf16, #tpu.memory_space<vmem>>, vector<32x512xbf16>
    %cst_222 = arith.constant dense<0.000000e+00> : vector<2x512xf32>
    %299 = tpu.matmul %297, %298, %cst_222 {dimension_numbers = #tpu.dot_dimension_numbers<[1], [0], [0], [1], [0, 0, 1, 1], [], []>} : vector<2x32xbf16>, vector<32x512xbf16>, vector<2x512xf32> -> vector<2x512xf32>
    %300 = arith.addf %295, %299 : vector<2x512xf32>
    %c64_223 = arith.constant 64 : index
    %c0_224 = arith.constant 0 : index
    %301 = vector.load %arg18[%c64_223, %c0_224] : memref<80x32xf32, #tpu.memory_space<vmem>>, vector<2x32xf32>
    %302 = arith.truncf %301 : vector<2x32xf32> to vector<2x32xbf16>
    %c1024 = arith.constant 1024 : index
    %c0_225 = arith.constant 0 : index
    %303 = vector.load %arg10[%c1024, %c0_225] : memref<1280x512xbf16, #tpu.memory_space<vmem>>, vector<32x512xbf16>
    %cst_226 = arith.constant dense<0.000000e+00> : vector<2x512xf32>
    %304 = tpu.matmul %302, %303, %cst_226 {dimension_numbers = #tpu.dot_dimension_numbers<[1], [0], [0], [1], [0, 0, 1, 1], [], []>} : vector<2x32xbf16>, vector<32x512xbf16>, vector<2x512xf32> -> vector<2x512xf32>
    %305 = arith.addf %300, %304 : vector<2x512xf32>
    %c66 = arith.constant 66 : index
    %c0_227 = arith.constant 0 : index
    %306 = vector.load %arg18[%c66, %c0_227] : memref<80x32xf32, #tpu.memory_space<vmem>>, vector<2x32xf32>
    %307 = arith.truncf %306 : vector<2x32xf32> to vector<2x32xbf16>
    %c1056 = arith.constant 1056 : index
    %c0_228 = arith.constant 0 : index
    %308 = vector.load %arg10[%c1056, %c0_228] : memref<1280x512xbf16, #tpu.memory_space<vmem>>, vector<32x512xbf16>
    %cst_229 = arith.constant dense<0.000000e+00> : vector<2x512xf32>
    %309 = tpu.matmul %307, %308, %cst_229 {dimension_numbers = #tpu.dot_dimension_numbers<[1], [0], [0], [1], [0, 0, 1, 1], [], []>} : vector<2x32xbf16>, vector<32x512xbf16>, vector<2x512xf32> -> vector<2x512xf32>
    %310 = arith.addf %305, %309 : vector<2x512xf32>
    %c68 = arith.constant 68 : index
    %c0_230 = arith.constant 0 : index
    %311 = vector.load %arg18[%c68, %c0_230] : memref<80x32xf32, #tpu.memory_space<vmem>>, vector<2x32xf32>
    %312 = arith.truncf %311 : vector<2x32xf32> to vector<2x32xbf16>
    %c1088 = arith.constant 1088 : index
    %c0_231 = arith.constant 0 : index
    %313 = vector.load %arg10[%c1088, %c0_231] : memref<1280x512xbf16, #tpu.memory_space<vmem>>, vector<32x512xbf16>
    %cst_232 = arith.constant dense<0.000000e+00> : vector<2x512xf32>
    %314 = tpu.matmul %312, %313, %cst_232 {dimension_numbers = #tpu.dot_dimension_numbers<[1], [0], [0], [1], [0, 0, 1, 1], [], []>} : vector<2x32xbf16>, vector<32x512xbf16>, vector<2x512xf32> -> vector<2x512xf32>
    %315 = arith.addf %310, %314 : vector<2x512xf32>
    %c70 = arith.constant 70 : index
    %c0_233 = arith.constant 0 : index
    %316 = vector.load %arg18[%c70, %c0_233] : memref<80x32xf32, #tpu.memory_space<vmem>>, vector<2x32xf32>
    %317 = arith.truncf %316 : vector<2x32xf32> to vector<2x32xbf16>
    %c1120 = arith.constant 1120 : index
    %c0_234 = arith.constant 0 : index
    %318 = vector.load %arg10[%c1120, %c0_234] : memref<1280x512xbf16, #tpu.memory_space<vmem>>, vector<32x512xbf16>
    %cst_235 = arith.constant dense<0.000000e+00> : vector<2x512xf32>
    %319 = tpu.matmul %317, %318, %cst_235 {dimension_numbers = #tpu.dot_dimension_numbers<[1], [0], [0], [1], [0, 0, 1, 1], [], []>} : vector<2x32xbf16>, vector<32x512xbf16>, vector<2x512xf32> -> vector<2x512xf32>
    %320 = arith.addf %315, %319 : vector<2x512xf32>
    %c72 = arith.constant 72 : index
    %c0_236 = arith.constant 0 : index
    %321 = vector.load %arg18[%c72, %c0_236] : memref<80x32xf32, #tpu.memory_space<vmem>>, vector<2x32xf32>
    %322 = arith.truncf %321 : vector<2x32xf32> to vector<2x32xbf16>
    %c1152 = arith.constant 1152 : index
    %c0_237 = arith.constant 0 : index
    %323 = vector.load %arg10[%c1152, %c0_237] : memref<1280x512xbf16, #tpu.memory_space<vmem>>, vector<32x512xbf16>
    %cst_238 = arith.constant dense<0.000000e+00> : vector<2x512xf32>
    %324 = tpu.matmul %322, %323, %cst_238 {dimension_numbers = #tpu.dot_dimension_numbers<[1], [0], [0], [1], [0, 0, 1, 1], [], []>} : vector<2x32xbf16>, vector<32x512xbf16>, vector<2x512xf32> -> vector<2x512xf32>
    %325 = arith.addf %320, %324 : vector<2x512xf32>
    %c74 = arith.constant 74 : index
    %c0_239 = arith.constant 0 : index
    %326 = vector.load %arg18[%c74, %c0_239] : memref<80x32xf32, #tpu.memory_space<vmem>>, vector<2x32xf32>
    %327 = arith.truncf %326 : vector<2x32xf32> to vector<2x32xbf16>
    %c1184 = arith.constant 1184 : index
    %c0_240 = arith.constant 0 : index
    %328 = vector.load %arg10[%c1184, %c0_240] : memref<1280x512xbf16, #tpu.memory_space<vmem>>, vector<32x512xbf16>
    %cst_241 = arith.constant dense<0.000000e+00> : vector<2x512xf32>
    %329 = tpu.matmul %327, %328, %cst_241 {dimension_numbers = #tpu.dot_dimension_numbers<[1], [0], [0], [1], [0, 0, 1, 1], [], []>} : vector<2x32xbf16>, vector<32x512xbf16>, vector<2x512xf32> -> vector<2x512xf32>
    %330 = arith.addf %325, %329 : vector<2x512xf32>
    %c76 = arith.constant 76 : index
    %c0_242 = arith.constant 0 : index
    %331 = vector.load %arg18[%c76, %c0_242] : memref<80x32xf32, #tpu.memory_space<vmem>>, vector<2x32xf32>
    %332 = arith.truncf %331 : vector<2x32xf32> to vector<2x32xbf16>
    %c1216 = arith.constant 1216 : index
    %c0_243 = arith.constant 0 : index
    %333 = vector.load %arg10[%c1216, %c0_243] : memref<1280x512xbf16, #tpu.memory_space<vmem>>, vector<32x512xbf16>
    %cst_244 = arith.constant dense<0.000000e+00> : vector<2x512xf32>
    %334 = tpu.matmul %332, %333, %cst_244 {dimension_numbers = #tpu.dot_dimension_numbers<[1], [0], [0], [1], [0, 0, 1, 1], [], []>} : vector<2x32xbf16>, vector<32x512xbf16>, vector<2x512xf32> -> vector<2x512xf32>
    %335 = arith.addf %330, %334 : vector<2x512xf32>
    %c78 = arith.constant 78 : index
    %c0_245 = arith.constant 0 : index
    %336 = vector.load %arg18[%c78, %c0_245] : memref<80x32xf32, #tpu.memory_space<vmem>>, vector<2x32xf32>
    %337 = arith.truncf %336 : vector<2x32xf32> to vector<2x32xbf16>
    %c1248 = arith.constant 1248 : index
    %c0_246 = arith.constant 0 : index
    %338 = vector.load %arg10[%c1248, %c0_246] : memref<1280x512xbf16, #tpu.memory_space<vmem>>, vector<32x512xbf16>
    %cst_247 = arith.constant dense<0.000000e+00> : vector<2x512xf32>
    %339 = tpu.matmul %337, %338, %cst_247 {dimension_numbers = #tpu.dot_dimension_numbers<[1], [0], [0], [1], [0, 0, 1, 1], [], []>} : vector<2x32xbf16>, vector<32x512xbf16>, vector<2x512xf32> -> vector<2x512xf32>
    %340 = arith.addf %335, %339 : vector<2x512xf32>
    %c0_248 = arith.constant 0 : index
    %c0_249 = arith.constant 0 : index
    %341 = vector.load %arg11[%c0_248, %c0_249] : memref<1x512xf32, #tpu.memory_space<vmem>>, vector<1x512xf32>
    %342 = vector.broadcast %341 : vector<1x512xf32> to vector<2x512xf32>
    %343 = arith.addf %340, %342 : vector<2x512xf32>
    %cst_250 = arith.constant 0.000000e+00 : f32
    %344 = vector.broadcast %cst_250 : f32 to vector<2x512xf32>
    %345 = arith.cmpf ogt, %343, %344 : vector<2x512xf32>
    %cst_251 = arith.constant 0.00999999977 : f32
    %346 = vector.broadcast %cst_251 : f32 to vector<2x512xf32>
    %347 = arith.mulf %346, %343 : vector<2x512xf32>
    %348 = arith.select %345, %343, %347 : vector<2x512xi1>, vector<2x512xf32>
    %349 = arith.truncf %348 : vector<2x512xf32> to vector<2x512xbf16>
    %c0_252 = arith.constant 0 : index
    %c0_253 = arith.constant 0 : index
    %350 = vector.load %arg12[%c0_252, %c0_253] : memref<512x256xbf16, #tpu.memory_space<vmem>>, vector<512x256xbf16>
    %cst_254 = arith.constant dense<0.000000e+00> : vector<2x256xf32>
    %351 = tpu.matmul %349, %350, %cst_254 {dimension_numbers = #tpu.dot_dimension_numbers<[1], [0], [0], [1], [0, 0, 1, 1], [], []>} : vector<2x512xbf16>, vector<512x256xbf16>, vector<2x256xf32> -> vector<2x256xf32>
    %c0_255 = arith.constant 0 : index
    %c0_256 = arith.constant 0 : index
    %352 = vector.load %arg13[%c0_255, %c0_256] : memref<1x256xf32, #tpu.memory_space<vmem>>, vector<1x256xf32>
    %353 = vector.broadcast %352 : vector<1x256xf32> to vector<2x256xf32>
    %354 = arith.addf %351, %353 : vector<2x256xf32>
    %cst_257 = arith.constant 0.000000e+00 : f32
    %355 = vector.broadcast %cst_257 : f32 to vector<2x256xf32>
    %356 = arith.cmpf ogt, %354, %355 : vector<2x256xf32>
    %cst_258 = arith.constant 0.00999999977 : f32
    %357 = vector.broadcast %cst_258 : f32 to vector<2x256xf32>
    %358 = arith.mulf %357, %354 : vector<2x256xf32>
    %359 = arith.select %356, %354, %358 : vector<2x256xi1>, vector<2x256xf32>
    %360 = arith.truncf %359 : vector<2x256xf32> to vector<2x256xbf16>
    %c0_259 = arith.constant 0 : index
    %c0_260 = arith.constant 0 : index
    %361 = vector.load %arg14[%c0_259, %c0_260] : memref<256x10xbf16, #tpu.memory_space<vmem>>, vector<256x10xbf16>
    %cst_261 = arith.constant dense<0.000000e+00> : vector<2x10xf32>
    %362 = tpu.matmul %360, %361, %cst_261 {dimension_numbers = #tpu.dot_dimension_numbers<[1], [0], [0], [1], [0, 0, 1, 1], [], []>} : vector<2x256xbf16>, vector<256x10xbf16>, vector<2x10xf32> -> vector<2x10xf32>
    %c0_262 = arith.constant 0 : index
    %c0_263 = arith.constant 0 : index
    %363 = vector.load %arg15[%c0_262, %c0_263] : memref<1x10xf32, #tpu.memory_space<vmem>>, vector<1x10xf32>
    %364 = vector.broadcast %363 : vector<1x10xf32> to vector<2x10xf32>
    %365 = arith.addf %362, %364 : vector<2x10xf32>
    %cst_264 = arith.constant dense<0xFF800000> : vector<2xf32>
    %366 = vector.multi_reduction <maximumf>, %365, %cst_264 [1] : vector<2x10xf32> to vector<2xf32>
    %367 = vector.shape_cast %366 : vector<2xf32> to vector<2x1xf32>
    %368 = vector.broadcast %367 : vector<2x1xf32> to vector<2x10xf32>
    %369 = arith.subf %365, %368 : vector<2x10xf32>
    %370 = math.exp %369 : vector<2x10xf32>
    %cst_265 = arith.constant dense<0.000000e+00> : vector<2xf32>
    %371 = vector.multi_reduction <add>, %370, %cst_265 [1] : vector<2x10xf32> to vector<2xf32>
    %372 = vector.shape_cast %371 : vector<2xf32> to vector<2x1xf32>
    %373 = tpu.reciprocal %372 {approx = true} : vector<2x1xf32> -> vector<2x1xf32>
    %374 = vector.broadcast %373 : vector<2x1xf32> to vector<2x10xf32>
    %375 = arith.mulf %370, %374 : vector<2x10xf32>
    %c0_266 = arith.constant 0 : index
    %c0_267 = arith.constant 0 : index
    %376 = vector.load %arg16[%c0_266, %c0_267] : memref<2x10xf32, #tpu.memory_space<vmem>>, vector<2x10xf32>
    tpu.vector_store %arg16[%c0_266, %c0_267], %375 {strides = array<i32>} : memref<2x10xf32, #tpu.memory_space<vmem>>, vector<2x10xf32>,
    return
  }
}

</mosaic_0001>

<bundles_post_ra>
// kernel: actor2_forward.1
= control target key start
LH: loop header
LB: loop body
LE: loop exit
PB: predicated region body
PF: predicated region fallthrough
CT: control target
= control target key end

     0   :  { %s12742_s0 = inlined_call_operand.vmem [shape: f32[200,5], index: 0, kind: input, shape index: {}]   ;;  %s12743_s1 = inlined_call_operand.vmem [shape: f32[200,5], index: 1, kind: input, shape index: {}]   ;;  %s12744_s2 = inlined_call_operand.hbm [shape: bf16[25,32], index: 2, kind: input, shape index: {}]   ;;  %s12745_s3 = inlined_call_operand.hbm [shape: f32[1,32], index: 3, kind: input, shape index: {}]   ;;  %s12746_s4 = inlined_call_operand.vmem [shape: bf16[160,32], index: 4, kind: input, shape index: {}]   ;;  %s12747_s5 = inlined_call_operand.hbm [shape: f32[1,32], index: 5, kind: input, shape index: {}]   ;;  %s12748_s6 = inlined_call_operand.hbm [shape: bf16[25,32], index: 6, kind: input, shape index: {}]   ;;  %s12749_s7 = inlined_call_operand.hbm [shape: f32[1,32], index: 7, kind: input, shape index: {}]   ;;  %s12750_s8 = inlined_call_operand.vmem [shape: bf16[160,32], index: 8, kind: input, shape index: {}]   ;;  %s12751_s9 = inlined_call_operand.hbm [shape: f32[1,32], index: 9, kind: input, shape index: {}]   ;;  %s12752_s10 = inlined_call_operand.hbm [shape: bf16[1280,512], index: 10, kind: input, shape index: {}]   ;;  %s12753_s11 = inlined_call_operand.hbm [shape: f32[1,512], index: 11, kind: input, shape index: {}]   ;;  %s12754_s12 = inlined_call_operand.hbm [shape: bf16[512,256], index: 12, kind: input, shape index: {}]   ;;  %s12755_s13 = inlined_call_operand.hbm [shape: f32[1,256], index: 13, kind: input, shape index: {}]   ;;  %s12756_s14 = inlined_call_operand.vmem [shape: bf16[256,10], index: 14, kind: input, shape index: {}]   ;;  %s12757_s15 = inlined_call_operand.hbm [shape: f32[1,10], index: 15, kind: input, shape index: {}]   ;;  %s12758_s16 = inlined_call_operand.hbm [shape: f32[2,10], index: 16, kind: output, shape index: {}]  }
   0x1   :  { %12760 = sst [smem:[#allocation30_spill]] %s12742_s0 }
   0x2   :  { %21 = vsyncpa [#allocation5], 0 }
   0x3   :  { %22 = vsyncpa [#allocation8], 0 }
   0x4   :  { %23 = vsyncpa [#allocation11], 0 }
   0x5   :  { %24 = vsyncpa [#allocation14], 0 }
   0x6   :  { %25 = vsyncpa [#allocation17], 0 }
   0x7   :  { %26 = vsyncpa [#allocation20], 0 }
   0x8   :  { %27 = vsyncpa [#allocation6], 0  ;;  %s11423_s21 = smov [#allocation7]   ;;  %s11145_s25 = scalar_lea.hbm %s12745_s3, 16 }
   0x9   :  { %s50_s22 = sshll.u32 %s11423_s21, 4  ;;  %p11146_p0 = scmp.ne.s32.totalorder %s12745_s3, %s11145_s25  ;;  %s51_s22 = int_to_ptr.vmem [resolvable:$true] %s50_s22 }
   0xa   :  { %p11149_p1 = scmp.lt.u32.totalorder %s11145_s25, %s12745_s3 }
   0xc   :  { %p11151_p2 = pnand %p11149_p1, %p11146_p0 }
   0xe   :  { %11154 = shalt.err (!%p11151_p2)
}
   0xf   :  { %s11155_s30 = scalar_lea.vmem %s51_s22, 16  ;;  %s11159_s0 = scalar_lea.vmem %s51_s22, 32 }
  0x10   :  { %p11156_p3 = scmp.ne.s32.totalorder %s51_s22, %s11155_s30  ;;  %p11160_p4 = scmp.lt.s32.totalorder %s51_s22, %s51_s22 }
  0x11   :  { %p11161_p5 = scmp.lt.s32.totalorder %s11159_s0, %s11155_s30 }
  0x13   :  { %p11162_p6 = por %p11161_p5, %p11160_p4 }
  0x15   :  { %p11163_p7 = pnand %p11162_p6, %p11156_p3 }
  0x17   :  { %11166 = shalt.err (!%p11163_p7)
}
  0x18   :  { %53 = dma.hbm_to_vmem [thread:$0]  %s12745_s3, 16, %s51_s22, [#allocation8]  }
  0x19   :  { %s11424_s19 = smov [#allocation10]   ;;  %s11425_s21 = smov [#allocation13]  }
  0x1a   :  { %s71_s20 = sshll.u32 %s11424_s19, 4  ;;  %s96_s23 = sshll.u32 %s11425_s21, 4  ;;  %s72_s20 = int_to_ptr.vmem [resolvable:$true] %s71_s20  ;;  %s97_s23 = int_to_ptr.vmem [resolvable:$true] %s96_s23 }
  0x1b   :  { %s11167_s26 = scalar_lea.hbm %s12748_s6, 256 }
  0x1c   :  { %p11168_p8 = scmp.ne.s32.totalorder %s12748_s6, %s11167_s26  ;;  %p11171_p9 = scmp.lt.u32.totalorder %s11167_s26, %s12748_s6 }
  0x1e   :  { %p11173_p10 = pnand %p11171_p9, %p11168_p8 }
  0x20   :  { %11176 = shalt.err (!%p11173_p10)
}
  0x21   :  { %s11177_s3 = scalar_lea.vmem %s72_s20, 256  ;;  %p11182_p12 = scmp.lt.s32.totalorder %s72_s20, %s72_s20 }
  0x22   :  { %p11178_p11 = scmp.ne.s32.totalorder %s72_s20, %s11177_s3  ;;  %p11183_p13 = scmp.lt.s32.totalorder %s11177_s3, %s11177_s3 }
  0x24   :  { %p11184_p0 = por %p11183_p13, %p11182_p12 }
  0x26   :  { %p11185_p1 = pnand %p11184_p0, %p11178_p11 }
  0x28   :  { %11188 = shalt.err (!%p11185_p1)
}
  0x29   :  { %s11426_s22 = smov 64   ;;  %s11427_s0 = smov 4  }
  0x2a   :  { %77 = dma.hbm_to_vmem [thread:$0]  %s12748_s6, 256, %s72_s20, [#allocation11], %s11426_s22, %s11426_s22, %s11427_s0  }
  0x2b   :  { %s11189_s24 = scalar_lea.hbm %s12751_s9, 16 }
  0x2c   :  { %p11190_p2 = scmp.ne.s32.totalorder %s12751_s9, %s11189_s24  ;;  %p11193_p3 = scmp.lt.u32.totalorder %s11189_s24, %s12751_s9 }
  0x2e   :  { %p11195_p4 = pnand %p11193_p3, %p11190_p2 }
  0x30   :  { %11198 = shalt.err (!%p11195_p4)
}
  0x31   :  { %s11199_s29 = scalar_lea.vmem %s97_s23, 16  ;;  %s11203_s30 = scalar_lea.vmem %s97_s23, 32 }
  0x32   :  { %p11200_p5 = scmp.ne.s32.totalorder %s97_s23, %s11199_s29  ;;  %p11204_p6 = scmp.lt.s32.totalorder %s97_s23, %s97_s23 }
  0x33   :  { %p11205_p7 = scmp.lt.s32.totalorder %s11203_s30, %s11199_s29 }
  0x35   :  { %p11206_p8 = por %p11205_p7, %p11204_p6 }
  0x37   :  { %p11207_p9 = pnand %p11206_p8, %p11200_p5 }
  0x39   :  { %11210 = shalt.err (!%p11207_p9)
}
  0x3a   :  { %99 = dma.hbm_to_vmem [thread:$0]  %s12751_s9, 16, %s97_s23, [#allocation14]  }
  0x3b   :  { %s11428_s3 = smov [#allocation16]   ;;  %s11429_s18 = smov [#allocation19]  }
  0x3c   :  { %s118_s17 = sshll.u32 %s11428_s3, 4  ;;  %s140_s19 = sshll.u32 %s11429_s18, 4  ;;  %s119_s17 = int_to_ptr.vmem [resolvable:$true] %s118_s17  ;;  %s141_s19 = int_to_ptr.vmem [resolvable:$true] %s140_s19 }
  0x3d   :  { %s11211_s25 = scalar_lea.hbm %s12753_s11, 64 }
  0x3e   :  { %p11212_p10 = scmp.ne.s32.totalorder %s12753_s11, %s11211_s25  ;;  %p11215_p11 = scmp.lt.u32.totalorder %s11211_s25, %s12753_s11 }
  0x40   :  { %p11217_p12 = pnand %p11215_p11, %p11212_p10 }
  0x42   :  { %11220 = shalt.err (!%p11217_p12)
}
  0x43   :  { %s11221_s9 = scalar_lea.vmem %s119_s17, 64  ;;  %p11226_p0 = scmp.lt.s32.totalorder %s119_s17, %s119_s17 }
  0x44   :  { %p11222_p13 = scmp.ne.s32.totalorder %s119_s17, %s11221_s9  ;;  %p11227_p1 = scmp.lt.s32.totalorder %s11221_s9, %s11221_s9 }
  0x46   :  { %p11228_p2 = por %p11227_p1, %p11226_p0 }
  0x48   :  { %p11229_p3 = pnand %p11228_p2, %p11222_p13 }
  0x4a   :  { %11232 = shalt.err (!%p11229_p3)
}
  0x4b   :  { %121 = dma.hbm_to_vmem [thread:$0]  %s12753_s11, 64, %s119_s17, [#allocation17]  }
  0x4c   :  { %s11233_s3 = scalar_lea.hbm %s12755_s13, 32 }
  0x4d   :  { %p11234_p4 = scmp.ne.s32.totalorder %s12755_s13, %s11233_s3  ;;  %p11237_p5 = scmp.lt.u32.totalorder %s11233_s3, %s12755_s13 }
  0x4f   :  { %p11239_p6 = pnand %p11237_p5, %p11234_p4 }
  0x51   :  { %11242 = shalt.err (!%p11239_p6)
}
  0x52   :  { %s11243_s26 = scalar_lea.vmem %s141_s19, 32  ;;  %p11248_p8 = scmp.lt.s32.totalorder %s141_s19, %s141_s19 }
  0x53   :  { %p11244_p7 = scmp.ne.s32.totalorder %s141_s19, %s11243_s26  ;;  %p11249_p9 = scmp.lt.s32.totalorder %s11243_s26, %s11243_s26 }
  0x55   :  { %p11250_p10 = por %p11249_p9, %p11248_p8 }
  0x57   :  { %p11251_p11 = pnand %p11250_p10, %p11244_p7 }
  0x59   :  { %11254 = shalt.err (!%p11251_p11)
}
  0x5a   :  { %143 = dma.hbm_to_vmem [thread:$0]  %s12755_s13, 32, %s141_s19, [#allocation20]  }
  0x5b   :  { %s11430_s27 = smov [#allocation4]   ;;  %s11431_s29 = smov [#allocation9]  }
  0x5c   :  { %s37_s28 = sshll.u32 %s11430_s27, 4  ;;  %s62_s9 = sshll.u32 %s11431_s29, 4  ;;  %s38_s28 = int_to_ptr.vmem [resolvable:$true] %s37_s28  ;;  %s63_s9 = int_to_ptr.vmem [resolvable:$true] %s62_s9 }
  0x5d   :  { %s11255_s6 = scalar_lea.hbm %s12744_s2, 256 }
  0x5e   :  { %p11256_p12 = scmp.ne.s32.totalorder %s12744_s2, %s11255_s6  ;;  %p11259_p13 = scmp.lt.u32.totalorder %s11255_s6, %s12744_s2 }
  0x60   :  { %p11261_p0 = pnand %p11259_p13, %p11256_p12 }
  0x62   :  { %11264 = shalt.err (!%p11261_p0)
}
  0x63   :  { %s11265_s13 = scalar_lea.vmem %s38_s28, 256  ;;  %p11270_p2 = scmp.lt.s32.totalorder %s38_s28, %s38_s28 }
  0x64   :  { %p11266_p1 = scmp.ne.s32.totalorder %s38_s28, %s11265_s13  ;;  %p11271_p3 = scmp.lt.s32.totalorder %s11265_s13, %s11265_s13 }
  0x66   :  { %p11272_p4 = por %p11271_p3, %p11270_p2 }
  0x68   :  { %p11273_p5 = pnand %p11272_p4, %p11266_p1 }
  0x6a   :  { %11276 = shalt.err (!%p11273_p5)
}
  0x6b   :  { %43 = dma.hbm_to_vmem [thread:$0]  %s12744_s2, 256, %s38_s28, [#allocation5], %s11426_s22, %s11426_s22, %s11427_s0  }
  0x6c   :  { %s11277_s11 = scalar_lea.hbm %s12747_s5, 16 }
  0x6d   :  { %p11278_p6 = scmp.ne.s32.totalorder %s12747_s5, %s11277_s11  ;;  %p11281_p7 = scmp.lt.u32.totalorder %s11277_s11, %s12747_s5 }
  0x6f   :  { %p11283_p8 = pnand %p11281_p7, %p11278_p6 }
  0x71   :  { %11286 = shalt.err (!%p11283_p8)
}
  0x72   :  { %s11287_s30 = scalar_lea.vmem %s63_s9, 16  ;;  %s11291_s6 = scalar_lea.vmem %s63_s9, 32 }
  0x73   :  { %p11288_p9 = scmp.ne.s32.totalorder %s63_s9, %s11287_s30  ;;  %p11292_p10 = scmp.lt.s32.totalorder %s63_s9, %s63_s9 }
  0x74   :  { %p11293_p11 = scmp.lt.s32.totalorder %s11291_s6, %s11287_s30 }
  0x76   :  { %p11294_p12 = por %p11293_p11, %p11292_p10 }
  0x78   :  { %p11295_p13 = pnand %p11294_p12, %p11288_p9 }
  0x7a   :  { %11298 = shalt.err (!%p11295_p13)
}
  0x7b   :  { %65 = dma.hbm_to_vmem [thread:$0]  %s12747_s5, 16, %s63_s9, [#allocation8]  }
  0x7c   :  { %s11432_s0 = smov [#allocation12]   ;;  %s11433_s20 = smov [#allocation15]  }
  0x7d   :  { %s84_s28 = sshll.u32 %s11432_s0, 4  ;;  %s105_s3 = sshll.u32 %s11433_s20, 4  ;;  %s85_s28 = int_to_ptr.vmem [resolvable:$true] %s84_s28  ;;  %s106_s3 = int_to_ptr.vmem [resolvable:$true] %s105_s3 }
  0x7e   :  { %s11299_s13 = scalar_lea.hbm %s12749_s7, 16 }
  0x7f   :  { %p11300_p0 = scmp.ne.s32.totalorder %s12749_s7, %s11299_s13  ;;  %p11303_p1 = scmp.lt.u32.totalorder %s11299_s13, %s12749_s7 }
  0x81   :  { %p11305_p2 = pnand %p11303_p1, %p11300_p0 }
  0x83   :  { %11308 = shalt.err (!%p11305_p2)
}
  0x84   :  { %s11309_s5 = scalar_lea.vmem %s85_s28, 16  ;;  %s11313_s9 = scalar_lea.vmem %s85_s28, 32 }
  0x85   :  { %p11310_p3 = scmp.ne.s32.totalorder %s85_s28, %s11309_s5  ;;  %p11314_p4 = scmp.lt.s32.totalorder %s85_s28, %s85_s28 }
  0x86   :  { %p11315_p5 = scmp.lt.s32.totalorder %s11313_s9, %s11309_s5 }
  0x88   :  { %p11316_p6 = por %p11315_p5, %p11314_p4 }
  0x8a   :  { %p11317_p7 = pnand %p11316_p6, %p11310_p3 }
  0x8c   :  { %11320 = shalt.err (!%p11317_p7)
}
  0x8d   :  { %87 = dma.hbm_to_vmem [thread:$0]  %s12749_s7, 16, %s85_s28, [#allocation11]  }
  0x8e   :  { %s11321_s23 = scalar_lea.hbm %s12752_s10, 40960 }
  0x8f   :  { %p11322_p8 = scmp.ne.s32.totalorder %s12752_s10, %s11321_s23  ;;  %p11325_p9 = scmp.lt.u32.totalorder %s11321_s23, %s12752_s10 }
  0x91   :  { %p11327_p10 = pnand %p11325_p9, %p11322_p8 }
  0x93   :  { %11330 = shalt.err (!%p11327_p10)
}
  0x94   :  { %s11331_s0 = scalar_lea.vmem %s106_s3, 40960  ;;  %p11336_p12 = scmp.lt.s32.totalorder %s106_s3, %s106_s3 }
  0x95   :  { %p11332_p11 = scmp.ne.s32.totalorder %s106_s3, %s11331_s0  ;;  %p11337_p13 = scmp.lt.s32.totalorder %s11331_s0, %s11331_s0 }
  0x97   :  { %p11338_p0 = por %p11337_p13, %p11336_p12 }
  0x99   :  { %p11339_p1 = pnand %p11338_p0, %p11332_p11 }
  0x9b   :  { %11342 = shalt.err (!%p11339_p1)
}
  0x9c   :  { %s11434_s7 = smov 256   ;;  %s11435_s28 = smov 16  }
  0x9d   :  { %111 = dma.hbm_to_vmem [thread:$0]  %s12752_s10, 40960, %s106_s3, [#allocation14], %s11434_s7, %s11434_s7, %s11435_s28  }
  0x9e   :  { %s11436_s21 = smov [#allocation18]   ;;  %s11343_s25 = scalar_lea.hbm %s12754_s12, 8192 }
  0x9f   :  { %s127_s13 = sshll.u32 %s11436_s21, 4  ;;  %p11344_p2 = scmp.ne.s32.totalorder %s12754_s12, %s11343_s25  ;;  %s128_s13 = int_to_ptr.vmem [resolvable:$true] %s127_s13 }
  0xa0   :  { %p11347_p3 = scmp.lt.u32.totalorder %s11343_s25, %s12754_s12 }
  0xa2   :  { %p11349_p4 = pnand %p11347_p3, %p11344_p2 }
  0xa4   :  { %11352 = shalt.err (!%p11349_p4)
}
  0xa5   :  { %s11353_s17 = scalar_lea.vmem %s128_s13, 8192  ;;  %p11358_p6 = scmp.lt.s32.totalorder %s128_s13, %s128_s13 }
  0xa6   :  { %p11354_p5 = scmp.ne.s32.totalorder %s128_s13, %s11353_s17  ;;  %p11359_p7 = scmp.lt.s32.totalorder %s11353_s17, %s11353_s17 }
  0xa8   :  { %p11360_p8 = por %p11359_p7, %p11358_p6 }
  0xaa   :  { %p11361_p9 = pnand %p11360_p8, %p11354_p5 }
  0xac   :  { %11364 = shalt.err (!%p11361_p9)
}
  0xad   :  { %s11437_s10 = smov 128   ;;  %s11438_s3 = smov 8  }
  0xae   :  { %133 = dma.hbm_to_vmem [thread:$0]  %s12754_s12, 8192, %s128_s13, [#allocation17], %s11437_s10, %s11437_s10, %s11438_s3  }
  0xaf   :  { %s11439_s23 = smov [#allocation21]   ;;  %s11365_s22 = scalar_lea.hbm %s12757_s15, 16 }
  0xb0   :  { %s152_s30 = sshll.u32 %s11439_s23, 4  ;;  %p11366_p10 = scmp.ne.s32.totalorder %s12757_s15, %s11365_s22  ;;  %s153_s30 = int_to_ptr.vmem [resolvable:$true] %s152_s30 }
  0xb1   :  { %p11369_p11 = scmp.lt.u32.totalorder %s11365_s22, %s12757_s15 }
  0xb3   :  { %p11371_p12 = pnand %p11369_p11, %p11366_p10 }
  0xb5   :  { %11374 = shalt.err (!%p11371_p12)
}
  0xb6   :  { %s11375_s18 = scalar_lea.vmem %s153_s30, 16  ;;  %s11379_s12 = scalar_lea.vmem %s153_s30, 32 }
  0xb7   :  { %p11376_p13 = scmp.ne.s32.totalorder %s153_s30, %s11375_s18  ;;  %p11380_p0 = scmp.lt.s32.totalorder %s153_s30, %s153_s30 }
  0xb8   :  { %p11381_p1 = scmp.lt.s32.totalorder %s11379_s12, %s11375_s18 }
  0xba   :  { %p11382_p2 = por %p11381_p1, %p11380_p0 }
  0xbc   :  { %p11383_p3 = pnand %p11382_p2, %p11376_p13 }
  0xbe   :  { %11386 = shalt.err (!%p11383_p3)
}
  0xbf   :  { %155 = dma.hbm_to_vmem [thread:$0]  %s12757_s15, 16, %s153_s30, [#allocation20]  }
  0xc0   :  { %11409 = dma.done.wait [#allocation5], 256  }
  0xc1   :  { %11410 = vsyncadd [#allocation5], 4294967040 }
  0xc2   :  { %11411 = dma.done.wait [#allocation8], 32  }
  0xc3   :  { %11412 = vsyncadd [#allocation8], 4294967264 }
  0xc4   :  { %11413 = dma.done.wait [#allocation11], 272  }
  0xc5   :  { %11414 = vsyncadd [#allocation11], 4294967024 }
  0xc6   :  { %11415 = dma.done.wait [#allocation14], 40976  }
  0xc7   :  { %11416 = vsyncadd [#allocation14], 4294926320 }
  0xc8   :  { %11417 = dma.done.wait [#allocation17], 8256  }
  0xc9   :  { %11418 = vsyncadd [#allocation17], 4294959040 }
  0xca   :  { %11419 = dma.done.wait [#allocation20], 48  }
  0xcb   :  { %11420 = vsyncadd [#allocation20], 4294967248  ;;  %vm277_vm0 = vcmask 1041408   ;;  %vm278_vm1 = vcmask 1042432   ;;  %v11440_v0 = vmov 65535   ;;  %s12761_s24 = sld [smem:[#allocation30_spill]] }
  0xcc   :  { %v279_v1 = vsel %vm277_vm0, 4294967295, %v11440_v0  ;;  %v213_v3 = vld [vmem:[#allocation4] sm:$0x7]  ;;  %vm252_vm2 = vcmask 39936   ;;  %v10523_v27 = vld [vmem:[#allocation4 + $0x4] sm:$0x38]  }
  0xcd   :  { %v11668_v2 = vsel %vm278_vm1, %v279_v1, 0  ;;  %v10521_v10 = vld [vmem:[#allocation4 + $0x4] ss:$0 sps:$4 sm:$0xee]   ;;  %v700_v31 = vshrl.u32 %v10523_v27, 16  ;;  %v703_v32 = vshll.u32 %v10523_v27, 16 }
  0xce   :  { %v11677_v6 = vand.u32 %v11668_v2, %v213_v3  ;;  %v10522_v13 = vld [vmem:[#allocation4] sm:$0x1c]   ;;  %v530_v15 = vrot.slane %v10521_v10, 1  ;;  %v10524_v43 = vld [vmem:[#allocation4 + $0x8] sm:$0x1c]   ;;  %vm11442_vm3 = vmmov 0  }
  0xcf   :  { %v245_v19 = vshrl.u32 %v10522_v13, 16  ;;  %v248_v20 = vshll.u32 %v10522_v13, 16  ;;  %v702_v38 = vrot.slane %v700_v31, 3  ;;  %v705_v39 = vrot.slane %v703_v32, 4 }
  0xd0   :  { %10073 = vmatprep.subr.bf16.mxu0 %v11677_v6  ;;  %v556_v22 = vand.u32 %v530_v15, %v11668_v2  ;;  %v875_v49 = vrot.slane %v10524_v43, 2  ;;  %vm1081_vm5 = vcmask 261120  }
  0xd1   :  { %v190_v4 = vld [vmem:[%s12761_s24] sm:$0xff]  ;;  %v191_v5 = vld [vmem:[%s12761_s24 + $0x8] sm:$0xff]  ;;  %v192_v8 = vld [vmem:[%s12761_s24 + $0x10] sm:$0xff]  ;;  %10074 = vmatpush3.bf16.msra.mxu0 %v11677_v6  ;;  %v247_v23 = vrot.slane %v245_v19, 2  ;;  %v250_v24 = vrot.slane %v248_v20, 3  ;;  %v706_v42 = vor.u32 %v705_v39, %v702_v38 }
  0xd2   :  { %v205_v7 = vpack.c.bf16 %v191_v5, %v190_v4  ;;  %v193_v9 = vld [vmem:[%s12761_s24 + $0x18] sm:$0xff]  ;;  %v194_v17 = vld [vmem:[%s12761_s24 + $0x20] sm:$0xff]  ;;  %v195_v18 = vld [vmem:[%s12761_s24 + $0x28] sm:$0xff]  ;;  %10091 = vmatprep.subr.bf16.mxu0 %v556_v22  ;;  %v901_v56 = vand.u32 %v875_v49, %v11668_v2 }
  0xd3   :  { %v214_v11 = vld [vmem:[%s12761_s24 + $0x14] sm:$0xff]  ;;  %v206_v12 = vpack.c.bf16 %v193_v9, %v192_v8  ;;  %v215_v14 = vld [vmem:[%s12761_s24 + $0x1c] sm:$0xff]  ;;  %v207_v21 = vpack.c.bf16 %v195_v18, %v194_v17  ;;  %v251_v28 = vor.u32 %v250_v24, %v247_v23  ;;  %v216_v29 = vld [vmem:[%s12761_s24 + $0x24] sm:$0xff]  ;;  %v732_v45 = vand.u32 %v706_v42, %v11668_v2 }
  0xd4   :  { %10075 = vmatprep.mubr.msk.bf16.mxu0 %vm252_vm2, %v205_v7  ;;  %v229_v16 = vpack.c.bf16 %v215_v14, %v214_v11  ;;  %v196_v25 = vld [vmem:[%s12761_s24 + $0x30] sm:$0xff]  ;;  %v197_v26 = vld [vmem:[%s12761_s24 + $0x38] sm:$0xff]  ;;  %v506_v44 = vld [vmem:[%s12761_s24 + $0x40] sm:$0xff] }
  0xd5   :  { %10076 = vmatmul.mubr.msk.bf16.vlgmr.msra.gmra.mrb[0].mxu0 %vm252_vm2, %v206_v12  ;;  %v217_v30 = vld [vmem:[%s12761_s24 + $0x2c] sm:$0xff]  ;;  %v282_v33 = vand.u32 %v11668_v2, %v251_v28  ;;  %v208_v34 = vpack.c.bf16 %v197_v26, %v196_v25  ;;  %v218_v35 = vld [vmem:[%s12761_s24 + $0x34] sm:$0xff]  ;;  %v11723_v36 = vld [vmem:[%s12761_s24 + $0x3c] sm:$0xff]  ;;  %v518_v37 = vpack.c.bf16 %v196_v25, %v195_v18  ;;  %v519_v53 = vpack.c.bf16 %v506_v44, %v197_v26 }
  0xd6   :  { %10057 = vmatprep.mubr.msk.bf16.mxu1 %vm252_vm2, %v229_v16  ;;  %10079 = vmatprep.mubr.msk.bf16.mxu0 %vm252_vm2, %v207_v21  ;;  %v230_v40 = vpack.c.bf16 %v217_v30, %v216_v29  ;;  %v231_v41 = vpack.c.bf16 %v11723_v36, %v218_v35  ;;  %v220_v46 = vld [vmem:[%s12761_s24 + $0x44] sm:$0xff]  ;;  %v508_v48 = vld [vmem:[%s12761_s24 + $0x50] sm:$0xff]  ;;  %v223_v52 = vld [vmem:[%s12761_s24 + $0x5c] sm:$0xff] }
  0xd7   :  { %10092 = vmatpush3.bf16.msra.mxu0 %v556_v22  ;;  %10055 = vmatprep.subr.bf16.mxu1 %v282_v33  ;;  %v507_v47 = vld [vmem:[%s12761_s24 + $0x48] sm:$0xff]  ;;  %v222_v51 = vld [vmem:[%s12761_s24 + $0x54] sm:$0xff]  ;;  %v510_v59 = vld [vmem:[%s12761_s24 + $0x60] sm:$0xff]  ;;  %v684_v18 = vpack.c.bf16 %v220_v46, %v11723_v36 }
  0xd8   :  { %10056 = vmatpush3.bf16.msra.mxu1 %v282_v33  ;;  %v221_v50 = vld [vmem:[%s12761_s24 + $0x4c] sm:$0xff]  ;;  %10109 = vmatprep.subr.bf16.mxu0 %v732_v45  ;;  %v520_v54 = vpack.c.bf16 %v508_v48, %v507_v47  ;;  %v233_v57 = vpack.c.bf16 %v223_v52, %v222_v51  ;;  %v509_v58 = vld [vmem:[%s12761_s24 + $0x58] sm:$0xff]  ;;  %v224_v62 = vld [vmem:[%s12761_s24 + $0x64] sm:$0xff]  ;;  %v209_v15 = vpack.c.bf16 %v507_v47, %v506_v44 }
  0xd9   :  { %10395 = vmatprep.subr.bf16.mxu1 %v11677_v6  ;;  %v232_v55 = vpack.c.bf16 %v221_v50, %v220_v46  ;;  %v511_v60 = vld [vmem:[%s12761_s24 + $0x68] sm:$0xff]  ;;  %v11768_v61 = vld [vmem:[%s12761_s24 + $0x70] sm:$0xff]  ;;  %v227_v1 = vld [vmem:[%s12761_s24 + $0x7c] sm:$0xff]  ;;  %v521_v3 = vpack.c.bf16 %v510_v59, %v509_v58  ;;  %v210_v19 = vpack.c.bf16 %v509_v58, %v508_v48  ;;  %v685_v21 = vpack.c.bf16 %v222_v51, %v221_v50 }
  0xda   :  { %v225_v63 = vld [vmem:[%s12761_s24 + $0x6c] sm:$0xff]  ;;  %v226_v0 = vld [vmem:[%s12761_s24 + $0x74] sm:$0xff]  ;;  %v522_v4 = vpack.c.bf16 %v11768_v61, %v511_v60  ;;  %v514_v8 = vld [vmem:[%s12761_s24 + $0x80] sm:$0xff]  ;;  %v211_v20 = vpack.c.bf16 %v511_v60, %v510_v59  ;;  %v686_v22 = vpack.c.bf16 %v224_v62, %v223_v52  ;;  %v212_v23 = vpack.c.bf16 %v11768_v61, %v11768_v61 }
  0xdb   :  { %10058 = vmatmul.mubr.msk.bf16.vlgmr.msra.gmra.mrb[0].mxu1 %vm252_vm2, %v230_v40  ;;  %v234_v5 = vpack.c.bf16 %v225_v63, %v224_v62  ;;  %v513_v7 = vld [vmem:[%s12761_s24 + $0x78] sm:$0xff]  ;;  %v515_v9 = vld [vmem:[%s12761_s24 + $0x88] sm:$0xff]  ;;  %v516_v10 = vld [vmem:[%s12761_s24 + $0x90] sm:$0xff]  ;;  %v687_v24 = vpack.c.bf16 %v226_v0, %v225_v63  ;;  %v11441_v46 = vmov 0.0  }
  0xdc   :  { %10061 = vmatprep.mubr.msk.bf16.mxu1 %vm252_vm2, %v231_v41  ;;  %10396 = vmatpush3.bf16.msra.mxu1 %v11677_v6  ;;  %v235_v6 = vpack.c.bf16 %v227_v1, %v226_v0  ;;  %v228_v11 = vld [vmem:[%s12761_s24 + $0x84] sm:$0xff]  ;;  %v523_v12 = vpack.c.bf16 %v514_v8, %v513_v7  ;;  %v524_v13 = vpack.c.bf16 %v516_v10, %v515_v9  ;;  %v517_v16 = vld [vmem:[%s12761_s24 + $0x98] sm:$0xff]  ;;  %v679_v26 = vld [vmem:[%s12761_s24 + $0x8c] sm:$0xff] }
  0xdd   :  { %10080 = vmatmul.mubr.msk.bf16.gmra.mrb[4].mxu0 %vm252_vm2, %v208_v34  ;;  %v236_v14 = vpack.c.bf16 %v228_v11, %v228_v11  ;;  %v525_v17 = vpack.c.bf16 %v517_v16, %v517_v16  ;;  %v688_v25 = vpack.c.bf16 %v228_v11, %v227_v1  ;;  %v680_v27 = vld [vmem:[%s12761_s24 + $0x94] sm:$0xff]  ;;  %v681_v28 = vld [vmem:[%s12761_s24 + $0x9c] sm:$0xff]  ;;  %v682_v29 = vld [vmem:[%s12761_s24 + $0xa4] sm:$0xff]  ;;  %v862_v34 = vpack.c.bf16 %v513_v7, %v11768_v61 }
  0xde   :  { %10093 = vmatprep.mubr.msk.bf16.mxu0 %vm252_vm2, %v518_v37  ;;  %v689_v30 = vpack.c.bf16 %v680_v27, %v679_v26  ;;  %v690_v31 = vpack.c.bf16 %v682_v29, %v681_v28  ;;  %v683_v32 = vld [vmem:[%s12761_s24 + $0xac] sm:$0xff]  ;;  %v863_v35 = vpack.c.bf16 %v515_v9, %v514_v8  ;;  %v864_v36 = vpack.c.bf16 %v517_v16, %v516_v10  ;;  %v855_v37 = vld [vmem:[%s12761_s24 + $0xa0] sm:$0xff]  ;;  %v858_v40 = vld [vmem:[%s12761_s24 + $0xb8] sm:$0xff] }
  0xdf   :  { %v691_v33 = vpack.c.bf16 %v683_v32, %v683_v32  ;;  %v856_v38 = vld [vmem:[%s12761_s24 + $0xa8] sm:$0xff]  ;;  %v857_v39 = vld [vmem:[%s12761_s24 + $0xb0] sm:$0xff]  ;;  %v859_v43 = vld [vmem:[%s12761_s24 + $0xc0] sm:$0xff]  ;;  %10145 = vmatprep.subr.bf16.mxu1 %v11441_v46 }
  0xe0   :  { %v865_v41 = vpack.c.bf16 %v856_v38, %v855_v37  ;;  %v866_v42 = vpack.c.bf16 %v858_v40, %v857_v39  ;;  %v867_v44 = vpack.c.bf16 %v859_v43, %v859_v43  ;;  %v10526_v47 = vld [vmem:[%s12746_s4 + $0x18] sm:$0xff]  }
  0xe3   :  { %10062 = vmatmul.mubr.msk.bf16.gmra.mrb[4].mxu1 %vm252_vm2, %v232_v55 }
  0xe4   :  { %10065 = vmatprep.mubr.msk.bf16.mxu1 %vm252_vm2, %v233_v57 }
  0xe5   :  { %10094 = vmatmul.mubr.msk.bf16.vlgmr.msra.gmra.mrb[0].mxu0 %vm252_vm2, %v519_v53 }
  0xe6   :  { %10110 = vmatpush3.bf16.msra.mxu0 %v732_v45  ;;  %10097 = vmatprep.mubr.msk.bf16.mxu0 %vm252_vm2, %v520_v54  ;;  %v10525_v45 = vld [vmem:[%s12746_s4 + $0x10] sm:$0xff]  }
  0xe7   :  { %10127 = vmatprep.subr.bf16.mxu0 %v901_v56 }
  0xeb   :  { %10066 = vmatmul.mubr.msk.bf16.gmra.mrb[8].mxu1 %vm252_vm2, %v234_v5 }
  0xec   :  { %10069 = vmatprep.mubr.msk.bf16.mxu1 %vm252_vm2, %v235_v6 }
  0xed   :  { %10098 = vmatmul.mubr.msk.bf16.gmra.mrb[4].mxu0 %vm252_vm2, %v521_v3 }
  0xee   :  { %10101 = vmatprep.mubr.msk.bf16.mxu0 %vm252_vm2, %v522_v4 }
  0xf3   :  { %10070 = vmatmul.mubr.msk.bf16.gmra.mrb[12].mxu1 %vm252_vm2, %v236_v14 }
  0xf4   :  { %10083 = vmatprep.mubr.msk.bf16.mxu1 %vm252_vm2, %v209_v15 }
  0xf5   :  { %10102 = vmatmul.mubr.msk.bf16.gmra.mrb[8].mxu0 %vm252_vm2, %v523_v12 }
  0xf6   :  { %10105 = vmatprep.mubr.msk.bf16.mxu0 %vm252_vm2, %v524_v13 }
  0xfb   :  { %10084 = vmatmul.mubr.msk.bf16.vlgmr.msra.gmra.mrb[8].mxu1 %vm252_vm2, %v210_v19 }
  0xfc   :  { %10087 = vmatprep.mubr.msk.bf16.mxu1 %vm252_vm2, %v211_v20  ;;  %10146 = vmatpush3.bf16.msra.mxu1 %v10525_v45 }
  0xfd   :  { %10106 = vmatmul.mubr.msk.bf16.gmra.mrb[12].mxu0 %vm252_vm2, %v525_v17  ;;  %10147 = vmatprep.subr.bf16.mxu1 %v11441_v46 }
  0xfe   :  { %10111 = vmatprep.mubr.msk.bf16.mxu0 %vm252_vm2, %v684_v18 }
 0x100   :  { %10148 = vmatpush3.bf16.msra.mxu1 %v10526_v47 }
 0x101   :  { %10161 = vmatprep.subr.bf16.mxu1 %v11441_v46 }
 0x103   :  { %10088 = vmatmul.mubr.msk.bf16.gmra.mrb[16].mxu1 %vm252_vm2, %v212_v23  ;;  %v11900_v23 = vld [vmem:[#allocation7] ss:$0 sm:$0xff] }
 0x104   :  { %10149 = vmatprep.mubr.msk.bf16.mxu1 %vm11442_vm3, %v11441_v46 }
 0x105   :  { %10112 = vmatmul.mubr.msk.bf16.vlgmr.msra.gmra.mrb[0].mxu0 %vm252_vm2, %v685_v21 }
 0x106   :  { %10128 = vmatpush3.bf16.msra.mxu0 %v901_v56  ;;  %10115 = vmatprep.mubr.msk.bf16.mxu0 %vm252_vm2, %v686_v22 }
 0x107   :  { %10315 = vmatprep.subr.bf16.mxu0 %v11441_v46 }
 0x10d   :  { %10116 = vmatmul.mubr.msk.bf16.gmra.mrb[4].mxu0 %vm252_vm2, %v687_v24 }
 0x10e   :  { %10119 = vmatprep.mubr.msk.bf16.mxu0 %vm252_vm2, %v688_v25 }
 0x115   :  { %10120 = vmatmul.mubr.msk.bf16.gmra.mrb[8].mxu0 %vm252_vm2, %v689_v30 }
 0x116   :  { %10123 = vmatprep.mubr.msk.bf16.mxu0 %vm252_vm2, %v690_v31 }
 0x11d   :  { %10124 = vmatmul.mubr.msk.bf16.gmra.mrb[16].mxu0 %vm252_vm2, %v691_v33 }
 0x11e   :  { %10129 = vmatprep.mubr.msk.bf16.mxu0 %vm252_vm2, %v210_v19 }
 0x125   :  { %10130 = vmatmul.mubr.msk.bf16.vlgmr.msra.gmra.mrb[0].mxu0 %vm252_vm2, %v211_v20 }
 0x126   :  { %10133 = vmatprep.mubr.msk.bf16.mxu0 %vm252_vm2, %v862_v34 }
 0x12d   :  { %10134 = vmatmul.mubr.msk.bf16.gmra.mrb[4].mxu0 %vm252_vm2, %v863_v35 }
 0x12e   :  { %10137 = vmatprep.mubr.msk.bf16.mxu0 %vm252_vm2, %v864_v36 }
 0x135   :  { %10138 = vmatmul.mubr.msk.bf16.gmra.mrb[8].mxu0 %vm252_vm2, %v865_v41 }
 0x136   :  { %10141 = vmatprep.mubr.msk.bf16.mxu0 %vm252_vm2, %v866_v42 }
 0x13d   :  { %10142 = vmatmul.mubr.msk.bf16.gmra.mrb[20].mxu0 %vm252_vm2, %v867_v44 }
 0x13e   :  { %10319 = vmatprep.mubr.msk.bf16.mxu0 %vm11442_vm3, %v11441_v46 }
 0x1ae   :  { %v10059_v48 = vpop.f32.mrb[0].mxu1 }
 0x1af   :  { %v318_v49 = vpop.f32.mrb[1].mxu1 }
 0x1b0   :  { %v10060_v50 = vpop.f32.mrb[2].mxu1 }
 0x1b1   :  { %v321_v51 = vpop.f32.mrb[3].mxu1 }
 0x1b6   :  { %v10063_v52 = vpop.f32.mrb[4].mxu1 }
 0x1b7   :  { %v11880_v53 = vpop.f32.mrb[5].mxu1 }
 0x1b8   :  { %v11882_v54 = vpop.f32.mrb[6].mxu1 }
 0x1b9   :  { %v11884_v55 = vpop.f32.mrb[7].mxu1 }
 0x1c6   :  { %v10071_v56 = vpop.f32.mrb[12].mxu1 }
 0x1c7   :  { %v366_v57 = vpop.f32.mrb[13].mxu1 }
 0x1c8   :  { %v10072_v58 = vpop.f32.mrb[14].mxu1 }
 0x1c9   :  { %v369_v59 = vpop.f32.mrb[15].mxu1 }
 0x1ce   :  { %v11886_v63 = vpop.f32.mrb[8].mxu1 }
 0x1cf   :  { %v11888_v1 = vpop.f32.mrb[9].mxu1 }
 0x1d0   :  { %v10107_v60 = vpop.f32.mrb[12].mxu0  ;;  %v11890_v3 = vpop.f32.mrb[10].mxu1 }
 0x1d1   :  { %v640_v61 = vpop.f32.mrb[13].mxu0  ;;  %v11892_v4 = vpop.f32.mrb[11].mxu1 }
 0x1d2   :  { %v10108_v62 = vpop.f32.mrb[14].mxu0 }
 0x1d3   :  { %v643_v0 = vpop.f32.mrb[15].mxu0 }
 0x1d6   :  { %v10089_v5 = vpop.f32.mrb[16].mxu1 }
 0x1d7   :  { %v498_v6 = vadd.f32 %v10089_v5, %v10071_v56  ;;  %v489_v7 = vpop.f32.mrb[17].mxu1 }
 0x1d8   :  { %v490_v8 = vadd.f32 %v489_v7, %v366_v57  ;;  %v10090_v9 = vpop.f32.mrb[18].mxu1 }
 0x1d9   :  { %v492_v10 = vpop.f32.mrb[19].mxu1  ;;  %v668_v11 = vadd.f32 %v10107_v60, %v498_v6 }
 0x1da   :  { %v493_v12 = vadd.f32 %v492_v10, %v369_v59  ;;  %v666_v13 = vadd.f32 %v640_v61, %v490_v8 }
 0x1dc   :  { %v667_v14 = vadd.f32 %v643_v0, %v493_v12 }
 0x1f0   :  { %v10125_v15 = vpop.f32.mrb[16].mxu0 }
 0x1f1   :  { %v11894_v16 = vadd.f32 %v10125_v15, %v668_v11  ;;  %v816_v17 = vpop.f32.mrb[17].mxu0 }
 0x1f2   :  { %v11896_v18 = vadd.f32 %v816_v17, %v666_v13  ;;  %v10126_v19 = vpop.f32.mrb[18].mxu0 }
 0x1f3   :  { %v819_v20 = vpop.f32.mrb[19].mxu0 }
 0x1f4   :  { %v11898_v21 = vadd.f32 %v819_v20, %v667_v14 }
 0x1f8   :  { %v10131_v22 = vpop.f32.mrb[0].mxu0 }
 0x1f9   :  { %v10397_v24 = vadd.f32 %v10131_v22, %v10059_v48  ;;  %v937_v25 = vpop.f32.mrb[1].mxu0 }
 0x1fa   :  { %v10398_v26 = vadd.f32 %v937_v25, %v318_v49  ;;  %v10132_v27 = vpop.f32.mrb[2].mxu0 }
 0x1fb   :  { %v1023_v28 = vadd.f32 %v10397_v24, %v11900_v23  ;;  %v10399_v29 = vadd.f32 %v10132_v27, %v10060_v50  ;;  %v940_v30 = vpop.f32.mrb[3].mxu0 }
 0x1fc   :  { %v1021_v31 = vadd.f32 %v10398_v26, %v11900_v23  ;;  %v10400_v32 = vadd.f32 %v940_v30, %v321_v51 }
 0x1fd   :  { %vm1038_vm4 = vcmp.gt.f32.partialorder %v1023_v28, 0.0  ;;  %v1053_v33 = vmul.f32 0.01, %v1023_v28  ;;  %v1024_v34 = vadd.f32 %v10399_v29, %v11900_v23 }
 0x1fe   :  { %vm1036_vm6 = vcmp.gt.f32.partialorder %v1021_v31, 0.0  ;;  %v1051_v35 = vmul.f32 0.01, %v1021_v31  ;;  %v1022_v36 = vadd.f32 %v10400_v32, %v11900_v23 }
 0x1ff   :  { %v1068_v37 = vsel %vm1038_vm4, %v1023_v28, %v1053_v33  ;;  %vm1039_vm7 = vcmp.gt.f32.partialorder %v1024_v34, 0.0  ;;  %v1054_v38 = vmul.f32 0.01, %v1024_v34 }
 0x200   :  { %1084 = vst.msk [vmem:[#allocation2 + $0x10] sm:$0xff] %vm1081_vm5, %v1068_v37  ;;  %v1066_v39 = vsel %vm1036_vm6, %v1021_v31, %v1051_v35  ;;  %vm1037_vm8 = vcmp.gt.f32.partialorder %v1022_v36, 0.0  ;;  %v1052_v40 = vmul.f32 0.01, %v1022_v36  ;;  %v10135_v41 = vpop.f32.mrb[4].mxu0 }
 0x201   :  { %1082 = vst.msk [vmem:[#allocation2] sm:$0xff] %vm1081_vm5, %v1066_v39  ;;  %v1069_v42 = vsel %vm1039_vm7, %v1024_v34, %v1054_v38  ;;  %v10401_v43 = vadd.f32 %v10135_v41, %v10063_v52  ;;  %v953_v44 = vpop.f32.mrb[5].mxu0 }
 0x202   :  { %1085 = vst.msk [vmem:[#allocation2 + $0x18] sm:$0xff] %vm1081_vm5, %v1069_v42  ;;  %v1067_v45 = vsel %vm1037_vm8, %v1022_v36, %v1052_v40  ;;  %v10402_v47 = vadd.f32 %v953_v44, %v11880_v53  ;;  %v10136_v48 = vpop.f32.mrb[6].mxu0 }
 0x203   :  { %1083 = vst.msk [vmem:[#allocation2 + $0x8] sm:$0xff] %vm1081_vm5, %v1067_v45  ;;  %v1027_v49 = vadd.f32 %v10401_v43, %v11900_v23  ;;  %v10403_v50 = vadd.f32 %v10136_v48, %v11882_v54  ;;  %v956_v51 = vpop.f32.mrb[7].mxu0 }
 0x204   :  { %v1025_v56 = vadd.f32 %v10402_v47, %v11900_v23  ;;  %v10404_v57 = vadd.f32 %v956_v51, %v11884_v55 }
 0x205   :  { %vm1042_vm9 = vcmp.gt.f32.partialorder %v1027_v49, 0.0  ;;  %v1057_v52 = vmul.f32 0.01, %v1027_v49  ;;  %v1028_v58 = vadd.f32 %v10403_v50, %v11900_v23  ;;  %v10529_v50 = vld [vmem:[%s12746_s4 + $0x20] sm:$0xff]  }
 0x206   :  { %vm1040_vm10 = vcmp.gt.f32.partialorder %v1025_v56, 0.0  ;;  %v1055_v59 = vmul.f32 0.01, %v1025_v56  ;;  %v1026_v53 = vadd.f32 %v10404_v57, %v11900_v23 }
 0x207   :  { %v1072_v60 = vsel %vm1042_vm9, %v1027_v49, %v1057_v52  ;;  %vm1043_vm11 = vcmp.gt.f32.partialorder %v1028_v58, 0.0  ;;  %v1058_v61 = vmul.f32 0.01, %v1028_v58  ;;  %v1099_v52 = vld [vmem:[#allocation2 + $0x10] sm:$0xff] }
 0x208   :  { %1088 = vst.msk [vmem:[#allocation2 + $0x30] sm:$0xff] %vm1081_vm5, %v1072_v60  ;;  %v1070_v62 = vsel %vm1040_vm10, %v1025_v56, %v1055_v59  ;;  %vm1041_vm12 = vcmp.gt.f32.partialorder %v1026_v53, 0.0  ;;  %v1056_v54 = vmul.f32 0.01, %v1026_v53  ;;  %v10139_v0 = vpop.f32.mrb[8].mxu0  ;;  %v1097_v49 = vld [vmem:[#allocation2] sm:$0xff] }
 0x209   :  { %1086 = vst.msk [vmem:[#allocation2 + $0x20] sm:$0xff] %vm1081_vm5, %v1070_v62  ;;  %v1073_v55 = vsel %vm1043_vm11, %v1028_v58, %v1058_v61  ;;  %v10405_v5 = vadd.f32 %v10139_v0, %v11886_v63  ;;  %v969_v6 = vpop.f32.mrb[9].mxu0  ;;  %v1109_v25 = vld [vmem:[#allocation2 + $0x14] sm:$0xff]  ;;  %v10530_v56 = vld [vmem:[%s12746_s4 + $0x28] sm:$0xff]  }
 0x20a   :  { %1089 = vst.msk [vmem:[#allocation2 + $0x38] sm:$0xff] %vm1081_vm5, %v1073_v55  ;;  %v1071_v7 = vsel %vm1041_vm12, %v1026_v53, %v1056_v54  ;;  %v10406_v8 = vadd.f32 %v969_v6, %v11888_v1  ;;  %v10140_v9 = vpop.f32.mrb[10].mxu0  ;;  %v1098_v48 = vld [vmem:[#allocation2 + $0x8] sm:$0xff]  ;;  %v1100_v57 = vld [vmem:[#allocation2 + $0x18] sm:$0xff]  ;;  %v10531_v62 = vld [vmem:[%s12746_s4 + $0x30] sm:$0xff]  }
 0x20b   :  { %1087 = vst.msk [vmem:[#allocation2 + $0x28] sm:$0xff] %vm1081_vm5, %v1071_v7  ;;  %v1031_v10 = vadd.f32 %v10405_v5, %v11900_v23  ;;  %v10407_v11 = vadd.f32 %v10140_v9, %v11890_v3  ;;  %v972_v12 = vpop.f32.mrb[11].mxu0  ;;  %v10527_v3 = vld [vmem:[%s12746_s4] sm:$0xff]   ;;  %v1102_v51 = vpack.c.bf16 %v1098_v48, %v1097_v49  ;;  %v1103_v58 = vpack.c.bf16 %v1100_v57, %v1099_v52  ;;  %v10532_v0 = vld [vmem:[%s12746_s4 + $0x38] sm:$0xff]  }
 0x20c   :  { %v1029_v13 = vadd.f32 %v10406_v8, %v11900_v23  ;;  %v10408_v14 = vadd.f32 %v972_v12, %v11892_v4  ;;  %v10535_v7 = vld [vmem:[#allocation10] sm:$0x1c]   ;;  %v12082_v57 = vld [vmem:[%s12743_s1 + $0x74] sm:$0xff] }
 0x20d   :  { %vm1046_vm13 = vcmp.gt.f32.partialorder %v1031_v10, 0.0  ;;  %v1061_v63 = vmul.f32 0.01, %v1031_v10  ;;  %v1032_v15 = vadd.f32 %v10407_v11, %v11900_v23  ;;  %v1647_v11 = vshll.u32 %v10535_v7, 16  ;;  %v12061_v48 = vld [vmem:[%s12743_s1 + $0x5c] sm:$0xff] }
 0x20e   :  { %vm1044_vm14 = vcmp.gt.f32.partialorder %v1029_v13, 0.0  ;;  %v1059_v17 = vmul.f32 0.01, %v1029_v13  ;;  %v1030_v1 = vadd.f32 %v10408_v14, %v11900_v23  ;;  %v12087_v52 = vld [vmem:[%s12743_s1 + $0x7c] sm:$0xff] }
 0x20f   :  { %v1076_v19 = vsel %vm1046_vm13, %v1031_v10, %v1061_v63  ;;  %vm1047_vm15 = vcmp.gt.f32.partialorder %v1032_v15, 0.0  ;;  %v1062_v20 = vmul.f32 0.01, %v1032_v15  ;;  %v1276_v61 = vld [vmem:[#allocation2 + $0x30] sm:$0xff]  ;;  %v1644_v10 = vshrl.u32 %v10535_v7, 16 }
 0x210   :  { %1092 = vst.msk [vmem:[#allocation2 + $0x50] sm:$0xff] %vm1081_vm5, %v1076_v19  ;;  %v1074_v22 = vsel %vm1044_vm14, %v1029_v13, %v1059_v17  ;;  %vm1045_vm0 = vcmp.gt.f32.partialorder %v1030_v1, 0.0  ;;  %v1060_v4 = vmul.f32 0.01, %v1030_v1  ;;  %v10143_v24 = vpop.f32.mrb[20].mxu0  ;;  %v1110_v26 = vld [vmem:[#allocation2 + $0x1c] sm:$0xff] }
 0x211   :  { %1090 = vst.msk [vmem:[#allocation2 + $0x40] sm:$0xff] %vm1081_vm5, %v1074_v22  ;;  %v1077_v27 = vsel %vm1047_vm15, %v1032_v15, %v1062_v20  ;;  %v1013_v28 = vadd.f32 %v10143_v24, %v11894_v16  ;;  %v985_v29 = vpop.f32.mrb[21].mxu0  ;;  %v1114_v30 = vpack.c.bf16 %v1110_v26, %v1109_v25  ;;  %v10528_v16 = vld [vmem:[%s12746_s4 + $0x8] sm:$0xff]   ;;  %v1101_v59 = vld [vmem:[#allocation2 + $0x20] sm:$0xff]  ;;  %v1277_v5 = vld [vmem:[#allocation2 + $0x38] sm:$0xff]  ;;  %v1646_v12 = vrot.slane %v1644_v10, 2 }
 0x212   :  { %1093 = vst.msk [vmem:[#allocation2 + $0x58] sm:$0xff] %vm1081_vm5, %v1077_v27  ;;  %v1075_v31 = vsel %vm1045_vm0, %v1030_v1, %v1060_v4  ;;  %v1011_v32 = vadd.f32 %v985_v29, %v11896_v18  ;;  %v10144_v33 = vpop.f32.mrb[22].mxu0  ;;  %v1111_v40 = vld [vmem:[#allocation2 + $0x24] sm:$0xff]  ;;  %v1112_v41 = vld [vmem:[#allocation2 + $0x2c] sm:$0xff]  ;;  %v1104_v53 = vpack.c.bf16 %v1101_v59, %v1101_v59  ;;  %v1649_v13 = vrot.slane %v1647_v11, 3 }
 0x213   :  { %1091 = vst.msk [vmem:[#allocation2 + $0x48] sm:$0xff] %vm1081_vm5, %v1075_v31  ;;  %v1035_v34 = vadd.f32 %v11900_v23, %v1013_v28  ;;  %v988_v35 = vpop.f32.mrb[23].mxu0  ;;  %10150 = vmatmul.mubr.msk.bf16.vlgmr.msra.gmra.mrb[20].mxu1 %vm1081_vm5, %v1114_v30  ;;  %v1115_v44 = vpack.c.bf16 %v1112_v41, %v1111_v40  ;;  %v1275_v60 = vld [vmem:[#allocation2 + $0x28] sm:$0xff]  ;;  %v10533_v15 = vld [vmem:[%s12746_s4 + $0x40] sm:$0xff]   ;;  %v1612_v27 = vld [vmem:[#allocation10] sm:$0x7]  ;;  %v1634_v59 = vpack.c.bf16 %v12087_v52, %v12082_v57 }
 0x214   :  { %v1033_v36 = vadd.f32 %v11900_v23, %v1011_v32  ;;  %v1012_v37 = vadd.f32 %v988_v35, %v11898_v21  ;;  %10162 = vmatpush3.bf16.msra.mxu1 %v10527_v3  ;;  %10153 = vmatprep.mubr.msk.bf16.mxu1 %vm11442_vm3, %v11441_v46  ;;  %v1280_v54 = vpack.c.bf16 %v1276_v61, %v1275_v60  ;;  %v10534_v19 = vld [vmem:[%s12746_s4 + $0x48] sm:$0xff]   ;;  %v1614_v35 = vld [vmem:[%s12743_s1 + $0x1c] sm:$0xff]  ;;  %v1617_v40 = vld [vmem:[%s12743_s1 + $0x34] sm:$0xff] }
 0x215   :  { %vm1050_vm1 = vcmp.gt.f32.partialorder %v1035_v34, 0.0  ;;  %v1065_v18 = vmul.f32 0.01, %v1035_v34  ;;  %10163 = vmatprep.subr.bf16.mxu1 %v11441_v46  ;;  %v1650_v1 = vor.u32 %v1649_v13, %v1646_v12  ;;  %v1799_v30 = vand.u32 %v1612_v27, %v11668_v2  ;;  %v12037_v41 = vld [vmem:[%s12743_s1 + $0x3c] sm:$0xff]  ;;  %v12098_v60 = vld [vmem:[%s12743_s1 + $0x84] sm:$0xff] }
 0x216   :  { %vm1048_vm4 = vcmp.gt.f32.partialorder %v1033_v36, 0.0  ;;  %v1063_v38 = vmul.f32 0.01, %v1033_v36  ;;  %v1034_v39 = vadd.f32 %v11900_v23, %v1012_v37  ;;  %v1113_v23 = vld [vmem:[#allocation2 + $0x34] sm:$0xff]  ;;  %v1589_v61 = vld [vmem:[%s12743_s1] sm:$0xff]  ;;  %v1594_v11 = vld [vmem:[%s12743_s1 + $0x28] sm:$0xff] }
 0x217   :  { %v1080_v42 = vsel %vm1050_vm1, %v1035_v34, %v1065_v18  ;;  %v1116_v47 = vpack.c.bf16 %v1113_v23, %v1113_v23  ;;  %v1676_v20 = vand.u32 %v1650_v1, %v11668_v2  ;;  %v1463_v28 = vld [vmem:[#allocation2 + $0x50] sm:$0xff]  ;;  %v10536_v18 = vld [vmem:[#allocation10 + $0x4] ss:$0 sps:$4 sm:$0xee]  }
 0x218   :  { %1096 = vst.msk [vmem:[#allocation2 + $0x70] sm:$0xff] %vm1081_vm5, %v1080_v42  ;;  %v1078_v21 = vsel %vm1048_vm4, %v1033_v36, %v1063_v38  ;;  %vm1049_vm6 = vcmp.gt.f32.partialorder %v1034_v39, 0.0  ;;  %v1064_v43 = vmul.f32 0.01, %v1034_v39  ;;  %10164 = vmatpush3.bf16.msra.mxu1 %v10528_v16  ;;  %v1278_v55 = vld [vmem:[#allocation2 + $0x40] sm:$0xff]  ;;  %v1613_v34 = vld [vmem:[%s12743_s1 + $0x14] sm:$0xff] }
 0x219   :  { %1094 = vst.msk [vmem:[#allocation2 + $0x60] sm:$0xff] %vm1081_vm5, %v1078_v21  ;;  %10177 = vmatprep.subr.bf16.mxu1 %v11441_v46  ;;  %v1281_v6 = vpack.c.bf16 %v1278_v55, %v1277_v5  ;;  %v1369_v63 = vld [vmem:[#allocation2 + $0x3c] sm:$0xff]  ;;  %v1372_v22 = vld [vmem:[#allocation2 + $0x54] sm:$0xff]  ;;  %v1628_v37 = vpack.c.bf16 %v1614_v35, %v1613_v34  ;;  %v1615_v38 = vld [vmem:[%s12743_s1 + $0x24] sm:$0xff]  ;;  %v1924_v42 = vrot.slane %v10536_v18, 1  ;;  %v1635_v55 = vpack.c.bf16 %v12098_v60, %v12098_v60 }
 0x21a   :  { %v1079_v45 = vsel %vm1049_vm6, %v1034_v39, %v1064_v43  ;;  %v1279_v8 = vld [vmem:[#allocation2 + $0x48] sm:$0xff]  ;;  %v1464_v26 = vld [vmem:[#allocation2 + $0x58] sm:$0xff]  ;;  %v1630_v43 = vpack.c.bf16 %v12037_v41, %v1617_v40  ;;  %v1593_v10 = vld [vmem:[%s12743_s1 + $0x20] sm:$0xff] }
 0x21b   :  { %1095 = vst.msk [vmem:[#allocation2 + $0x68] sm:$0xff] %vm1081_vm5, %v1079_v45  ;;  %10154 = vmatmul.mubr.msk.bf16.gmra.mrb[24].mxu1 %vm1081_vm5, %v1115_v44  ;;  %v1282_v9 = vpack.c.bf16 %v1279_v8, %v1279_v8  ;;  %v1370_v14 = vld [vmem:[#allocation2 + $0x44] sm:$0xff]  ;;  %v1371_v3 = vld [vmem:[#allocation2 + $0x4c] sm:$0xff]  ;;  %v1468_v29 = vpack.c.bf16 %v1464_v26, %v1463_v28  ;;  %v1950_v44 = vand.u32 %v1924_v42, %v11668_v2  ;;  %v12203_v42 = vld [vmem:[%s12743_s1 + $0x98] sm:$0xff] }
 0x21c   :  { %10157 = vmatprep.mubr.msk.bf16.mxu1 %vm11442_vm3, %v11441_v46  ;;  %v1374_v17 = vpack.c.bf16 %v1370_v14, %v1369_v63  ;;  %v1375_v4 = vpack.c.bf16 %v1372_v22, %v1371_v3  ;;  %v1616_v39 = vld [vmem:[%s12743_s1 + $0x2c] sm:$0xff]  ;;  %v12046_v45 = vld [vmem:[%s12743_s1 + $0x44] sm:$0xff]  ;;  %v1606_v14 = vpack.c.bf16 %v1594_v11, %v1593_v10 }
 0x21d   :  { %v1629_v21 = vpack.c.bf16 %v1616_v39, %v1615_v38  ;;  %v12051_v23 = vld [vmem:[%s12743_s1 + $0x4c] sm:$0xff]  ;;  %v1597_v1 = vld [vmem:[%s12743_s1 + $0x40] sm:$0xff] }
 0x21e   :  { %v1631_v49 = vpack.c.bf16 %v12051_v23, %v12046_v45  ;;  %v1591_v8 = vld [vmem:[%s12743_s1 + $0x10] sm:$0xff]  ;;  %v12187_v18 = vld [vmem:[%s12743_s1 + $0x88] sm:$0xff] }
 0x21f   :  { %v1467_v36 = vld [vmem:[#allocation2 + $0x70] sm:$0xff] }
 0x220   :  { %v1373_v24 = vld [vmem:[#allocation2 + $0x5c] sm:$0xff]  ;;  %v1470_v16 = vpack.c.bf16 %v1467_v36, %v1467_v36  ;;  %v1599_v22 = vld [vmem:[%s12743_s1 + $0x50] sm:$0xff] }
 0x221   :  { %v1376_v25 = vpack.c.bf16 %v1373_v24, %v1373_v24  ;;  %v1465_v32 = vld [vmem:[#allocation2 + $0x60] sm:$0xff]  ;;  %v12162_v28 = vld [vmem:[%s12743_s1 + $0x70] sm:$0xff] }
 0x222   :  { %v1466_v31 = vld [vmem:[#allocation2 + $0x68] sm:$0xff]  ;;  %v1601_v24 = vld [vmem:[%s12743_s1 + $0x60] sm:$0xff]  ;;  %v12192_v38 = vld [vmem:[%s12743_s1 + $0x90] sm:$0xff] }
 0x223   :  { %10158 = vmatmul.mubr.msk.bf16.gmra.mrb[28].mxu1 %vm1081_vm5, %v1116_v47  ;;  %v1469_v33 = vpack.c.bf16 %v1466_v31, %v1465_v32  ;;  %v12056_v47 = vld [vmem:[%s12743_s1 + $0x54] sm:$0xff]  ;;  %v10538_v31 = vld [vmem:[#allocation10 + $0x8] sm:$0x1c]   ;;  %v1918_v40 = vpack.c.bf16 %v12192_v38, %v12187_v18 }
 0x224   :  { %10165 = vmatprep.mubr.msk.bf16.mxu1 %vm11442_vm3, %v11441_v46  ;;  %v2269_v32 = vrot.slane %v10538_v31, 2 }
 0x226   :  { %v2295_v35 = vand.u32 %v2269_v32, %v11668_v2  ;;  %v2258_v32 = vpack.c.bf16 %v12203_v42, %v12192_v38 }
 0x22b   :  { %10166 = vmatmul.mubr.msk.bf16.vlgmr.msra.gmra.mrb[32].mxu1 %vm1081_vm5, %v1102_v51  ;;  %v12072_v51 = vld [vmem:[%s12743_s1 + $0x64] sm:$0xff] }
 0x22c   :  { %10178 = vmatpush3.bf16.msra.mxu1 %v10529_v50  ;;  %10169 = vmatprep.mubr.msk.bf16.mxu1 %vm11442_vm3, %v11441_v46  ;;  %v1632_v50 = vpack.c.bf16 %v12061_v48, %v12056_v47 }
 0x22d   :  { %10179 = vmatprep.subr.bf16.mxu1 %v11441_v46 }
 0x230   :  { %10180 = vmatpush3.bf16.msra.mxu1 %v10530_v56  ;;  %v12077_v56 = vld [vmem:[%s12743_s1 + $0x6c] sm:$0xff] }
 0x231   :  { %10193 = vmatprep.subr.bf16.mxu1 %v11441_v46 }
 0x233   :  { %10170 = vmatmul.mubr.msk.bf16.gmra.mrb[36].mxu1 %vm1081_vm5, %v1103_v58  ;;  %v1633_v58 = vpack.c.bf16 %v12077_v56, %v12072_v51 }
 0x234   :  { %10173 = vmatprep.mubr.msk.bf16.mxu1 %vm11442_vm3, %v11441_v46 }
 0x23b   :  { %10174 = vmatmul.mubr.msk.bf16.gmra.mrb[40].mxu1 %vm1081_vm5, %v1104_v53  ;;  %v10537_v53 = vld [vmem:[#allocation10 + $0x4] sm:$0x38]  }
 0x23c   :  { %10181 = vmatprep.mubr.msk.bf16.mxu1 %vm11442_vm3, %v11441_v46 }
 0x243   :  { %10182 = vmatmul.mubr.msk.bf16.vlgmr.msra.gmra.mrb[44].mxu1 %vm1081_vm5, %v1280_v54  ;;  %v2094_v54 = vshrl.u32 %v10537_v53, 16 }
 0x244   :  { %10194 = vmatpush3.bf16.msra.mxu1 %v10531_v62  ;;  %10185 = vmatprep.mubr.msk.bf16.mxu1 %vm11442_vm3, %v11441_v46  ;;  %v1590_v62 = vld [vmem:[%s12743_s1 + $0x8] sm:$0xff] }
 0x245   :  { %10195 = vmatprep.subr.bf16.mxu1 %v11441_v46  ;;  %v1604_v5 = vpack.c.bf16 %v1590_v62, %v1589_v61  ;;  %v10541_v61 = vld [vmem:[#allocation15 + $0x4c] ss:$16 sps:$4 sm:$0xff]   ;;  %v2081_v62 = vpack.c.bf16 %v12082_v57, %v12077_v56  ;;  %v2076_v57 = vld [vmem:[%s12743_s1 + $0xa4] sm:$0xff] }
 0x246   :  { %v2075_v56 = vld [vmem:[%s12743_s1 + $0x9c] sm:$0xff] }
 0x248   :  { %10196 = vmatpush3.bf16.msra.mxu1 %v10532_v0  ;;  %v2097_v0 = vshll.u32 %v10537_v53, 16 }
 0x249   :  { %10209 = vmatprep.subr.bf16.mxu1 %v11441_v46 }
 0x24a   :  { %v2099_v7 = vrot.slane %v2097_v0, 4 }
 0x24b   :  { %10186 = vmatmul.mubr.msk.bf16.gmra.mrb[48].mxu1 %vm1081_vm5, %v1281_v6  ;;  %v2096_v6 = vrot.slane %v2094_v54, 3 }
 0x24c   :  { %10189 = vmatprep.mubr.msk.bf16.mxu1 %vm11442_vm3, %v11441_v46 }
 0x24d   :  { %v2100_v12 = vor.u32 %v2099_v7, %v2096_v6  ;;  %v2077_v7 = vld [vmem:[%s12743_s1 + $0xac] sm:$0xff] }
 0x24f   :  { %v2126_v63 = vand.u32 %v2100_v12, %v11668_v2  ;;  %v12182_v2 = vld [vmem:[%s12743_s1 + $0x80] sm:$0xff] }
 0x250   :  { %v2257_v31 = vpack.c.bf16 %v12187_v18, %v12182_v2 }
 0x253   :  { %10190 = vmatmul.mubr.msk.bf16.gmra.mrb[52].mxu1 %vm1081_vm5, %v1282_v9  ;;  %v1592_v9 = vld [vmem:[%s12743_s1 + $0x18] sm:$0xff] }
 0x254   :  { %10197 = vmatprep.mubr.msk.bf16.mxu1 %vm11442_vm3, %v11441_v46  ;;  %v1605_v13 = vpack.c.bf16 %v1592_v9, %v1591_v8 }
 0x25b   :  { %10198 = vmatmul.mubr.msk.bf16.vlgmr.msra.gmra.mrb[56].mxu1 %vm1081_vm5, %v1374_v17  ;;  %v1596_v17 = vld [vmem:[%s12743_s1 + $0x38] sm:$0xff] }
 0x25c   :  { %10210 = vmatpush3.bf16.msra.mxu1 %v10533_v15  ;;  %10201 = vmatprep.mubr.msk.bf16.mxu1 %vm11442_vm3, %v11441_v46  ;;  %v1595_v15 = vld [vmem:[%s12743_s1 + $0x30] sm:$0xff] }
 0x25d   :  { %10211 = vmatprep.subr.bf16.mxu1 %v11441_v46 }
 0x260   :  { %10212 = vmatpush3.bf16.msra.mxu1 %v10534_v19  ;;  %v1598_v19 = vld [vmem:[%s12743_s1 + $0x48] sm:$0xff] }
 0x261   :  { %10225 = vmatprep.subr.bf16.mxu1 %v1676_v20  ;;  %v1608_v3 = vpack.c.bf16 %v1598_v19, %v1597_v1  ;;  %v1914_v34 = vpack.c.bf16 %v1599_v22, %v1598_v19 }
 0x263   :  { %10202 = vmatmul.mubr.msk.bf16.gmra.mrb[60].mxu1 %vm1081_vm5, %v1375_v4  ;;  %v1600_v4 = vld [vmem:[%s12743_s1 + $0x58] sm:$0xff] }
 0x264   :  { %10205 = vmatprep.mubr.msk.bf16.mxu1 %vm11442_vm3, %v11441_v46  ;;  %v12151_v26 = vpack.c.bf16 %v1600_v4, %v1599_v22  ;;  %v1915_v36 = vpack.c.bf16 %v1601_v24, %v1600_v4  ;;  %v10544_v4 = vld [vmem:[#allocation15 + $0x6c] ss:$16 sps:$4 sm:$0xff]  }
 0x26b   :  { %10206 = vmatmul.mubr.msk.bf16.gmra.mrb[64].mxu1 %vm1081_vm5, %v1376_v25  ;;  %v1602_v25 = vld [vmem:[%s12743_s1 + $0x68] sm:$0xff] }
 0x26c   :  { %10213 = vmatprep.mubr.msk.bf16.mxu1 %vm11442_vm3, %v11441_v46  ;;  %v12153_v27 = vpack.c.bf16 %v1602_v25, %v1601_v24  ;;  %v10542_v24 = vld [vmem:[#allocation15 + $0x68] ss:$16 sps:$4 sm:$0xff]  }
 0x273   :  { %10214 = vmatmul.mubr.msk.bf16.vlgmr.msra.gmra.mrb[68].mxu1 %vm1081_vm5, %v1468_v29  ;;  %v1611_v29 = vpack.c.bf16 %v12162_v28, %v12162_v28 }
 0x274   :  { %10226 = vmatpush3.bf16.msra.mxu1 %v1676_v20  ;;  %10217 = vmatprep.mubr.msk.bf16.mxu1 %vm11442_vm3, %v11441_v46  ;;  %v1607_v20 = vpack.c.bf16 %v1596_v17, %v1595_v15 }
 0x275   :  { %10243 = vmatprep.subr.bf16.mxu1 %v1799_v30 }
 0x27b   :  { %10218 = vmatmul.mubr.msk.bf16.gmra.mrb[72].mxu1 %vm1081_vm5, %v1469_v33  ;;  %v1913_v33 = vpack.c.bf16 %v1597_v1, %v1596_v17 }
 0x27c   :  { %10221 = vmatprep.mubr.msk.bf16.mxu1 %vm11442_vm3, %v11441_v46 }
 0x283   :  { %10222 = vmatmul.mubr.msk.bf16.gmra.mrb[76].mxu1 %vm1081_vm5, %v1470_v16  ;;  %v12177_v16 = vld [vmem:[%s12743_s1 + $0x78] sm:$0xff] }
 0x284   :  { %10227 = vmatprep.mubr.msk.bf16.mxu1 %vm252_vm2, %v1628_v37  ;;  %v1916_v37 = vpack.c.bf16 %v12162_v28, %v1602_v25  ;;  %v1917_v39 = vpack.c.bf16 %v12182_v2, %v12177_v16  ;;  %v2256_v19 = vpack.c.bf16 %v12177_v16, %v12162_v28  ;;  %v10547_v25 = vld [vmem:[#allocation15 + $0xc] ss:$16 sps:$4 sm:$0xff]  }
 0x28b   :  { %10228 = vmatmul.mubr.msk.bf16.vlgmr.msra.gmra.mrb[80].mxu1 %vm252_vm2, %v1629_v21  ;;  %v1919_v21 = vpack.c.bf16 %v12203_v42, %v12203_v42 }
 0x28c   :  { %10244 = vmatpush3.bf16.msra.mxu1 %v1799_v30  ;;  %10231 = vmatprep.mubr.msk.bf16.mxu1 %vm252_vm2, %v1630_v43  ;;  %v1912_v30 = vpack.c.bf16 %v1595_v15, %v1594_v11  ;;  %v2078_v43 = vpack.c.bf16 %v12046_v45, %v12037_v41  ;;  %v2085_v11 = vpack.c.bf16 %v2077_v7, %v2077_v7 }
 0x28d   :  { %10261 = vmatprep.subr.bf16.mxu1 %v1950_v44 }
 0x293   :  { %10232 = vmatmul.mubr.msk.bf16.gmra.mrb[84].mxu1 %vm252_vm2, %v1631_v49 }
 0x294   :  { %10235 = vmatprep.mubr.msk.bf16.mxu1 %vm252_vm2, %v1632_v50  ;;  %v2079_v50 = vpack.c.bf16 %v12056_v47, %v12051_v23  ;;  %v2082_v23 = vpack.c.bf16 %v12098_v60, %v12087_v52 }
 0x29b   :  { %10236 = vmatmul.mubr.msk.bf16.gmra.mrb[88].mxu1 %vm252_vm2, %v1633_v58 }
 0x29c   :  { %10239 = vmatprep.mubr.msk.bf16.mxu1 %vm252_vm2, %v1634_v59  ;;  %v2080_v59 = vpack.c.bf16 %v12072_v51, %v12061_v48  ;;  %v2073_v48 = vld [vmem:[%s12743_s1 + $0x8c] sm:$0xff]  ;;  %v2074_v51 = vld [vmem:[%s12743_s1 + $0x94] sm:$0xff] }
 0x29d   :  { %v2083_v0 = vpack.c.bf16 %v2074_v51, %v2073_v48 }
 0x2a3   :  { %10240 = vmatmul.mubr.msk.bf16.gmra.mrb[92].mxu1 %vm252_vm2, %v1635_v55 }
 0x2a4   :  { %10245 = vmatprep.mubr.msk.bf16.mxu1 %vm252_vm2, %v1604_v5  ;;  %v2084_v5 = vpack.c.bf16 %v2076_v57, %v2075_v56 }
 0x2ab   :  { %10246 = vmatmul.mubr.msk.bf16.vlgmr.msra.gmra.mrb[80].mxu1 %vm252_vm2, %v1605_v13 }
 0x2ac   :  { %10262 = vmatpush3.bf16.msra.mxu1 %v1950_v44  ;;  %10249 = vmatprep.mubr.msk.bf16.mxu1 %vm252_vm2, %v1606_v14 }
 0x2ad   :  { %10279 = vmatprep.subr.bf16.mxu1 %v2126_v63 }
 0x2b3   :  { %10250 = vmatmul.mubr.msk.bf16.gmra.mrb[84].mxu1 %vm252_vm2, %v1607_v20  ;;  %v10539_v20 = vld [vmem:[#allocation15 + $0x48] ss:$16 sps:$4 sm:$0xff]  }
 0x2b4   :  { %10253 = vmatprep.mubr.msk.bf16.mxu1 %vm252_vm2, %v1608_v3 }
 0x2bb   :  { %10254 = vmatmul.mubr.msk.bf16.gmra.mrb[88].mxu1 %vm252_vm2, %v12151_v26 }
 0x2bc   :  { %10257 = vmatprep.mubr.msk.bf16.mxu1 %vm252_vm2, %v12153_v27 }
 0x2c3   :  { %10258 = vmatmul.mubr.msk.bf16.gmra.mrb[96].mxu1 %vm252_vm2, %v1611_v29 }
 0x2c4   :  { %10263 = vmatprep.mubr.msk.bf16.mxu1 %vm252_vm2, %v1912_v30 }
 0x2cb   :  { %10264 = vmatmul.mubr.msk.bf16.vlgmr.msra.gmra.mrb[80].mxu1 %vm252_vm2, %v1913_v33 }
 0x2cc   :  { %10280 = vmatpush3.bf16.msra.mxu1 %v2126_v63  ;;  %10267 = vmatprep.mubr.msk.bf16.mxu1 %vm252_vm2, %v1914_v34  ;;  %v2250_v34 = vld [vmem:[%s12743_s1 + $0xa8] sm:$0xff] }
 0x2cd   :  { %10297 = vmatprep.subr.bf16.mxu1 %v2295_v35 }
 0x2d3   :  { %10268 = vmatmul.mubr.msk.bf16.gmra.mrb[84].mxu1 %vm252_vm2, %v1915_v36  ;;  %v2252_v36 = vld [vmem:[%s12743_s1 + $0xb8] sm:$0xff] }
 0x2d4   :  { %10271 = vmatprep.mubr.msk.bf16.mxu1 %vm252_vm2, %v1916_v37 }
 0x2db   :  { %10272 = vmatmul.mubr.msk.bf16.gmra.mrb[88].mxu1 %vm252_vm2, %v1917_v39 }
 0x2dc   :  { %10275 = vmatprep.mubr.msk.bf16.mxu1 %vm252_vm2, %v1918_v40 }
 0x2e3   :  { %10276 = vmatmul.mubr.msk.bf16.gmra.mrb[100].mxu1 %vm252_vm2, %v1919_v21  ;;  %v2253_v21 = vld [vmem:[%s12743_s1 + $0xc0] sm:$0xff] }
 0x2e4   :  { %10281 = vmatprep.mubr.msk.bf16.mxu1 %vm252_vm2, %v2078_v43 }
 0x2e6   :  { %v1176_v44 = vpop.f32.mrb[20].mxu1 }
 0x2e7   :  { %v10151_v49 = vpop.f32.mrb[21].mxu1 }
 0x2e8   :  { %v1179_v58 = vpop.f32.mrb[22].mxu1 }
 0x2e9   :  { %v10152_v53 = vpop.f32.mrb[23].mxu1 }
 0x2eb   :  { %10282 = vmatmul.mubr.msk.bf16.vlgmr.msra.gmra.mrb[80].mxu1 %vm252_vm2, %v2079_v50  ;;  %v2261_v50 = vpack.c.bf16 %v2253_v21, %v2253_v21 }
 0x2ec   :  { %10298 = vmatpush3.bf16.msra.mxu1 %v2295_v35  ;;  %10285 = vmatprep.mubr.msk.bf16.mxu1 %vm252_vm2, %v2080_v59  ;;  %v2251_v35 = vld [vmem:[%s12743_s1 + $0xb0] sm:$0xff] }
 0x2ed   :  { %3086 = vmatprep.subr.bf16.mxu1 %v10541_v61  ;;  %v2260_v39 = vpack.c.bf16 %v2252_v36, %v2251_v35  ;;  %v11443_v61 = vmov 0   ;;  %v10545_v35 = vld [vmem:[#allocation15 + $0x8] ss:$16 sps:$4 sm:$0xff]  }
 0x2ee   :  { %v1184_v41 = vpop.f32.mrb[24].mxu1 }
 0x2ef   :  { %v10155_v45 = vpop.f32.mrb[25].mxu1 }
 0x2f0   :  { %v1187_v54 = vpop.f32.mrb[26].mxu1 }
 0x2f1   :  { %v10156_v47 = vpop.f32.mrb[27].mxu1 }
 0x2f3   :  { %10286 = vmatmul.mubr.msk.bf16.gmra.mrb[84].mxu1 %vm252_vm2, %v2081_v62 }
 0x2f4   :  { %10289 = vmatprep.mubr.msk.bf16.mxu1 %vm252_vm2, %v2082_v23 }
 0x2f6   :  { %v1192_v52 = vpop.f32.mrb[28].mxu1 }
 0x2f7   :  { %v10159_v60 = vpop.f32.mrb[29].mxu1 }
 0x2f8   :  { %v1195_v55 = vpop.f32.mrb[30].mxu1 }
 0x2f9   :  { %v10160_v6 = vpop.f32.mrb[31].mxu1 }
 0x2fb   :  { %10290 = vmatmul.mubr.msk.bf16.gmra.mrb[88].mxu1 %vm252_vm2, %v2083_v0 }
 0x2fc   :  { %10293 = vmatprep.mubr.msk.bf16.mxu1 %vm252_vm2, %v2084_v5 }
 0x2fe   :  { %v1253_v8 = vpop.f32.mrb[32].mxu1 }
 0x2ff   :  { %v1254_v9 = vadd.f32 %v1253_v8, %v1176_v44  ;;  %v10167_v10 = vpop.f32.mrb[33].mxu1 }
 0x300   :  { %v1256_v12 = vpop.f32.mrb[34].mxu1 }
 0x301   :  { %v1257_v13 = vadd.f32 %v1256_v12, %v1179_v58  ;;  %v10168_v14 = vpop.f32.mrb[35].mxu1 }
 0x302   :  { %v9340_v14 = vld [vmem:[#allocation9] ss:$0 sm:$0xff] }
 0x303   :  { %10294 = vmatmul.mubr.msk.bf16.gmra.mrb[104].mxu1 %vm252_vm2, %v2085_v11 }
 0x304   :  { %10299 = vmatprep.mubr.msk.bf16.mxu1 %vm252_vm2, %v12151_v26 }
 0x306   :  { %v1261_v63 = vpop.f32.mrb[36].mxu1 }
 0x307   :  { %v1262_v15 = vadd.f32 %v1261_v63, %v1184_v41  ;;  %v10171_v17 = vpop.f32.mrb[37].mxu1 }
 0x308   :  { %v1264_v1 = vpop.f32.mrb[38].mxu1 }
 0x309   :  { %v1265_v3 = vadd.f32 %v1264_v1, %v1187_v54  ;;  %v10172_v22 = vpop.f32.mrb[39].mxu1 }
 0x30b   :  { %10300 = vmatmul.mubr.msk.bf16.vlgmr.msra.gmra.mrb[80].mxu1 %vm252_vm2, %v12153_v27  ;;  %v2249_v27 = vld [vmem:[%s12743_s1 + $0xa0] sm:$0xff] }
 0x30c   :  { %10303 = vmatprep.mubr.msk.bf16.mxu1 %vm252_vm2, %v2256_v19  ;;  %3087 = vmatpush1.bf16.msra.mxu1 %v10539_v20  ;;  %v2259_v18 = vpack.c.bf16 %v2250_v34, %v2249_v27 }
 0x30d   :  { %3088 = vmatprep.subr.bf16.mxu1 %v10544_v4 }
 0x30e   :  { %v1269_v26 = vpop.f32.mrb[40].mxu1 }
 0x30f   :  { %v1270_v29 = vadd.f32 %v1269_v26, %v1192_v52  ;;  %v10175_v30 = vpop.f32.mrb[41].mxu1 }
 0x310   :  { %v1272_v28 = vpop.f32.mrb[42].mxu1  ;;  %3089 = vmatpush1.bf16.msra.mxu1 %v10542_v24 }
 0x311   :  { %v10176_v33 = vpop.f32.mrb[43].mxu1  ;;  %3211 = vmatprep.subr.bf16.mxu1 %v10547_v25 }
 0x313   :  { %10304 = vmatmul.mubr.msk.bf16.gmra.mrb[84].mxu1 %vm252_vm2, %v2257_v31 }
 0x314   :  { %10307 = vmatprep.mubr.msk.bf16.mxu1 %vm252_vm2, %v2258_v32 }
 0x316   :  { %v1342_v37 = vpop.f32.mrb[44].mxu1 }
 0x317   :  { %v1364_v16 = vadd.f32 %v1342_v37, %v1254_v9  ;;  %v10183_v2 = vpop.f32.mrb[45].mxu1 }
 0x318   :  { %v1345_v38 = vpop.f32.mrb[46].mxu1 }
 0x319   :  { %v1365_v40 = vadd.f32 %v1345_v38, %v1257_v13  ;;  %v10184_v42 = vpop.f32.mrb[47].mxu1  ;;  %v10550_v38 = vld [vmem:[#allocation15 + $0x2c] ss:$16 sps:$4 sm:$0xff]  }
 0x31b   :  { %10308 = vmatmul.mubr.msk.bf16.gmra.mrb[88].mxu1 %vm252_vm2, %v2259_v18 }
 0x31c   :  { %10311 = vmatprep.mubr.msk.bf16.mxu1 %vm252_vm2, %v2260_v39 }
 0x31e   :  { %v1350_v43 = vpop.f32.mrb[48].mxu1 }
 0x31f   :  { %v1366_v44 = vadd.f32 %v1350_v43, %v1262_v15  ;;  %v10187_v49 = vpop.f32.mrb[49].mxu1  ;;  %v10641_v43 = vld [vmem:[%s12750_s8 + $0x10] sm:$0xff]  }
 0x320   :  { %v1353_v58 = vpop.f32.mrb[50].mxu1  ;;  %10316 = vmatpush3.bf16.msra.mxu0 %v10641_v43 }
 0x321   :  { %v1367_v59 = vadd.f32 %v1353_v58, %v1265_v3  ;;  %v10188_v53 = vpop.f32.mrb[51].mxu1  ;;  %v10553_v58 = vld [vmem:[#allocation15 + $0x8c] ss:$16 sps:$4 sm:$0xff]   ;;  %10317 = vmatprep.subr.bf16.mxu0 %v11441_v46 }
 0x323   :  { %10312 = vmatmul.mubr.msk.bf16.gmra.mrb[108].mxu1 %vm252_vm2, %v2261_v50  ;;  %v10548_v50 = vld [vmem:[#allocation15 + $0x28] ss:$16 sps:$4 sm:$0xff]  }
 0x324   :  { %3118 = vmatprep.mubr.bf16.mxu1 %v11443_v61 }
 0x326   :  { %v1358_v41 = vpop.f32.mrb[52].mxu1 }
 0x327   :  { %v1368_v45 = vadd.f32 %v1358_v41, %v1270_v29  ;;  %v10191_v62 = vpop.f32.mrb[53].mxu1 }
 0x328   :  { %v1361_v54 = vpop.f32.mrb[54].mxu1 }
 0x329   :  { %v10192_v23 = vpop.f32.mrb[55].mxu1  ;;  %v10556_v54 = vld [vmem:[#allocation15 + $0xac] ss:$16 sps:$4 sm:$0xff]  }
 0x32a   :  { %v10554_v23 = vld [vmem:[#allocation15 + $0xa8] ss:$16 sps:$4 sm:$0xff]  }
 0x32e   :  { %v1436_v47 = vpop.f32.mrb[56].mxu1 }
 0x32f   :  { %v1458_v48 = vadd.f32 %v1436_v47, %v1364_v16  ;;  %v10199_v51 = vpop.f32.mrb[57].mxu1  ;;  %v10559_v47 = vld [vmem:[#allocation15 + $0xcc] ss:$16 sps:$4 sm:$0xff]  }
 0x330   :  { %v1439_v56 = vpop.f32.mrb[58].mxu1  ;;  %v10557_v51 = vld [vmem:[#allocation15 + $0xc8] ss:$16 sps:$4 sm:$0xff]  }
 0x331   :  { %v1459_v57 = vadd.f32 %v1439_v56, %v1365_v40  ;;  %v10200_v52 = vpop.f32.mrb[59].mxu1 }
 0x332   :  { %v10560_v52 = vld [vmem:[#allocation15 + $0xe8] ss:$16 sps:$4 sm:$0xff]  }
 0x336   :  { %v1444_v60 = vpop.f32.mrb[60].mxu1 }
 0x337   :  { %v1460_v0 = vadd.f32 %v1444_v60, %v1366_v44  ;;  %v10203_v55 = vpop.f32.mrb[61].mxu1  ;;  %v10565_v60 = vld [vmem:[#allocation15 + $0x10c] ss:$16 sps:$4 sm:$0xff]  }
 0x338   :  { %v1447_v5 = vpop.f32.mrb[62].mxu1  ;;  %v10563_v55 = vld [vmem:[#allocation15 + $0x108] ss:$16 sps:$4 sm:$0xff]  }
 0x339   :  { %v1461_v6 = vadd.f32 %v1447_v5, %v1367_v59  ;;  %v10204_v7 = vpop.f32.mrb[63].mxu1 }
 0x33a   :  { %v10654_v7 = vld [vmem:[%s12750_s8 + $0x18] sm:$0xff]  }
 0x33b   :  { %10318 = vmatpush3.bf16.msra.mxu0 %v10654_v7 }
 0x33c   :  { %10331 = vmatprep.subr.bf16.mxu0 %v11441_v46 }
 0x33e   :  { %v1452_v8 = vpop.f32.mrb[64].mxu1 }
 0x33f   :  { %v1462_v9 = vadd.f32 %v1452_v8, %v1368_v45  ;;  %v10207_v10 = vpop.f32.mrb[65].mxu1  ;;  %v10551_v45 = vld [vmem:[#allocation15 + $0x88] ss:$16 sps:$4 sm:$0xff]  }
 0x340   :  { %v1455_v11 = vpop.f32.mrb[66].mxu1  ;;  %v10566_v8 = vld [vmem:[#allocation15 + $0x128] ss:$16 sps:$4 sm:$0xff]  }
 0x341   :  { %v10208_v12 = vpop.f32.mrb[67].mxu1  ;;  %v10569_v11 = vld [vmem:[#allocation15 + $0x148] ss:$16 sps:$4 sm:$0xff]  }
 0x346   :  { %v1530_v13 = vpop.f32.mrb[68].mxu1 }
 0x347   :  { %v1552_v63 = vadd.f32 %v1530_v13, %v1458_v48  ;;  %v10215_v15 = vpop.f32.mrb[69].mxu1 }
 0x348   :  { %v1533_v17 = vpop.f32.mrb[70].mxu1 }
 0x349   :  { %v1564_v1 = vadd.f32 %v9340_v14, %v1552_v63  ;;  %v1553_v19 = vadd.f32 %v1533_v17, %v1459_v57  ;;  %v10216_v20 = vpop.f32.mrb[71].mxu1  ;;  %v10562_v57 = vld [vmem:[#allocation15 + $0xec] ss:$16 sps:$4 sm:$0xff]  }
 0x34b   :  { %vm1569_vm2 = vcmp.gt.f32.partialorder %v1564_v1, 0.0  ;;  %v1574_v3 = vmul.f32 0.01, %v1564_v1  ;;  %v1565_v22 = vadd.f32 %v9340_v14, %v1553_v19  ;;  %v10577_v19 = vld [vmem:[#allocation15 + $0x18c] ss:$16 sps:$4 sm:$0xff]  }
 0x34d   :  { %v1579_v4 = vsel %vm1569_vm2, %v1564_v1, %v1574_v3  ;;  %vm1570_vm7 = vcmp.gt.f32.partialorder %v1565_v22, 0.0  ;;  %v1575_v24 = vmul.f32 0.01, %v1565_v22  ;;  %v10572_v1 = vld [vmem:[#allocation15 + $0x168] ss:$16 sps:$4 sm:$0xff]  }
 0x34e   :  { %1584 = vst.msk [vmem:[#allocation3] sm:$0xff] %vm1081_vm5, %v1579_v4  ;;  %v1538_v25 = vpop.f32.mrb[72].mxu1  ;;  %v10575_v3 = vld [vmem:[#allocation15 + $0x188] ss:$16 sps:$4 sm:$0xff]   ;;  %v10580_v4 = vld [vmem:[#allocation15 + $0x1ac] ss:$16 sps:$4 sm:$0xff]  }
 0x34f   :  { %v1580_v26 = vsel %vm1570_vm7, %v1565_v22, %v1575_v24  ;;  %v1554_v29 = vadd.f32 %v1538_v25, %v1460_v0  ;;  %v10219_v30 = vpop.f32.mrb[73].mxu1  ;;  %v10578_v24 = vld [vmem:[#allocation15 + $0x1a8] ss:$16 sps:$4 sm:$0xff]   ;;  %v10583_v25 = vld [vmem:[#allocation15 + $0x1cc] ss:$16 sps:$4 sm:$0xff]  }
 0x350   :  { %1585 = vst.msk [vmem:[#allocation3 + $0x8] sm:$0xff] %vm1081_vm5, %v1580_v26  ;;  %v1541_v31 = vpop.f32.mrb[74].mxu1 }
 0x351   :  { %v1566_v28 = vadd.f32 %v9340_v14, %v1554_v29  ;;  %v1555_v32 = vadd.f32 %v1541_v31, %v1461_v6  ;;  %v10220_v33 = vpop.f32.mrb[75].mxu1  ;;  %v10568_v6 = vld [vmem:[#allocation15 + $0x12c] ss:$16 sps:$4 sm:$0xff]   ;;  %v10581_v29 = vld [vmem:[#allocation15 + $0x1c8] ss:$16 sps:$4 sm:$0xff]  }
 0x352   :  { %v10586_v31 = vld [vmem:[#allocation15 + $0x1ec] ss:$16 sps:$4 sm:$0xff]  }
 0x353   :  { %vm1571_vm8 = vcmp.gt.f32.partialorder %v1566_v28, 0.0  ;;  %v1576_v27 = vmul.f32 0.01, %v1566_v28  ;;  %v1567_v34 = vadd.f32 %v9340_v14, %v1555_v32  ;;  %v10589_v32 = vld [vmem:[#allocation15 + $0x20c] ss:$16 sps:$4 sm:$0xff]  }
 0x355   :  { %v1581_v36 = vsel %vm1571_vm8, %v1566_v28, %v1576_v27  ;;  %vm1572_vm9 = vcmp.gt.f32.partialorder %v1567_v34, 0.0  ;;  %v1577_v37 = vmul.f32 0.01, %v1567_v34  ;;  %v2992_v16 = vld [vmem:[#allocation3 + $0x2] sm:$0x3] }
 0x356   :  { %1586 = vst.msk [vmem:[#allocation3 + $0x10] sm:$0xff] %vm1081_vm5, %v1581_v36  ;;  %v1546_v2 = vpop.f32.mrb[76].mxu1  ;;  %v12276_v18 = vpack.c.bf16 %v2992_v16, %v2992_v16  ;;  %v2982_v53 = vld [vmem:[#allocation3] sm:$0x3]  ;;  %v3252_v48 = vld [vmem:[#allocation3 + $0x4] sm:$0x3] }
 0x357   :  { %v1582_v39 = vsel %vm1572_vm9, %v1567_v34, %v1577_v37  ;;  %v1556_v40 = vadd.f32 %v1546_v2, %v1462_v9  ;;  %v10223_v42 = vpop.f32.mrb[77].mxu1  ;;  %v12287_v62 = vpack.c.bf16 %v2982_v53, %v2982_v53  ;;  %v12292_v56 = vpack.c.bf16 %v3252_v48, %v3252_v48  ;;  %v3391_v0 = vld [vmem:[#allocation3 + $0x6] sm:$0x3]  ;;  %v3530_v10 = vld [vmem:[#allocation3 + $0x8] sm:$0x3] }
 0x358   :  { %1587 = vst.msk [vmem:[#allocation3 + $0x18] sm:$0xff] %vm1081_vm5, %v1582_v39  ;;  %v1549_v21 = vpop.f32.mrb[78].mxu1  ;;  %9421 = vmatmul.mubr.msk.bf16.vlgmr.msra.gmra.mrb[112].mxu1 %vm1081_vm5, %v12276_v18  ;;  %v12297_v5 = vpack.c.bf16 %v3391_v0, %v3391_v0  ;;  %v10571_v9 = vld [vmem:[#allocation15 + $0x14c] ss:$16 sps:$4 sm:$0xff]   ;;  %v12306_v13 = vpack.c.bf16 %v3530_v10, %v3530_v10  ;;  %v3669_v20 = vld [vmem:[#allocation3 + $0xa] sm:$0x3] }
 0x359   :  { %v1568_v44 = vadd.f32 %v9340_v14, %v1556_v40  ;;  %v10224_v49 = vpop.f32.mrb[79].mxu1  ;;  %3212 = vmatpush1.bf16.msra.mxu1 %v10545_v35  ;;  %3243 = vmatprep.mubr.bf16.mxu1 %v11443_v61  ;;  %v10574_v14 = vld [vmem:[#allocation15 + $0x16c] ss:$16 sps:$4 sm:$0xff]   ;;  %v12311_v22 = vpack.c.bf16 %v3669_v20, %v3669_v20  ;;  %v3808_v26 = vld [vmem:[#allocation3 + $0xc] sm:$0x3] }
 0x35a   :  { %3213 = vmatprep.subr.bf16.mxu1 %v10550_v38  ;;  %v12316_v30 = vpack.c.bf16 %v3808_v26, %v3808_v26  ;;  %v10584_v28 = vld [vmem:[#allocation15 + $0x1e8] ss:$16 sps:$4 sm:$0xff]   ;;  %v3947_v33 = vld [vmem:[#allocation3 + $0xe] sm:$0x3]  ;;  %v10592_v35 = vld [vmem:[#allocation15 + $0x22c] ss:$16 sps:$4 sm:$0xff]  }
 0x35b   :  { %vm1573_vm10 = vcmp.gt.f32.partialorder %v1568_v44, 0.0  ;;  %v1578_v59 = vmul.f32 0.01, %v1568_v44  ;;  %v10587_v27 = vld [vmem:[#allocation15 + $0x208] ss:$16 sps:$4 sm:$0xff]   ;;  %v12321_v34 = vpack.c.bf16 %v3947_v33, %v3947_v33 }
 0x35c   :  { %v10590_v36 = vld [vmem:[#allocation15 + $0x228] ss:$16 sps:$4 sm:$0xff]   ;;  %v10595_v37 = vld [vmem:[#allocation15 + $0x24c] ss:$16 sps:$4 sm:$0xff]  }
 0x35d   :  { %v1583_v41 = vsel %vm1573_vm10, %v1568_v44, %v1578_v59  ;;  %3214 = vmatpush1.bf16.msra.mxu1 %v10548_v50  ;;  %v4086_v16 = vld [vmem:[#allocation3 + $0x10] sm:$0x3]  ;;  %v10598_v40 = vld [vmem:[#allocation15 + $0x26c] ss:$16 sps:$4 sm:$0xff]   ;;  %v4225_v53 = vld [vmem:[#allocation3 + $0x12] sm:$0x3] }
 0x35e   :  { %1588 = vst.msk [vmem:[#allocation3 + $0x20] sm:$0xff] %vm1081_vm5, %v1583_v41  ;;  %3346 = vmatprep.subr.bf16.mxu1 %v10553_v58  ;;  %v10593_v2 = vld [vmem:[#allocation15 + $0x248] ss:$16 sps:$4 sm:$0xff]   ;;  %v12326_v39 = vpack.c.bf16 %v4086_v16, %v4086_v16  ;;  %v10601_v59 = vld [vmem:[#allocation15 + $0x28c] ss:$16 sps:$4 sm:$0xff]  }
 0x35f   :  { %v10596_v50 = vld [vmem:[#allocation15 + $0x268] ss:$16 sps:$4 sm:$0xff]   ;;  %v4364_v48 = vld [vmem:[#allocation3 + $0x14] sm:$0x3]  ;;  %v4781_v26 = vld [vmem:[#allocation3 + $0x1a] sm:$0x3] }
 0x360   :  { %9431 = vmatmul.mubr.msk.bf16.vlgmr.msra.gmra.mrb[116].mxu1 %vm1081_vm5, %v12287_v62  ;;  %v10599_v41 = vld [vmem:[#allocation15 + $0x288] ss:$16 sps:$4 sm:$0xff]   ;;  %v10613_v0 = vld [vmem:[#allocation15 + $0x30c] ss:$16 sps:$4 sm:$0xff]  }
 0x361   :  { %3347 = vmatpush1.bf16.msra.mxu1 %v10551_v45  ;;  %3378 = vmatprep.mubr.bf16.mxu1 %v11443_v61  ;;  %v12331_v45 = vpack.c.bf16 %v4225_v53, %v4225_v53  ;;  %v10619_v10 = vld [vmem:[#allocation15 + $0x34c] ss:$16 sps:$4 sm:$0xff]   ;;  %v10632_v16 = vld [vmem:[#allocation15 + $0x3e8] ss:$16 sps:$4 sm:$0xff]  }
 0x362   :  { %3348 = vmatprep.subr.bf16.mxu1 %v10556_v54  ;;  %v10604_v54 = vld [vmem:[#allocation15 + $0x2ac] ss:$16 sps:$4 sm:$0xff]  }
 0x363   :  { %v10631_v33 = vld [vmem:[#allocation15 + $0x3cc] ss:$16 sps:$4 sm:$0xff]  }
 0x364   :  { %v10647_v53 = vld [vmem:[#allocation15 + $0x46c] ss:$16 sps:$4 sm:$0xff]  }
 0x365   :  { %3349 = vmatpush1.bf16.msra.mxu1 %v10554_v23  ;;  %v10602_v23 = vld [vmem:[#allocation15 + $0x2a8] ss:$16 sps:$4 sm:$0xff]  }
 0x366   :  { %3485 = vmatprep.subr.bf16.mxu1 %v10559_v47  ;;  %v10607_v47 = vld [vmem:[#allocation15 + $0x2cc] ss:$16 sps:$4 sm:$0xff]  }
 0x368   :  { %9441 = vmatmul.mubr.msk.bf16.vlgmr.msra.gmra.mrb[120].mxu1 %vm1081_vm5, %v12292_v56 }
 0x369   :  { %3486 = vmatpush1.bf16.msra.mxu1 %v10557_v51  ;;  %3517 = vmatprep.mubr.bf16.mxu1 %v11443_v61  ;;  %v10605_v51 = vld [vmem:[#allocation15 + $0x2c8] ss:$16 sps:$4 sm:$0xff]  }
 0x36a   :  { %3487 = vmatprep.subr.bf16.mxu1 %v10562_v57  ;;  %v12336_v57 = vpack.c.bf16 %v4364_v48, %v4364_v48 }
 0x36d   :  { %3488 = vmatpush1.bf16.msra.mxu1 %v10560_v52  ;;  %v10610_v52 = vld [vmem:[#allocation15 + $0x2ec] ss:$16 sps:$4 sm:$0xff]  }
 0x36e   :  { %3624 = vmatprep.subr.bf16.mxu1 %v10565_v60  ;;  %v10608_v60 = vld [vmem:[#allocation15 + $0x2e8] ss:$16 sps:$4 sm:$0xff]  }
 0x370   :  { %9451 = vmatmul.mubr.msk.bf16.vlgmr.msra.gmra.mrb[124].mxu1 %vm1081_vm5, %v12297_v5 }
 0x371   :  { %3625 = vmatpush1.bf16.msra.mxu1 %v10563_v55  ;;  %3656 = vmatprep.mubr.bf16.mxu1 %v11443_v61  ;;  %v4503_v55 = vld [vmem:[#allocation3 + $0x16] sm:$0x3] }
 0x372   :  { %3626 = vmatprep.subr.bf16.mxu1 %v10568_v6  ;;  %v10611_v6 = vld [vmem:[#allocation15 + $0x308] ss:$16 sps:$4 sm:$0xff]   ;;  %v12341_v7 = vpack.c.bf16 %v4503_v55, %v4503_v55  ;;  %v12377_v55 = vld [vmem:[#allocation12] ss:$0 sm:$0xff] }
 0x375   :  { %3627 = vmatpush1.bf16.msra.mxu1 %v10566_v8  ;;  %v10616_v8 = vld [vmem:[#allocation15 + $0x32c] ss:$16 sps:$4 sm:$0xff]  }
 0x376   :  { %v10241_v12 = vpop.f32.mrb[92].mxu1  ;;  %3763 = vmatprep.subr.bf16.mxu1 %v10571_v9  ;;  %v10614_v9 = vld [vmem:[#allocation15 + $0x328] ss:$16 sps:$4 sm:$0xff]  }
 0x377   :  { %v1760_v63 = vpop.f32.mrb[93].mxu1 }
 0x378   :  { %v10242_v15 = vpop.f32.mrb[94].mxu1  ;;  %9461 = vmatmul.mubr.msk.bf16.vlgmr.msra.gmra.mrb[128].mxu1 %vm1081_vm5, %v12306_v13 }
 0x379   :  { %v1763_v17 = vpop.f32.mrb[95].mxu1  ;;  %3764 = vmatpush1.bf16.msra.mxu1 %v10569_v11  ;;  %3795 = vmatprep.mubr.bf16.mxu1 %v11443_v61  ;;  %v4642_v11 = vld [vmem:[#allocation3 + $0x18] sm:$0x3]  ;;  %v10622_v15 = vld [vmem:[#allocation15 + $0x36c] ss:$16 sps:$4 sm:$0xff]  }
 0x37a   :  { %3765 = vmatprep.subr.bf16.mxu1 %v10574_v14 }
 0x37d   :  { %3766 = vmatpush1.bf16.msra.mxu1 %v10572_v1 }
 0x37e   :  { %3902 = vmatprep.subr.bf16.mxu1 %v10577_v19 }
 0x380   :  { %9471 = vmatmul.mubr.msk.bf16.vlgmr.msra.gmra.mrb[132].mxu1 %vm1081_vm5, %v12311_v22 }
 0x381   :  { %3903 = vmatpush1.bf16.msra.mxu1 %v10575_v3  ;;  %3934 = vmatprep.mubr.bf16.mxu1 %v11443_v61 }
 0x382   :  { %3904 = vmatprep.subr.bf16.mxu1 %v10580_v4  ;;  %v10620_v4 = vld [vmem:[#allocation15 + $0x368] ss:$16 sps:$4 sm:$0xff]  }
 0x385   :  { %3905 = vmatpush1.bf16.msra.mxu1 %v10578_v24 }
 0x386   :  { %4041 = vmatprep.subr.bf16.mxu1 %v10583_v25  ;;  %v10625_v25 = vld [vmem:[#allocation15 + $0x38c] ss:$16 sps:$4 sm:$0xff]  }
 0x388   :  { %9481 = vmatmul.mubr.msk.bf16.vlgmr.msra.gmra.mrb[136].mxu1 %vm1081_vm5, %v12316_v30 }
 0x389   :  { %4042 = vmatpush1.bf16.msra.mxu1 %v10581_v29  ;;  %4073 = vmatprep.mubr.bf16.mxu1 %v11443_v61  ;;  %v10623_v29 = vld [vmem:[#allocation15 + $0x388] ss:$16 sps:$4 sm:$0xff]  }
 0x38a   :  { %4043 = vmatprep.subr.bf16.mxu1 %v10586_v31  ;;  %v12351_v31 = vpack.c.bf16 %v4781_v26, %v4781_v26 }
 0x38d   :  { %4044 = vmatpush1.bf16.msra.mxu1 %v10584_v28  ;;  %v10628_v28 = vld [vmem:[#allocation15 + $0x3ac] ss:$16 sps:$4 sm:$0xff]  }
 0x38e   :  { %4180 = vmatprep.subr.bf16.mxu1 %v10589_v32  ;;  %v10626_v32 = vld [vmem:[#allocation15 + $0x3a8] ss:$16 sps:$4 sm:$0xff]  }
 0x390   :  { %9491 = vmatmul.mubr.msk.bf16.vlgmr.msra.gmra.mrb[140].mxu1 %vm1081_vm5, %v12321_v34 }
 0x391   :  { %4181 = vmatpush1.bf16.msra.mxu1 %v10587_v27  ;;  %4212 = vmatprep.mubr.bf16.mxu1 %v11443_v61  ;;  %v4920_v27 = vld [vmem:[#allocation3 + $0x1c] sm:$0x3] }
 0x392   :  { %4182 = vmatprep.subr.bf16.mxu1 %v10592_v35  ;;  %v10629_v35 = vld [vmem:[#allocation15 + $0x3c8] ss:$16 sps:$4 sm:$0xff]  }
 0x395   :  { %4183 = vmatpush1.bf16.msra.mxu1 %v10590_v36  ;;  %v12356_v36 = vpack.c.bf16 %v4920_v27, %v4920_v27  ;;  %v10655_v27 = vld [vmem:[#allocation15 + $0x4c8] ss:$16 sps:$4 sm:$0xff]  }
 0x396   :  { %v10259_v38 = vpop.f32.mrb[96].mxu1  ;;  %4319 = vmatprep.subr.bf16.mxu1 %v10595_v37  ;;  %v10634_v37 = vld [vmem:[#allocation15 + $0x3ec] ss:$16 sps:$4 sm:$0xff]  }
 0x397   :  { %v1892_v42 = vadd.f32 %v10259_v38, %v10241_v12  ;;  %v1883_v21 = vpop.f32.mrb[97].mxu1  ;;  %v10617_v12 = vld [vmem:[#allocation15 + $0x348] ss:$16 sps:$4 sm:$0xff]   ;;  %v5059_v38 = vld [vmem:[#allocation3 + $0x1e] sm:$0x3] }
 0x398   :  { %v1884_v43 = vadd.f32 %v1883_v21, %v1760_v63  ;;  %v10260_v44 = vpop.f32.mrb[98].mxu1  ;;  %9501 = vmatmul.mubr.msk.bf16.vlgmr.msra.gmra.mrb[144].mxu1 %vm1081_vm5, %v12326_v39  ;;  %v12346_v63 = vpack.c.bf16 %v4642_v11, %v4642_v11  ;;  %v10640_v21 = vld [vmem:[#allocation15 + $0x42c] ss:$16 sps:$4 sm:$0xff]  }
 0x399   :  { %v1886_v49 = vpop.f32.mrb[99].mxu1  ;;  %4320 = vmatpush1.bf16.msra.mxu1 %v10593_v2  ;;  %4351 = vmatprep.mubr.bf16.mxu1 %v11443_v61  ;;  %v10637_v2 = vld [vmem:[#allocation15 + $0x40c] ss:$16 sps:$4 sm:$0xff]  }
 0x39a   :  { %v1887_v58 = vadd.f32 %v1886_v49, %v1763_v17  ;;  %4321 = vmatprep.subr.bf16.mxu1 %v10598_v40  ;;  %v10635_v40 = vld [vmem:[#allocation15 + $0x408] ss:$16 sps:$4 sm:$0xff]   ;;  %v10644_v44 = vld [vmem:[#allocation15 + $0x44c] ss:$16 sps:$4 sm:$0xff]  }
 0x39b   :  { %v5198_v49 = vld [vmem:[#allocation3 + $0x20] sm:$0x3] }
 0x39d   :  { %4322 = vmatpush1.bf16.msra.mxu1 %v10596_v50  ;;  %v10642_v50 = vld [vmem:[#allocation15 + $0x448] ss:$16 sps:$4 sm:$0xff]  }
 0x39e   :  { %4458 = vmatprep.subr.bf16.mxu1 %v10601_v59  ;;  %v12366_v59 = vpack.c.bf16 %v5198_v49, %v5198_v49 }
 0x3a0   :  { %9511 = vmatmul.mubr.msk.bf16.vlgmr.msra.gmra.mrb[148].mxu1 %vm1081_vm5, %v12331_v45 }
 0x3a1   :  { %4459 = vmatpush1.bf16.msra.mxu1 %v10599_v41  ;;  %4490 = vmatprep.mubr.bf16.mxu1 %v11443_v61 }
 0x3a2   :  { %4460 = vmatprep.subr.bf16.mxu1 %v10604_v54 }
 0x3a5   :  { %4461 = vmatpush1.bf16.msra.mxu1 %v10602_v23 }
 0x3a6   :  { %4597 = vmatprep.subr.bf16.mxu1 %v10607_v47 }
 0x3a8   :  { %9521 = vmatmul.mubr.msk.bf16.vlgmr.msra.gmra.mrb[152].mxu1 %vm1081_vm5, %v12336_v57 }
 0x3a9   :  { %4598 = vmatpush1.bf16.msra.mxu1 %v10605_v51  ;;  %4629 = vmatprep.mubr.bf16.mxu1 %v11443_v61  ;;  %v10645_v51 = vld [vmem:[#allocation15 + $0x468] ss:$16 sps:$4 sm:$0xff]  }
 0x3aa   :  { %4599 = vmatprep.subr.bf16.mxu1 %v10610_v52 }
 0x3ad   :  { %4600 = vmatpush1.bf16.msra.mxu1 %v10608_v60  ;;  %v10650_v60 = vld [vmem:[#allocation15 + $0x48c] ss:$16 sps:$4 sm:$0xff]  }
 0x3ae   :  { %4736 = vmatprep.subr.bf16.mxu1 %v10613_v0  ;;  %v5337_v0 = vld [vmem:[#allocation3 + $0x22] sm:$0x3] }
 0x3b0   :  { %9531 = vmatmul.mubr.msk.bf16.vlgmr.msra.gmra.mrb[156].mxu1 %vm1081_vm5, %v12341_v7 }
 0x3b1   :  { %4737 = vmatpush1.bf16.msra.mxu1 %v10611_v6  ;;  %4768 = vmatprep.mubr.bf16.mxu1 %v11443_v61  ;;  %v10648_v6 = vld [vmem:[#allocation15 + $0x488] ss:$16 sps:$4 sm:$0xff]  }
 0x3b2   :  { %4738 = vmatprep.subr.bf16.mxu1 %v10616_v8 }
 0x3b5   :  { %4739 = vmatpush1.bf16.msra.mxu1 %v10614_v9  ;;  %v12379_v9 = vpack.c.bf16 %v5337_v0, %v5337_v0 }
 0x3b6   :  { %v10277_v14 = vpop.f32.mrb[100].mxu1  ;;  %4875 = vmatprep.subr.bf16.mxu1 %v10619_v10  ;;  %v10653_v10 = vld [vmem:[#allocation15 + $0x4ac] ss:$16 sps:$4 sm:$0xff]  }
 0x3b7   :  { %v2062_v17 = vadd.f32 %v10277_v14, %v1892_v42  ;;  %v2034_v1 = vpop.f32.mrb[101].mxu1  ;;  %v12361_v42 = vpack.c.bf16 %v5059_v38, %v5059_v38 }
 0x3b8   :  { %v2060_v19 = vadd.f32 %v2034_v1, %v1884_v43  ;;  %v10278_v20 = vpop.f32.mrb[102].mxu1  ;;  %9541 = vmatmul.mubr.msk.bf16.vlgmr.msra.gmra.mrb[160].mxu1 %vm1081_vm5, %v12346_v63  ;;  %v10638_v43 = vld [vmem:[#allocation15 + $0x428] ss:$16 sps:$4 sm:$0xff]  }
 0x3b9   :  { %v2037_v3 = vpop.f32.mrb[103].mxu1  ;;  %4876 = vmatpush1.bf16.msra.mxu1 %v10617_v12  ;;  %4907 = vmatprep.mubr.bf16.mxu1 %v11443_v61  ;;  %v10651_v20 = vld [vmem:[#allocation15 + $0x4a8] ss:$16 sps:$4 sm:$0xff]  }
 0x3ba   :  { %v2061_v24 = vadd.f32 %v2037_v3, %v1887_v58  ;;  %4877 = vmatprep.subr.bf16.mxu1 %v10622_v15 }
 0x3bd   :  { %4878 = vmatpush1.bf16.msra.mxu1 %v10620_v4 }
 0x3be   :  { %5014 = vmatprep.subr.bf16.mxu1 %v10625_v25 }
 0x3c0   :  { %9551 = vmatmul.mubr.msk.bf16.vlgmr.msra.gmra.mrb[164].mxu1 %vm1081_vm5, %v12351_v31 }
 0x3c1   :  { %5015 = vmatpush1.bf16.msra.mxu1 %v10623_v29  ;;  %5046 = vmatprep.mubr.bf16.mxu1 %v11443_v61  ;;  %v5476_v29 = vld [vmem:[#allocation3 + $0x24] sm:$0x3] }
 0x3c2   :  { %5016 = vmatprep.subr.bf16.mxu1 %v10628_v28 }
 0x3c5   :  { %5017 = vmatpush1.bf16.msra.mxu1 %v10626_v32 }
 0x3c6   :  { %5153 = vmatprep.subr.bf16.mxu1 %v10631_v33 }
 0x3c8   :  { %9561 = vmatmul.mubr.msk.bf16.vlgmr.msra.gmra.mrb[168].mxu1 %vm1081_vm5, %v12356_v36 }
 0x3c9   :  { %5154 = vmatpush1.bf16.msra.mxu1 %v10629_v35  ;;  %5185 = vmatprep.mubr.bf16.mxu1 %v11443_v61 }
 0x3ca   :  { %5155 = vmatprep.subr.bf16.mxu1 %v10634_v37 }
 0x3cd   :  { %5156 = vmatpush1.bf16.msra.mxu1 %v10632_v16  ;;  %v12391_v16 = vpack.c.bf16 %v5476_v29, %v5476_v29 }
 0x3ce   :  { %5292 = vmatprep.subr.bf16.mxu1 %v10637_v2  ;;  %v10660_v2 = vld [vmem:[#allocation15 + $0x4ec] ss:$16 sps:$4 sm:$0xff]  }
 0x3d0   :  { %9571 = vmatmul.mubr.msk.bf16.vlgmr.msra.gmra.mrb[172].mxu1 %vm1081_vm5, %v12361_v42 }
 0x3d1   :  { %5293 = vmatpush1.bf16.msra.mxu1 %v10635_v40  ;;  %5324 = vmatprep.mubr.bf16.mxu1 %v11443_v61 }
 0x3d2   :  { %5294 = vmatprep.subr.bf16.mxu1 %v10640_v21 }
 0x3d5   :  { %5295 = vmatpush1.bf16.msra.mxu1 %v10638_v43 }
 0x3d6   :  { %v10295_v58 = vpop.f32.mrb[104].mxu1  ;;  %5431 = vmatprep.subr.bf16.mxu1 %v10644_v44 }
 0x3d7   :  { %v12368_v41 = vadd.f32 %v10295_v58, %v2062_v17  ;;  %v2210_v54 = vpop.f32.mrb[105].mxu1  ;;  %v10658_v58 = vld [vmem:[#allocation15 + $0x4e8] ss:$16 sps:$4 sm:$0xff]  }
 0x3d8   :  { %v12370_v23 = vadd.f32 %v2210_v54, %v2060_v19  ;;  %v10296_v47 = vpop.f32.mrb[106].mxu1  ;;  %9581 = vmatmul.mubr.msk.bf16.vlgmr.msra.gmra.mrb[176].mxu1 %vm1081_vm5, %v12366_v59 }
 0x3d9   :  { %v2213_v48 = vpop.f32.mrb[107].mxu1  ;;  %5432 = vmatpush1.bf16.msra.mxu1 %v10642_v50  ;;  %5463 = vmatprep.mubr.bf16.mxu1 %v11443_v61 }
 0x3da   :  { %v12375_v52 = vadd.f32 %v2213_v48, %v2061_v24  ;;  %5433 = vmatprep.subr.bf16.mxu1 %v10647_v53  ;;  %v10657_v24 = vld [vmem:[#allocation15 + $0x4cc] ss:$16 sps:$4 sm:$0xff]  }
 0x3dd   :  { %5434 = vmatpush1.bf16.msra.mxu1 %v10645_v51  ;;  %v5615_v51 = vld [vmem:[#allocation3 + $0x26] sm:$0x3] }
 0x3de   :  { %v10301_v8 = vpop.f32.mrb[80].mxu1  ;;  %5570 = vmatprep.subr.bf16.mxu1 %v10650_v60 }
 0x3df   :  { %v2417_v11 = vadd.f32 %v10301_v8, %v12377_v55  ;;  %v2331_v12 = vpop.f32.mrb[81].mxu1 }
 0x3e0   :  { %v2415_v14 = vadd.f32 %v12377_v55, %v2331_v12  ;;  %v10302_v15 = vpop.f32.mrb[82].mxu1  ;;  %9591 = vmatmul.mubr.msk.bf16.vlgmr.msra.gmra.mrb[180].mxu1 %vm1081_vm5, %v12379_v9 }
 0x3e1   :  { %vm2432_vm11 = vcmp.gt.f32.partialorder %v2417_v11, 0.0  ;;  %v2447_v17 = vmul.f32 0.01, %v2417_v11  ;;  %v2418_v1 = vadd.f32 %v10302_v15, %v12377_v55  ;;  %v2334_v19 = vpop.f32.mrb[83].mxu1  ;;  %5571 = vmatpush1.bf16.msra.mxu1 %v10648_v6  ;;  %5602 = vmatprep.mubr.bf16.mxu1 %v11443_v61 }
 0x3e2   :  { %vm2430_vm12 = vcmp.gt.f32.partialorder %v2415_v14, 0.0  ;;  %v2445_v3 = vmul.f32 0.01, %v2415_v14  ;;  %v2416_v4 = vadd.f32 %v12377_v55, %v2334_v19  ;;  %5572 = vmatprep.subr.bf16.mxu1 %v10653_v10 }
 0x3e3   :  { %v2462_v25 = vsel %vm2432_vm11, %v2417_v11, %v2447_v17  ;;  %vm2433_vm13 = vcmp.gt.f32.partialorder %v2418_v1, 0.0  ;;  %v2448_v26 = vmul.f32 0.01, %v2418_v1  ;;  %v12404_v11 = vpack.c.bf16 %v5615_v51, %v5615_v51 }
 0x3e4   :  { %2477 = vst.msk [vmem:[#allocation2 + $0x10] sm:$0xff] %vm1081_vm5, %v2462_v25  ;;  %v2460_v28 = vsel %vm2430_vm12, %v2415_v14, %v2445_v3  ;;  %vm2431_vm14 = vcmp.gt.f32.partialorder %v2416_v4, 0.0  ;;  %v2446_v32 = vmul.f32 0.01, %v2416_v4 }
 0x3e5   :  { %2475 = vst.msk [vmem:[#allocation2] sm:$0xff] %vm1081_vm5, %v2460_v28  ;;  %v2463_v33 = vsel %vm2433_vm13, %v2418_v1, %v2448_v26  ;;  %5573 = vmatpush1.bf16.msra.mxu1 %v10651_v20 }
 0x3e6   :  { %2478 = vst.msk [vmem:[#allocation2 + $0x18] sm:$0xff] %vm1081_vm5, %v2463_v33  ;;  %v2461_v35 = vsel %vm2431_vm14, %v2416_v4, %v2446_v32  ;;  %v10305_v37 = vpop.f32.mrb[84].mxu1  ;;  %5709 = vmatprep.subr.bf16.mxu1 %v10657_v24  ;;  %v10661_v33 = vld [vmem:[%s12750_s8] sm:$0xff]  }
 0x3e7   :  { %2476 = vst.msk [vmem:[#allocation2 + $0x8] sm:$0xff] %vm1081_vm5, %v2461_v35  ;;  %v2421_v38 = vadd.f32 %v10305_v37, %v12377_v55  ;;  %v2347_v40 = vpop.f32.mrb[85].mxu1 }
 0x3e8   :  { %v2419_v21 = vadd.f32 %v12377_v55, %v2347_v40  ;;  %v10306_v43 = vpop.f32.mrb[86].mxu1  ;;  %9601 = vmatmul.mubr.msk.bf16.vlgmr.msra.gmra.mrb[184].mxu1 %vm1081_vm5, %v12391_v16 }
 0x3e9   :  { %vm2436_vm15 = vcmp.gt.f32.partialorder %v2421_v38, 0.0  ;;  %v2451_v44 = vmul.f32 0.01, %v2421_v38  ;;  %v2422_v49 = vadd.f32 %v10306_v43, %v12377_v55  ;;  %v2350_v50 = vpop.f32.mrb[87].mxu1  ;;  %5710 = vmatpush1.bf16.msra.mxu1 %v10655_v27  ;;  %5741 = vmatprep.mubr.bf16.mxu1 %v11443_v61 }
 0x3ea   :  { %vm2434_vm0 = vcmp.gt.f32.partialorder %v2419_v21, 0.0  ;;  %v2449_v53 = vmul.f32 0.01, %v2419_v21  ;;  %v2420_v54 = vadd.f32 %v12377_v55, %v2350_v50  ;;  %5711 = vmatprep.subr.bf16.mxu1 %v10660_v2 }
 0x3eb   :  { %v2466_v47 = vsel %vm2436_vm15, %v2421_v38, %v2451_v44  ;;  %vm2437_vm1 = vcmp.gt.f32.partialorder %v2422_v49, 0.0  ;;  %v2452_v48 = vmul.f32 0.01, %v2422_v49  ;;  %v10662_v44 = vld [vmem:[%s12750_s8 + $0x8] sm:$0xff]  }
 0x3ec   :  { %2481 = vst.msk [vmem:[#allocation2 + $0x30] sm:$0xff] %vm1081_vm5, %v2466_v47  ;;  %v2464_v60 = vsel %vm2434_vm0, %v2419_v21, %v2449_v53  ;;  %vm2435_vm4 = vcmp.gt.f32.partialorder %v2420_v54, 0.0  ;;  %v2450_v0 = vmul.f32 0.01, %v2420_v54 }
 0x3ed   :  { %2479 = vst.msk [vmem:[#allocation2 + $0x20] sm:$0xff] %vm1081_vm5, %v2464_v60  ;;  %v2467_v6 = vsel %vm2437_vm1, %v2422_v49, %v2452_v48  ;;  %5712 = vmatpush1.bf16.msra.mxu1 %v10658_v58  ;;  %v2502_v28 = vld [vmem:[#allocation2 + $0x14] sm:$0xff] }
 0x3ee   :  { %2482 = vst.msk [vmem:[#allocation2 + $0x38] sm:$0xff] %vm1081_vm5, %v2467_v6  ;;  %v2465_v8 = vsel %vm2435_vm4, %v2420_v54, %v2450_v0  ;;  %v10309_v10 = vpop.f32.mrb[88].mxu1 }
 0x3ef   :  { %2480 = vst.msk [vmem:[#allocation2 + $0x28] sm:$0xff] %vm1081_vm5, %v2465_v8  ;;  %v2425_v12 = vadd.f32 %v10309_v10, %v12377_v55  ;;  %v2363_v14 = vpop.f32.mrb[89].mxu1  ;;  %v2491_v10 = vld [vmem:[#allocation2 + $0x8] sm:$0xff] }
 0x3f0   :  { %v2423_v15 = vadd.f32 %v12377_v55, %v2363_v14  ;;  %v10310_v17 = vpop.f32.mrb[90].mxu1  ;;  %9611 = vmatmul.mubr.msk.bf16.vlgmr.msra.gmra.mrb[188].mxu1 %vm1081_vm5, %v12404_v11  ;;  %v10663_v14 = vld [vmem:[%s12750_s8 + $0x20] sm:$0xff]  }
 0x3f1   :  { %vm2440_vm6 = vcmp.gt.f32.partialorder %v2425_v12, 0.0  ;;  %v2455_v1 = vmul.f32 0.01, %v2425_v12  ;;  %v2426_v19 = vadd.f32 %v10310_v17, %v12377_v55  ;;  %v2366_v20 = vpop.f32.mrb[91].mxu1  ;;  %5880 = vmatprep.mubr.bf16.mxu1 %v11443_v61  ;;  %v10664_v17 = vld [vmem:[%s12750_s8 + $0x28] sm:$0xff]  }
 0x3f2   :  { %vm2438_vm2 = vcmp.gt.f32.partialorder %v2423_v15, 0.0  ;;  %v2453_v3 = vmul.f32 0.01, %v2423_v15  ;;  %v2424_v4 = vadd.f32 %v12377_v55, %v2366_v20 }
 0x3f3   :  { %v2470_v24 = vsel %vm2440_vm6, %v2425_v12, %v2455_v1  ;;  %vm2441_vm7 = vcmp.gt.f32.partialorder %v2426_v19, 0.0  ;;  %v2456_v25 = vmul.f32 0.01, %v2426_v19  ;;  %v2490_v12 = vld [vmem:[#allocation2] sm:$0xff]  ;;  %v2493_v1 = vld [vmem:[#allocation2 + $0x18] sm:$0xff] }
 0x3f4   :  { %2485 = vst.msk [vmem:[#allocation2 + $0x50] sm:$0xff] %vm1081_vm5, %v2470_v24  ;;  %v2468_v26 = vsel %vm2438_vm2, %v2423_v15, %v2453_v3  ;;  %vm2439_vm8 = vcmp.gt.f32.partialorder %v2424_v4, 0.0  ;;  %v2454_v29 = vmul.f32 0.01, %v2424_v4  ;;  %v2503_v32 = vld [vmem:[#allocation2 + $0x1c] sm:$0xff]  ;;  %v2495_v15 = vpack.c.bf16 %v2491_v10, %v2490_v12 }
 0x3f5   :  { %2483 = vst.msk [vmem:[#allocation2 + $0x40] sm:$0xff] %vm1081_vm5, %v2468_v26  ;;  %v2471_v27 = vsel %vm2441_vm7, %v2426_v19, %v2456_v25  ;;  %v2507_v35 = vpack.c.bf16 %v2503_v32, %v2502_v28  ;;  %v2492_v19 = vld [vmem:[#allocation2 + $0x10] sm:$0xff]  ;;  %v2494_v3 = vld [vmem:[#allocation2 + $0x20] sm:$0xff]  ;;  %v10666_v28 = vld [vmem:[%s12750_s8 + $0x38] sm:$0xff]   ;;  %vm9237_vm7 = vcmask 74752  }
 0x3f6   :  { %2486 = vst.msk [vmem:[#allocation2 + $0x58] sm:$0xff] %vm1081_vm5, %v2471_v27  ;;  %v2469_v37 = vsel %vm2439_vm8, %v2424_v4, %v2454_v29  ;;  %v10313_v2 = vpop.f32.mrb[108].mxu1  ;;  %v2504_v53 = vld [vmem:[#allocation2 + $0x24] sm:$0xff]  ;;  %v2496_v20 = vpack.c.bf16 %v2493_v1, %v2492_v19  ;;  %v2497_v4 = vpack.c.bf16 %v2494_v3, %v2494_v3  ;;  %v2669_v25 = vld [vmem:[#allocation2 + $0x30] sm:$0xff] }
 0x3f7   :  { %2484 = vst.msk [vmem:[#allocation2 + $0x48] sm:$0xff] %vm1081_vm5, %v2469_v37  ;;  %v2407_v38 = vadd.f32 %v10313_v2, %v12368_v41  ;;  %v2379_v40 = vpop.f32.mrb[109].mxu1  ;;  %10320 = vmatmul.mubr.msk.bf16.vlgmr.msra.gmra.mrb[24].mxu0 %vm1081_vm5, %v2507_v35  ;;  %v2668_v24 = vld [vmem:[#allocation2 + $0x28] sm:$0xff]  ;;  %v10665_v26 = vld [vmem:[%s12750_s8 + $0x30] sm:$0xff]   ;;  %v2670_v35 = vld [vmem:[#allocation2 + $0x38] sm:$0xff] }
 0x3f8   :  { %v2405_v21 = vadd.f32 %v2379_v40, %v12370_v23  ;;  %v10314_v43 = vpop.f32.mrb[110].mxu1  ;;  %10332 = vmatpush3.bf16.msra.mxu0 %v10661_v33  ;;  %10323 = vmatprep.mubr.msk.bf16.mxu0 %vm11442_vm3, %v11441_v46  ;;  %v2505_v23 = vld [vmem:[#allocation2 + $0x2c] sm:$0xff]  ;;  %v2673_v29 = vpack.c.bf16 %v2669_v25, %v2668_v24 }
 0x3f9   :  { %v2429_v49 = vadd.f32 %v12377_v55, %v2407_v38  ;;  %v2382_v50 = vpop.f32.mrb[111].mxu1  ;;  %10333 = vmatprep.subr.bf16.mxu0 %v11441_v46  ;;  %v2508_v60 = vpack.c.bf16 %v2505_v23, %v2504_v53 }
 0x3fa   :  { %v2427_v41 = vadd.f32 %v12377_v55, %v2405_v21  ;;  %v2406_v58 = vadd.f32 %v2382_v50, %v12375_v52 }
 0x3fb   :  { %vm2444_vm9 = vcmp.gt.f32.partialorder %v2429_v49, 0.0  ;;  %v2459_v54 = vmul.f32 0.01, %v2429_v49 }
 0x3fc   :  { %vm2442_vm10 = vcmp.gt.f32.partialorder %v2427_v41, 0.0  ;;  %v2457_v47 = vmul.f32 0.01, %v2427_v41  ;;  %v2428_v48 = vadd.f32 %v12377_v55, %v2406_v58  ;;  %10334 = vmatpush3.bf16.msra.mxu0 %v10662_v44  ;;  %v2506_v55 = vld [vmem:[#allocation2 + $0x34] sm:$0xff]  ;;  %v2671_v32 = vld [vmem:[#allocation2 + $0x40] sm:$0xff] }
 0x3fd   :  { %v2474_v51 = vsel %vm2444_vm9, %v2429_v49, %v2459_v54  ;;  %10347 = vmatprep.subr.bf16.mxu0 %v11441_v46  ;;  %v2509_v8 = vpack.c.bf16 %v2506_v55, %v2506_v55  ;;  %v2674_v2 = vpack.c.bf16 %v2671_v32, %v2670_v35  ;;  %v10668_v55 = vld [vmem:[%s12750_s8 + $0x48] sm:$0xff]   ;;  %v2765_v12 = vld [vmem:[#allocation2 + $0x54] sm:$0xff] }
 0x3fe   :  { %2489 = vst.msk [vmem:[#allocation2 + $0x70] sm:$0xff] %vm1081_vm5, %v2474_v51  ;;  %v2472_v0 = vsel %vm2442_vm10, %v2427_v41, %v2457_v47  ;;  %vm2443_vm11 = vcmp.gt.f32.partialorder %v2428_v48, 0.0  ;;  %v2458_v6 = vmul.f32 0.01, %v2428_v48  ;;  %v2672_v40 = vld [vmem:[#allocation2 + $0x48] sm:$0xff]  ;;  %v10667_v51 = vld [vmem:[%s12750_s8 + $0x40] sm:$0xff]  }
 0x3ff   :  { %2487 = vst.msk [vmem:[#allocation2 + $0x60] sm:$0xff] %vm1081_vm5, %v2472_v0  ;;  %10324 = vmatmul.mubr.msk.bf16.gmra.mrb[28].mxu0 %vm1081_vm5, %v2508_v60  ;;  %v2675_v41 = vpack.c.bf16 %v2672_v40, %v2672_v40  ;;  %v2763_v53 = vld [vmem:[#allocation2 + $0x44] sm:$0xff]  ;;  %v2764_v10 = vld [vmem:[#allocation2 + $0x4c] sm:$0xff] }
 0x400   :  { %v2473_v52 = vsel %vm2443_vm11, %v2428_v48, %v2458_v6  ;;  %10327 = vmatprep.mubr.msk.bf16.mxu0 %vm11442_vm3, %v11441_v46  ;;  %v2762_v48 = vld [vmem:[#allocation2 + $0x3c] sm:$0xff] }
 0x401   :  { %2488 = vst.msk [vmem:[#allocation2 + $0x68] sm:$0xff] %vm1081_vm5, %v2473_v52  ;;  %v2767_v6 = vpack.c.bf16 %v2763_v53, %v2762_v48  ;;  %v10669_v40 = vld [vmem:[#allocation15 + $0x40] ss:$16 sps:$4 sm:$0xff]  }
 0x406   :  { %v2858_v48 = vld [vmem:[#allocation2 + $0x60] sm:$0xff] }
 0x407   :  { %10328 = vmatmul.mubr.msk.bf16.gmra.mrb[32].mxu0 %vm1081_vm5, %v2509_v8  ;;  %v10671_v8 = vld [vmem:[#allocation15 + $0x44] ss:$16 sps:$4 sm:$0xff]  }
 0x408   :  { %10335 = vmatprep.mubr.msk.bf16.mxu0 %vm11442_vm3, %v11441_v46  ;;  %v2859_v53 = vld [vmem:[#allocation2 + $0x68] sm:$0xff] }
 0x40f   :  { %10336 = vmatmul.mubr.msk.bf16.vlgmr.msra.gmra.mrb[36].mxu0 %vm1081_vm5, %v2495_v15 }
 0x410   :  { %10348 = vmatpush3.bf16.msra.mxu0 %v10663_v14  ;;  %10339 = vmatprep.mubr.msk.bf16.mxu0 %vm11442_vm3, %v11441_v46 }
 0x411   :  { %10349 = vmatprep.subr.bf16.mxu0 %v11441_v46 }
 0x414   :  { %10350 = vmatpush3.bf16.msra.mxu0 %v10664_v17 }
 0x415   :  { %10363 = vmatprep.subr.bf16.mxu0 %v11441_v46 }
 0x417   :  { %10340 = vmatmul.mubr.msk.bf16.gmra.mrb[40].mxu0 %vm1081_vm5, %v2496_v20  ;;  %v2768_v20 = vpack.c.bf16 %v2765_v12, %v2764_v10 }
 0x418   :  { %10343 = vmatprep.mubr.msk.bf16.mxu0 %vm11442_vm3, %v11441_v46 }
 0x41f   :  { %10344 = vmatmul.mubr.msk.bf16.gmra.mrb[44].mxu0 %vm1081_vm5, %v2497_v4  ;;  %v2766_v4 = vld [vmem:[#allocation2 + $0x5c] sm:$0xff] }
 0x420   :  { %10351 = vmatprep.mubr.msk.bf16.mxu0 %vm11442_vm3, %v11441_v46  ;;  %v2769_v32 = vpack.c.bf16 %v2766_v4, %v2766_v4 }
 0x427   :  { %10352 = vmatmul.mubr.msk.bf16.vlgmr.msra.gmra.mrb[48].mxu0 %vm1081_vm5, %v2673_v29 }
 0x428   :  { %10364 = vmatpush3.bf16.msra.mxu0 %v10665_v26  ;;  %10355 = vmatprep.mubr.msk.bf16.mxu0 %vm11442_vm3, %v11441_v46 }
 0x429   :  { %10365 = vmatprep.subr.bf16.mxu0 %v11441_v46 }
 0x42b   :  { %v3120_v33 = vpop.f32.mrb[112].mxu1 }
 0x42c   :  { %v3122_v27 = vpop.f32.mrb[113].mxu1  ;;  %10366 = vmatpush3.bf16.msra.mxu0 %v10666_v28 }
 0x42d   :  { %v3124_v37 = vpop.f32.mrb[114].mxu1  ;;  %10379 = vmatprep.subr.bf16.mxu0 %v11441_v46 }
 0x42e   :  { %v3125_v38 = vpop.f32.mrb[115].mxu1 }
 0x42f   :  { %10356 = vmatmul.mubr.msk.bf16.gmra.mrb[52].mxu0 %vm1081_vm5, %v2674_v2  ;;  %v2856_v38 = vld [vmem:[#allocation2 + $0x50] sm:$0xff] }
 0x430   :  { %10359 = vmatprep.mubr.msk.bf16.mxu0 %vm11442_vm3, %v11441_v46 }
 0x433   :  { %v3245_v21 = vpop.f32.mrb[116].mxu1 }
 0x434   :  { %v3246_v43 = vadd.f32 %v3245_v21, %v3120_v33  ;;  %v3247_v44 = vpop.f32.mrb[117].mxu1 }
 0x435   :  { %v3248_v49 = vadd.f32 %v3247_v44, %v3122_v27  ;;  %v3249_v50 = vpop.f32.mrb[118].mxu1  ;;  %v2857_v27 = vld [vmem:[#allocation2 + $0x58] sm:$0xff] }
 0x436   :  { %v3250_v58 = vpop.f32.mrb[119].mxu1  ;;  %v2861_v44 = vpack.c.bf16 %v2857_v27, %v2856_v38  ;;  %v10681_v27 = vld [vmem:[#allocation15 + $0x80] ss:$16 sps:$4 sm:$0xff]  }
 0x437   :  { %10360 = vmatmul.mubr.msk.bf16.gmra.mrb[56].mxu0 %vm1081_vm5, %v2675_v41  ;;  %v10672_v41 = vld [vmem:[#allocation15 + $0x60] ss:$16 sps:$4 sm:$0xff]   ;;  %v10677_v58 = vld [vmem:[#allocation15 + $0x4] ss:$16 sps:$4 sm:$0xff]  }
 0x438   :  { %10367 = vmatprep.mubr.msk.bf16.mxu0 %vm11442_vm3, %v11441_v46 }
 0x43b   :  { %v3380_v23 = vpop.f32.mrb[120].mxu1 }
 0x43c   :  { %v3389_v54 = vadd.f32 %v3380_v23, %v3246_v43  ;;  %v3382_v47 = vpop.f32.mrb[121].mxu1 }
 0x43d   :  { %v3390_v60 = vadd.f32 %v3382_v47, %v3248_v49  ;;  %v3384_v0 = vpop.f32.mrb[122].mxu1  ;;  %v10674_v49 = vld [vmem:[#allocation15 + $0x64] ss:$16 sps:$4 sm:$0xff]  }
 0x43e   :  { %v3385_v52 = vpop.f32.mrb[123].mxu1  ;;  %v2862_v0 = vpack.c.bf16 %v2859_v53, %v2858_v48 }
 0x43f   :  { %10368 = vmatmul.mubr.msk.bf16.vlgmr.msra.gmra.mrb[60].mxu0 %vm1081_vm5, %v2767_v6  ;;  %v2860_v52 = vld [vmem:[#allocation2 + $0x70] sm:$0xff] }
 0x440   :  { %10380 = vmatpush3.bf16.msra.mxu0 %v10667_v51  ;;  %10371 = vmatprep.mubr.msk.bf16.mxu0 %vm11442_vm3, %v11441_v46 }
 0x441   :  { %10381 = vmatprep.subr.bf16.mxu0 %v11441_v46 }
 0x443   :  { %v3519_v14 = vpop.f32.mrb[124].mxu1 }
 0x444   :  { %v3528_v15 = vadd.f32 %v3519_v14, %v3389_v54  ;;  %v3521_v17 = vpop.f32.mrb[125].mxu1  ;;  %10382 = vmatpush3.bf16.msra.mxu0 %v10668_v55 }
 0x445   :  { %v3529_v1 = vadd.f32 %v3521_v17, %v3390_v60  ;;  %v3523_v19 = vpop.f32.mrb[126].mxu1  ;;  %3045 = vmatprep.subr.bf16.mxu0 %v10671_v8 }
 0x446   :  { %v3524_v3 = vpop.f32.mrb[127].mxu1 }
 0x447   :  { %10372 = vmatmul.mubr.msk.bf16.gmra.mrb[64].mxu0 %vm1081_vm5, %v2768_v20  ;;  %v10675_v3 = vld [vmem:[#allocation15] ss:$16 sps:$4 sm:$0xff]  }
 0x448   :  { %10375 = vmatprep.mubr.msk.bf16.mxu0 %vm11442_vm3, %v11441_v46 }
 0x44b   :  { %v3658_v24 = vpop.f32.mrb[128].mxu1 }
 0x44c   :  { %v3667_v25 = vadd.f32 %v3658_v24, %v3528_v15  ;;  %v3660_v26 = vpop.f32.mrb[129].mxu1  ;;  %v2863_v15 = vpack.c.bf16 %v2860_v52, %v2860_v52 }
 0x44d   :  { %v3668_v29 = vadd.f32 %v3660_v26, %v3529_v1  ;;  %v3662_v28 = vpop.f32.mrb[130].mxu1  ;;  %v10678_v26 = vld [vmem:[#allocation15 + $0x20] ss:$16 sps:$4 sm:$0xff]  }
 0x44e   :  { %v3663_v33 = vpop.f32.mrb[131].mxu1 }
 0x44f   :  { %10376 = vmatmul.mubr.msk.bf16.gmra.mrb[68].mxu0 %vm1081_vm5, %v2769_v32 }
 0x450   :  { %10383 = vmatprep.mubr.msk.bf16.mxu0 %vm11442_vm3, %v11441_v46 }
 0x453   :  { %v3797_v35 = vpop.f32.mrb[132].mxu1 }
 0x454   :  { %v3806_v37 = vadd.f32 %v3797_v35, %v3667_v25  ;;  %v3799_v2 = vpop.f32.mrb[133].mxu1  ;;  %v10680_v25 = vld [vmem:[#allocation15 + $0x24] ss:$16 sps:$4 sm:$0xff]  }
 0x455   :  { %v3807_v21 = vadd.f32 %v3799_v2, %v3668_v29  ;;  %v3801_v43 = vpop.f32.mrb[134].mxu1  ;;  %v10683_v29 = vld [vmem:[#allocation15 + $0x84] ss:$16 sps:$4 sm:$0xff]  }
 0x456   :  { %v3802_v50 = vpop.f32.mrb[135].mxu1  ;;  %v10686_v2 = vld [vmem:[#allocation15 + $0xa4] ss:$16 sps:$4 sm:$0xff]  }
 0x457   :  { %10384 = vmatmul.mubr.msk.bf16.vlgmr.msra.gmra.mrb[72].mxu0 %vm1081_vm5, %v2861_v44 }
 0x458   :  { %10387 = vmatprep.mubr.msk.bf16.mxu0 %vm11442_vm3, %v11441_v46  ;;  %3046 = vmatpush1.bf16.msra.mxu0 %v10669_v40  ;;  %v10689_v40 = vld [vmem:[#allocation15 + $0xc4] ss:$16 sps:$4 sm:$0xff]  }
 0x459   :  { %3047 = vmatprep.subr.bf16.mxu0 %v10674_v49  ;;  %v10687_v49 = vld [vmem:[#allocation15 + $0xc0] ss:$16 sps:$4 sm:$0xff]  }
 0x45b   :  { %v3936_v23 = vpop.f32.mrb[136].mxu1 }
 0x45c   :  { %v3945_v54 = vadd.f32 %v3936_v23, %v3806_v37  ;;  %v3938_v47 = vpop.f32.mrb[137].mxu1  ;;  %3048 = vmatpush1.bf16.msra.mxu0 %v10672_v41  ;;  %v10695_v23 = vld [vmem:[#allocation15 + $0x104] ss:$16 sps:$4 sm:$0xff]  }
 0x45d   :  { %v3946_v51 = vadd.f32 %v3938_v47, %v3807_v21  ;;  %v3940_v60 = vpop.f32.mrb[138].mxu1  ;;  %3170 = vmatprep.subr.bf16.mxu0 %v10677_v58  ;;  %v10692_v58 = vld [vmem:[#allocation15 + $0xe4] ss:$16 sps:$4 sm:$0xff]  }
 0x45e   :  { %v3941_v6 = vpop.f32.mrb[139].mxu1 }
 0x45f   :  { %10388 = vmatmul.mubr.msk.bf16.gmra.mrb[76].mxu0 %vm1081_vm5, %v2862_v0  ;;  %v10698_v6 = vld [vmem:[#allocation15 + $0x124] ss:$16 sps:$4 sm:$0xff]  }
 0x460   :  { %10391 = vmatprep.mubr.msk.bf16.mxu0 %vm11442_vm3, %v11441_v46 }
 0x463   :  { %v4075_v55 = vpop.f32.mrb[140].mxu1 }
 0x464   :  { %v4084_v8 = vadd.f32 %v4075_v55, %v3945_v54  ;;  %v4077_v10 = vpop.f32.mrb[141].mxu1  ;;  %v10701_v55 = vld [vmem:[#allocation15 + $0x144] ss:$16 sps:$4 sm:$0xff]  }
 0x465   :  { %v4085_v12 = vadd.f32 %v4077_v10, %v3946_v51  ;;  %v4079_v14 = vpop.f32.mrb[142].mxu1  ;;  %v10693_v51 = vld [vmem:[#allocation15 + $0x100] ss:$16 sps:$4 sm:$0xff]  }
 0x466   :  { %v4080_v17 = vpop.f32.mrb[143].mxu1  ;;  %v10699_v14 = vld [vmem:[#allocation15 + $0x140] ss:$16 sps:$4 sm:$0xff]  }
 0x467   :  { %10392 = vmatmul.mubr.msk.bf16.gmra.mrb[80].mxu0 %vm1081_vm5, %v2863_v15 }
 0x468   :  { %3077 = vmatprep.mubr.bf16.mxu0 %v11443_v61 }
 0x46b   :  { %v4214_v1 = vpop.f32.mrb[144].mxu1 }
 0x46c   :  { %v4223_v19 = vadd.f32 %v4214_v1, %v4084_v8  ;;  %v4216_v20 = vpop.f32.mrb[145].mxu1  ;;  %v10704_v1 = vld [vmem:[#allocation15 + $0x164] ss:$16 sps:$4 sm:$0xff]  }
 0x46d   :  { %v4224_v4 = vadd.f32 %v4216_v20, %v4085_v12  ;;  %v4218_v24 = vpop.f32.mrb[146].mxu1  ;;  %v10707_v20 = vld [vmem:[#allocation15 + $0x184] ss:$16 sps:$4 sm:$0xff]  }
 0x46e   :  { %v4219_v46 = vpop.f32.mrb[147].mxu1 }
 0x46f   :  { %9420 = vmatmul.mubr.msk.bf16.vlgmr.msra.gmra.mrb[84].mxu0 %vm1081_vm5, %v12276_v18  ;;  %v10684_v18 = vld [vmem:[#allocation15 + $0xa0] ss:$16 sps:$4 sm:$0xff]  }
 0x470   :  { %3171 = vmatpush1.bf16.msra.mxu0 %v10675_v3  ;;  %3202 = vmatprep.mubr.bf16.mxu0 %v11443_v61 }
 0x471   :  { %3172 = vmatprep.subr.bf16.mxu0 %v10680_v25  ;;  %v10705_v25 = vld [vmem:[#allocation15 + $0x180] ss:$16 sps:$4 sm:$0xff]  }
 0x473   :  { %v4353_v28 = vpop.f32.mrb[148].mxu1 }
 0x474   :  { %v4362_v32 = vadd.f32 %v4353_v28, %v4223_v19  ;;  %3173 = vmatpush1.bf16.msra.mxu0 %v10678_v26  ;;  %v4355_v33 = vpop.f32.mrb[149].mxu1 }
 0x475   :  { %v4363_v35 = vadd.f32 %v4355_v33, %v4224_v4  ;;  %v4357_v37 = vpop.f32.mrb[150].mxu1  ;;  %3305 = vmatprep.subr.bf16.mxu0 %v10683_v29  ;;  %v10710_v29 = vld [vmem:[#allocation15 + $0x1a4] ss:$16 sps:$4 sm:$0xff]  }
 0x476   :  { %v4358_v38 = vpop.f32.mrb[151].mxu1  ;;  %v10711_v37 = vld [vmem:[#allocation15 + $0x1c0] ss:$16 sps:$4 sm:$0xff]  }
 0x477   :  { %9430 = vmatmul.mubr.msk.bf16.vlgmr.msra.gmra.mrb[88].mxu0 %vm1081_vm5, %v12287_v62  ;;  %v10690_v62 = vld [vmem:[#allocation15 + $0xe0] ss:$16 sps:$4 sm:$0xff]  }
 0x478   :  { %3306 = vmatpush1.bf16.msra.mxu0 %v10681_v27  ;;  %3337 = vmatprep.mubr.bf16.mxu0 %v11443_v61 }
 0x479   :  { %3307 = vmatprep.subr.bf16.mxu0 %v10686_v2 }
 0x47b   :  { %v4492_v21 = vpop.f32.mrb[152].mxu1 }
 0x47c   :  { %v4501_v43 = vadd.f32 %v4492_v21, %v4362_v32  ;;  %3308 = vmatpush1.bf16.msra.mxu0 %v10684_v18  ;;  %v4494_v44 = vpop.f32.mrb[153].mxu1  ;;  %v10713_v32 = vld [vmem:[#allocation15 + $0x1c4] ss:$16 sps:$4 sm:$0xff]  }
 0x47d   :  { %v4502_v50 = vadd.f32 %v4494_v44, %v4363_v35  ;;  %v4496_v41 = vpop.f32.mrb[154].mxu1  ;;  %3444 = vmatprep.subr.bf16.mxu0 %v10689_v40  ;;  %v10716_v18 = vld [vmem:[#allocation15 + $0x1e4] ss:$16 sps:$4 sm:$0xff]  }
 0x47e   :  { %v4497_v53 = vpop.f32.mrb[155].mxu1  ;;  %v10719_v21 = vld [vmem:[#allocation15 + $0x204] ss:$16 sps:$4 sm:$0xff]  }
 0x47f   :  { %9440 = vmatmul.mubr.msk.bf16.vlgmr.msra.gmra.mrb[92].mxu0 %vm1081_vm5, %v12292_v56  ;;  %v10696_v56 = vld [vmem:[#allocation15 + $0x120] ss:$16 sps:$4 sm:$0xff]   ;;  %v10722_v53 = vld [vmem:[#allocation15 + $0x224] ss:$16 sps:$4 sm:$0xff]  }
 0x480   :  { %3445 = vmatpush1.bf16.msra.mxu0 %v10687_v49  ;;  %3476 = vmatprep.mubr.bf16.mxu0 %v11443_v61 }
 0x481   :  { %3446 = vmatprep.subr.bf16.mxu0 %v10692_v58 }
 0x483   :  { %v4631_v54 = vpop.f32.mrb[156].mxu1 }
 0x484   :  { %v4640_v47 = vadd.f32 %v4631_v54, %v4501_v43  ;;  %3447 = vmatpush1.bf16.msra.mxu0 %v10690_v62  ;;  %v4633_v48 = vpop.f32.mrb[157].mxu1 }
 0x485   :  { %v4641_v60 = vadd.f32 %v4633_v48, %v4502_v50  ;;  %v4635_v0 = vpop.f32.mrb[158].mxu1  ;;  %3583 = vmatprep.subr.bf16.mxu0 %v10695_v23  ;;  %v10717_v50 = vld [vmem:[#allocation15 + $0x200] ss:$16 sps:$4 sm:$0xff]   ;;  %v10725_v23 = vld [vmem:[#allocation15 + $0x244] ss:$16 sps:$4 sm:$0xff]  }
 0x486   :  { %v4636_v52 = vpop.f32.mrb[159].mxu1 }
 0x487   :  { %9450 = vmatmul.mubr.msk.bf16.vlgmr.msra.gmra.mrb[96].mxu0 %vm1081_vm5, %v12297_v5  ;;  %v10702_v5 = vld [vmem:[#allocation15 + $0x160] ss:$16 sps:$4 sm:$0xff]  }
 0x488   :  { %3584 = vmatpush1.bf16.msra.mxu0 %v10693_v51  ;;  %3615 = vmatprep.mubr.bf16.mxu0 %v11443_v61  ;;  %v10723_v51 = vld [vmem:[#allocation15 + $0x240] ss:$16 sps:$4 sm:$0xff]  }
 0x489   :  { %3585 = vmatprep.subr.bf16.mxu0 %v10698_v6  ;;  %v10728_v6 = vld [vmem:[#allocation15 + $0x264] ss:$16 sps:$4 sm:$0xff]  }
 0x48b   :  { %v4770_v8 = vpop.f32.mrb[160].mxu1 }
 0x48c   :  { %v4779_v10 = vadd.f32 %v4770_v8, %v4640_v47  ;;  %3586 = vmatpush1.bf16.msra.mxu0 %v10696_v56  ;;  %v4772_v12 = vpop.f32.mrb[161].mxu1  ;;  %v10731_v56 = vld [vmem:[#allocation15 + $0x284] ss:$16 sps:$4 sm:$0xff]  }
 0x48d   :  { %v4780_v15 = vadd.f32 %v4772_v12, %v4641_v60  ;;  %v4774_v17 = vpop.f32.mrb[162].mxu1  ;;  %3722 = vmatprep.subr.bf16.mxu0 %v10701_v55  ;;  %v10729_v12 = vld [vmem:[#allocation15 + $0x280] ss:$16 sps:$4 sm:$0xff]  }
 0x48e   :  { %v4775_v19 = vpop.f32.mrb[163].mxu1  ;;  %v10734_v17 = vld [vmem:[#allocation15 + $0x2a4] ss:$16 sps:$4 sm:$0xff]  }
 0x48f   :  { %9460 = vmatmul.mubr.msk.bf16.vlgmr.msra.gmra.mrb[100].mxu0 %vm1081_vm5, %v12306_v13  ;;  %v10708_v13 = vld [vmem:[#allocation15 + $0x1a0] ss:$16 sps:$4 sm:$0xff]  }
 0x490   :  { %3723 = vmatpush1.bf16.msra.mxu0 %v10699_v14  ;;  %3754 = vmatprep.mubr.bf16.mxu0 %v11443_v61 }
 0x491   :  { %3724 = vmatprep.subr.bf16.mxu0 %v10704_v1  ;;  %v10794_v1 = vld [vmem:[#allocation15 + $0x50c] ss:$16 sps:$4 sm:$0xff]  }
 0x492   :  { %5848 = vmatprep.subr.bf16.mxu1 %v10794_v1 }
 0x493   :  { %v4909_v3 = vpop.f32.mrb[164].mxu1 }
 0x494   :  { %v4918_v4 = vadd.f32 %v4909_v3, %v4779_v10  ;;  %3725 = vmatpush1.bf16.msra.mxu0 %v10702_v5  ;;  %v4911_v24 = vpop.f32.mrb[165].mxu1  ;;  %v10792_v5 = vld [vmem:[#allocation15 + $0x508] ss:$16 sps:$4 sm:$0xff]   ;;  %v10800_v3 = vld [vmem:[#allocation15 + $0x52c] ss:$16 sps:$4 sm:$0xff]  }
 0x495   :  { %v4919_v46 = vadd.f32 %v4911_v24, %v4780_v15  ;;  %v4913_v26 = vpop.f32.mrb[166].mxu1  ;;  %3861 = vmatprep.subr.bf16.mxu0 %v10707_v20  ;;  %v10737_v20 = vld [vmem:[#allocation15 + $0x2c4] ss:$16 sps:$4 sm:$0xff]   ;;  %5849 = vmatpush1.bf16.msra.mxu1 %v10792_v5 }
 0x496   :  { %v4914_v28 = vpop.f32.mrb[167].mxu1  ;;  %5850 = vmatprep.subr.bf16.mxu1 %v10800_v3  ;;  %v10735_v26 = vld [vmem:[#allocation15 + $0x2c0] ss:$16 sps:$4 sm:$0xff]   ;;  %v10770_v5 = vld [vmem:[#allocation15 + $0x424] ss:$16 sps:$4 sm:$0xff]  }
 0x497   :  { %9470 = vmatmul.mubr.msk.bf16.vlgmr.msra.gmra.mrb[104].mxu0 %vm1081_vm5, %v12311_v22  ;;  %v10714_v22 = vld [vmem:[#allocation15 + $0x1e0] ss:$16 sps:$4 sm:$0xff]  }
 0x498   :  { %3862 = vmatpush1.bf16.msra.mxu0 %v10705_v25  ;;  %3893 = vmatprep.mubr.bf16.mxu0 %v11443_v61 }
 0x499   :  { %3863 = vmatprep.subr.bf16.mxu0 %v10710_v29 }
 0x49b   :  { %v5048_v33 = vpop.f32.mrb[168].mxu1 }
 0x49c   :  { %v5057_v27 = vadd.f32 %v5048_v33, %v4918_v4  ;;  %3864 = vmatpush1.bf16.msra.mxu0 %v10708_v13  ;;  %v5050_v35 = vpop.f32.mrb[169].mxu1  ;;  %v10798_v4 = vld [vmem:[#allocation15 + $0x528] ss:$16 sps:$4 sm:$0xff]   ;;  %v10806_v13 = vld [vmem:[#allocation15 + $0x54c] ss:$16 sps:$4 sm:$0xff]  }
 0x49d   :  { %v5058_v2 = vadd.f32 %v5050_v35, %v4919_v46  ;;  %v5052_v38 = vpop.f32.mrb[170].mxu1  ;;  %4000 = vmatprep.subr.bf16.mxu0 %v10713_v32  ;;  %5851 = vmatpush1.bf16.msra.mxu1 %v10798_v4  ;;  %v10738_v33 = vld [vmem:[#allocation15 + $0x2e0] ss:$16 sps:$4 sm:$0xff]  }
 0x49e   :  { %v5053_v40 = vpop.f32.mrb[171].mxu1  ;;  %5987 = vmatprep.subr.bf16.mxu1 %v10806_v13  ;;  %v10741_v38 = vld [vmem:[#allocation15 + $0x300] ss:$16 sps:$4 sm:$0xff]  }
 0x49f   :  { %9480 = vmatmul.mubr.msk.bf16.vlgmr.msra.gmra.mrb[108].mxu0 %vm1081_vm5, %v12316_v30  ;;  %v10720_v30 = vld [vmem:[#allocation15 + $0x220] ss:$16 sps:$4 sm:$0xff]  }
 0x4a0   :  { %4001 = vmatpush1.bf16.msra.mxu0 %v10711_v37  ;;  %4032 = vmatprep.mubr.bf16.mxu0 %v11443_v61 }
 0x4a1   :  { %4002 = vmatprep.subr.bf16.mxu0 %v10716_v18 }
 0x4a3   :  { %v5187_v43 = vpop.f32.mrb[172].mxu1 }
 0x4a4   :  { %v5196_v44 = vadd.f32 %v5187_v43, %v5057_v27  ;;  %4003 = vmatpush1.bf16.msra.mxu0 %v10714_v22  ;;  %v5189_v49 = vpop.f32.mrb[173].mxu1  ;;  %v10743_v27 = vld [vmem:[#allocation15 + $0x304] ss:$16 sps:$4 sm:$0xff]  }
 0x4a5   :  { %v5197_v41 = vadd.f32 %v5189_v49, %v5058_v2  ;;  %v5191_v58 = vpop.f32.mrb[174].mxu1  ;;  %4139 = vmatprep.subr.bf16.mxu0 %v10719_v21  ;;  %v10746_v22 = vld [vmem:[#allocation15 + $0x324] ss:$16 sps:$4 sm:$0xff]  }
 0x4a6   :  { %v5192_v62 = vpop.f32.mrb[175].mxu1  ;;  %v10749_v43 = vld [vmem:[#allocation15 + $0x344] ss:$16 sps:$4 sm:$0xff]  }
 0x4a7   :  { %9490 = vmatmul.mubr.msk.bf16.vlgmr.msra.gmra.mrb[112].mxu0 %vm1081_vm5, %v12321_v34  ;;  %v10726_v34 = vld [vmem:[#allocation15 + $0x260] ss:$16 sps:$4 sm:$0xff]  }
 0x4a8   :  { %4140 = vmatpush1.bf16.msra.mxu0 %v10717_v50  ;;  %4171 = vmatprep.mubr.bf16.mxu0 %v11443_v61  ;;  %v10750_v62 = vld [vmem:[#allocation15 + $0x360] ss:$16 sps:$4 sm:$0xff]  }
 0x4a9   :  { %4141 = vmatprep.subr.bf16.mxu0 %v10722_v53  ;;  %v10752_v53 = vld [vmem:[#allocation15 + $0x364] ss:$16 sps:$4 sm:$0xff]  }
 0x4ab   :  { %v5326_v54 = vpop.f32.mrb[176].mxu1 }
 0x4ac   :  { %v5335_v47 = vadd.f32 %v5326_v54, %v5196_v44  ;;  %4142 = vmatpush1.bf16.msra.mxu0 %v10720_v30  ;;  %v5328_v48 = vpop.f32.mrb[177].mxu1 }
 0x4ad   :  { %v5336_v60 = vadd.f32 %v5328_v48, %v5197_v41  ;;  %v5330_v0 = vpop.f32.mrb[178].mxu1  ;;  %4278 = vmatprep.subr.bf16.mxu0 %v10725_v23  ;;  %v10747_v41 = vld [vmem:[#allocation15 + $0x340] ss:$16 sps:$4 sm:$0xff]  }
 0x4ae   :  { %v5331_v52 = vpop.f32.mrb[179].mxu1 }
 0x4af   :  { %9500 = vmatmul.mubr.msk.bf16.vlgmr.msra.gmra.mrb[116].mxu0 %vm1081_vm5, %v12326_v39  ;;  %v10732_v39 = vld [vmem:[#allocation15 + $0x2a0] ss:$16 sps:$4 sm:$0xff]  }
 0x4b0   :  { %4279 = vmatpush1.bf16.msra.mxu0 %v10723_v51  ;;  %4310 = vmatprep.mubr.bf16.mxu0 %v11443_v61  ;;  %v10758_v51 = vld [vmem:[#allocation15 + $0x3a4] ss:$16 sps:$4 sm:$0xff]  }
 0x4b1   :  { %4280 = vmatprep.subr.bf16.mxu0 %v10728_v6 }
 0x4b3   :  { %v5465_v55 = vpop.f32.mrb[180].mxu1 }
 0x4b4   :  { %v5474_v8 = vadd.f32 %v5465_v55, %v5335_v47  ;;  %4281 = vmatpush1.bf16.msra.mxu0 %v10726_v34  ;;  %v5467_v10 = vpop.f32.mrb[181].mxu1  ;;  %v10753_v47 = vld [vmem:[#allocation15 + $0x380] ss:$16 sps:$4 sm:$0xff]   ;;  %v10764_v55 = vld [vmem:[#allocation15 + $0x3e4] ss:$16 sps:$4 sm:$0xff]  }
 0x4b5   :  { %v5475_v14 = vadd.f32 %v5467_v10, %v5336_v60  ;;  %v5469_v15 = vpop.f32.mrb[182].mxu1  ;;  %4417 = vmatprep.subr.bf16.mxu0 %v10731_v56  ;;  %v10756_v60 = vld [vmem:[#allocation15 + $0x3a0] ss:$16 sps:$4 sm:$0xff]  }
 0x4b6   :  { %v5470_v19 = vpop.f32.mrb[183].mxu1  ;;  %v10759_v34 = vld [vmem:[#allocation15 + $0x3c0] ss:$16 sps:$4 sm:$0xff]  }
 0x4b7   :  { %9510 = vmatmul.mubr.msk.bf16.vlgmr.msra.gmra.mrb[120].mxu0 %vm1081_vm5, %v12331_v45  ;;  %v10740_v45 = vld [vmem:[#allocation15 + $0x2e4] ss:$16 sps:$4 sm:$0xff]  }
 0x4b8   :  { %4418 = vmatpush1.bf16.msra.mxu0 %v10729_v12  ;;  %4449 = vmatprep.mubr.bf16.mxu0 %v11443_v61 }
 0x4b9   :  { %4419 = vmatprep.subr.bf16.mxu0 %v10734_v17  ;;  %v10765_v17 = vld [vmem:[#allocation15 + $0x400] ss:$16 sps:$4 sm:$0xff]  }
 0x4bb   :  { %v5604_v24 = vpop.f32.mrb[184].mxu1 }
 0x4bc   :  { %v5613_v25 = vadd.f32 %v5604_v24, %v5474_v8  ;;  %4420 = vmatpush1.bf16.msra.mxu0 %v10732_v39  ;;  %v5606_v46 = vpop.f32.mrb[185].mxu1  ;;  %v10762_v8 = vld [vmem:[#allocation15 + $0x3e0] ss:$16 sps:$4 sm:$0xff]   ;;  %v10773_v39 = vld [vmem:[#allocation15 + $0x444] ss:$16 sps:$4 sm:$0xff]  }
 0x4bd   :  { %v5614_v29 = vadd.f32 %v5606_v46, %v5475_v14  ;;  %v5608_v28 = vpop.f32.mrb[186].mxu1  ;;  %4556 = vmatprep.subr.bf16.mxu0 %v10737_v20 }
 0x4be   :  { %v5609_v32 = vpop.f32.mrb[187].mxu1  ;;  %v10779_v28 = vld [vmem:[#allocation15 + $0x484] ss:$16 sps:$4 sm:$0xff]  }
 0x4bf   :  { %9520 = vmatmul.mubr.msk.bf16.vlgmr.msra.gmra.mrb[124].mxu0 %vm1081_vm5, %v12336_v57  ;;  %v10744_v57 = vld [vmem:[#allocation15 + $0x320] ss:$16 sps:$4 sm:$0xff]  }
 0x4c0   :  { %4557 = vmatpush1.bf16.msra.mxu0 %v10735_v26  ;;  %4588 = vmatprep.mubr.bf16.mxu0 %v11443_v61 }
 0x4c1   :  { %4558 = vmatprep.subr.bf16.mxu0 %v10740_v45 }
 0x4c3   :  { %v5743_v35 = vpop.f32.mrb[188].mxu1 }
 0x4c4   :  { %v12535_v37 = vadd.f32 %v5743_v35, %v5613_v25  ;;  %4559 = vmatpush1.bf16.msra.mxu0 %v10738_v33  ;;  %v5745_v2 = vpop.f32.mrb[189].mxu1  ;;  %v10771_v25 = vld [vmem:[#allocation15 + $0x440] ss:$16 sps:$4 sm:$0xff]  }
 0x4c5   :  { %v12537_v18 = vadd.f32 %v5745_v2, %v5614_v29  ;;  %v5747_v40 = vpop.f32.mrb[190].mxu1  ;;  %4695 = vmatprep.subr.bf16.mxu0 %v10743_v27  ;;  %v10776_v29 = vld [vmem:[#allocation15 + $0x464] ss:$16 sps:$4 sm:$0xff]   ;;  %v10777_v27 = vld [vmem:[#allocation15 + $0x480] ss:$16 sps:$4 sm:$0xff]  }
 0x4c6   :  { %v5748_v21 = vpop.f32.mrb[191].mxu1  ;;  %v10782_v2 = vld [vmem:[#allocation15 + $0x4a4] ss:$16 sps:$4 sm:$0xff]  }
 0x4c7   :  { %9530 = vmatmul.mubr.msk.bf16.vlgmr.msra.gmra.mrb[128].mxu0 %vm1081_vm5, %v12341_v7  ;;  %v10755_v7 = vld [vmem:[#allocation15 + $0x384] ss:$16 sps:$4 sm:$0xff]  }
 0x4c8   :  { %4696 = vmatpush1.bf16.msra.mxu0 %v10741_v38  ;;  %4727 = vmatprep.mubr.bf16.mxu0 %v11443_v61  ;;  %v10785_v38 = vld [vmem:[#allocation15 + $0x4c4] ss:$16 sps:$4 sm:$0xff]  }
 0x4c9   :  { %4697 = vmatprep.subr.bf16.mxu0 %v10746_v22 }
 0x4ca   :  { %v2569_v44 = vpop.f32.mrb[24].mxu0 }
 0x4cb   :  { %v10321_v49 = vpop.f32.mrb[25].mxu0 }
 0x4cc   :  { %v2572_v50 = vpop.f32.mrb[26].mxu0  ;;  %4698 = vmatpush1.bf16.msra.mxu0 %v10744_v57 }
 0x4cd   :  { %v10322_v58 = vpop.f32.mrb[27].mxu0  ;;  %4834 = vmatprep.subr.bf16.mxu0 %v10749_v43  ;;  %v10783_v43 = vld [vmem:[#allocation15 + $0x4c0] ss:$16 sps:$4 sm:$0xff]  }
 0x4cf   :  { %9540 = vmatmul.mubr.msk.bf16.vlgmr.msra.gmra.mrb[132].mxu0 %vm1081_vm5, %v12346_v63  ;;  %v10761_v63 = vld [vmem:[#allocation15 + $0x3c4] ss:$16 sps:$4 sm:$0xff]  }
 0x4d0   :  { %4835 = vmatpush1.bf16.msra.mxu0 %v10747_v41  ;;  %4866 = vmatprep.mubr.bf16.mxu0 %v11443_v61  ;;  %v10791_v41 = vld [vmem:[#allocation15 + $0x504] ss:$16 sps:$4 sm:$0xff]  }
 0x4d1   :  { %4836 = vmatprep.subr.bf16.mxu0 %v10752_v53 }
 0x4d2   :  { %v2577_v30 = vpop.f32.mrb[28].mxu0 }
 0x4d3   :  { %v10325_v23 = vpop.f32.mrb[29].mxu0 }
 0x4d4   :  { %v2580_v54 = vpop.f32.mrb[30].mxu0  ;;  %4837 = vmatpush1.bf16.msra.mxu0 %v10750_v62 }
 0x4d5   :  { %v10326_v48 = vpop.f32.mrb[31].mxu0  ;;  %4973 = vmatprep.subr.bf16.mxu0 %v10755_v7 }
 0x4d6   :  { %v10803_v48 = vld [vmem:[#allocation15 + $0x544] ss:$16 sps:$4 sm:$0xff]  }
 0x4d7   :  { %9550 = vmatmul.mubr.msk.bf16.vlgmr.msra.gmra.mrb[136].mxu0 %vm1081_vm5, %v12351_v31  ;;  %v10767_v31 = vld [vmem:[#allocation15 + $0x404] ss:$16 sps:$4 sm:$0xff]  }
 0x4d8   :  { %4974 = vmatpush1.bf16.msra.mxu0 %v10753_v47  ;;  %5005 = vmatprep.mubr.bf16.mxu0 %v11443_v61  ;;  %v10797_v47 = vld [vmem:[#allocation15 + $0x524] ss:$16 sps:$4 sm:$0xff]  }
 0x4d9   :  { %4975 = vmatprep.subr.bf16.mxu0 %v10758_v51 }
 0x4da   :  { %v2585_v0 = vpop.f32.mrb[32].mxu0 }
 0x4db   :  { %v10329_v6 = vpop.f32.mrb[33].mxu0 }
 0x4dc   :  { %v2588_v52 = vpop.f32.mrb[34].mxu0  ;;  %4976 = vmatpush1.bf16.msra.mxu0 %v10756_v60 }
 0x4dd   :  { %v10330_v56 = vpop.f32.mrb[35].mxu0  ;;  %5112 = vmatprep.subr.bf16.mxu0 %v10761_v63 }
 0x4df   :  { %9560 = vmatmul.mubr.msk.bf16.vlgmr.msra.gmra.mrb[140].mxu0 %vm1081_vm5, %v12356_v36  ;;  %v10768_v36 = vld [vmem:[#allocation15 + $0x420] ss:$16 sps:$4 sm:$0xff]  }
 0x4e0   :  { %5113 = vmatpush1.bf16.msra.mxu0 %v10759_v34  ;;  %5144 = vmatprep.mubr.bf16.mxu0 %v11443_v61 }
 0x4e1   :  { %5114 = vmatprep.subr.bf16.mxu0 %v10764_v55 }
 0x4e2   :  { %v2646_v10 = vpop.f32.mrb[36].mxu0 }
 0x4e3   :  { %v2647_v12 = vadd.f32 %v2646_v10, %v2569_v44  ;;  %v10337_v14 = vpop.f32.mrb[37].mxu0 }
 0x4e4   :  { %v2649_v15 = vpop.f32.mrb[38].mxu0  ;;  %5115 = vmatpush1.bf16.msra.mxu0 %v10762_v8 }
 0x4e5   :  { %v2650_v1 = vadd.f32 %v2649_v15, %v2572_v50  ;;  %v10338_v19 = vpop.f32.mrb[39].mxu0  ;;  %5251 = vmatprep.subr.bf16.mxu0 %v10767_v31  ;;  %v10788_v50 = vld [vmem:[#allocation15 + $0x4e4] ss:$16 sps:$4 sm:$0xff]  }
 0x4e7   :  { %9570 = vmatmul.mubr.msk.bf16.vlgmr.msra.gmra.mrb[144].mxu0 %vm1081_vm5, %v12361_v42  ;;  %v10774_v42 = vld [vmem:[#allocation15 + $0x460] ss:$16 sps:$4 sm:$0xff]  }
 0x4e8   :  { %5252 = vmatpush1.bf16.msra.mxu0 %v10765_v17  ;;  %5283 = vmatprep.mubr.bf16.mxu0 %v11443_v61 }
 0x4e9   :  { %5253 = vmatprep.subr.bf16.mxu0 %v10770_v5 }
 0x4ea   :  { %v2654_v20 = vpop.f32.mrb[40].mxu0 }
 0x4eb   :  { %v2655_v3 = vadd.f32 %v2654_v20, %v2577_v30  ;;  %v10341_v4 = vpop.f32.mrb[41].mxu0  ;;  %v10789_v30 = vld [vmem:[#allocation15 + $0x500] ss:$16 sps:$4 sm:$0xff]  }
 0x4ec   :  { %v2657_v24 = vpop.f32.mrb[42].mxu0  ;;  %5254 = vmatpush1.bf16.msra.mxu0 %v10768_v36 }
 0x4ed   :  { %v2658_v46 = vadd.f32 %v2657_v24, %v2580_v54  ;;  %v10342_v26 = vpop.f32.mrb[43].mxu0  ;;  %5390 = vmatprep.subr.bf16.mxu0 %v10773_v39 }
 0x4ef   :  { %9580 = vmatmul.mubr.msk.bf16.vlgmr.msra.gmra.mrb[148].mxu0 %vm1081_vm5, %v12366_v59  ;;  %v10780_v59 = vld [vmem:[#allocation15 + $0x4a0] ss:$16 sps:$4 sm:$0xff]  }
 0x4f0   :  { %5391 = vmatpush1.bf16.msra.mxu0 %v10771_v25  ;;  %5422 = vmatprep.mubr.bf16.mxu0 %v11443_v61 }
 0x4f1   :  { %5392 = vmatprep.subr.bf16.mxu0 %v10776_v29 }
 0x4f2   :  { %v2662_v45 = vpop.f32.mrb[44].mxu0 }
 0x4f3   :  { %v2663_v13 = vadd.f32 %v2662_v45, %v2585_v0  ;;  %v10345_v32 = vpop.f32.mrb[45].mxu0 }
 0x4f4   :  { %v2665_v33 = vpop.f32.mrb[46].mxu0  ;;  %5393 = vmatpush1.bf16.msra.mxu0 %v10774_v42 }
 0x4f5   :  { %v10346_v35 = vpop.f32.mrb[47].mxu0  ;;  %5529 = vmatprep.subr.bf16.mxu0 %v10779_v28 }
 0x4f7   :  { %9590 = vmatmul.mubr.msk.bf16.vlgmr.msra.gmra.mrb[152].mxu0 %vm1081_vm5, %v12379_v9  ;;  %v10786_v9 = vld [vmem:[#allocation15 + $0x4e0] ss:$16 sps:$4 sm:$0xff]  }
 0x4f8   :  { %5530 = vmatpush1.bf16.msra.mxu0 %v10777_v27  ;;  %5561 = vmatprep.mubr.bf16.mxu0 %v11443_v61 }
 0x4f9   :  { %5531 = vmatprep.subr.bf16.mxu0 %v10782_v2 }
 0x4fa   :  { %v2735_v40 = vpop.f32.mrb[48].mxu0 }
 0x4fb   :  { %v2757_v22 = vadd.f32 %v2735_v40, %v2647_v12  ;;  %v10353_v21 = vpop.f32.mrb[49].mxu0 }
 0x4fc   :  { %v2738_v57 = vpop.f32.mrb[50].mxu0  ;;  %5532 = vmatpush1.bf16.msra.mxu0 %v10780_v59 }
 0x4fd   :  { %v2758_v44 = vadd.f32 %v2738_v57, %v2650_v1  ;;  %v10354_v49 = vpop.f32.mrb[51].mxu0  ;;  %5668 = vmatprep.subr.bf16.mxu0 %v10785_v38  ;;  %v10801_v57 = vld [vmem:[#allocation15 + $0x540] ss:$16 sps:$4 sm:$0xff]  }
 0x4ff   :  { %9600 = vmatmul.mubr.msk.bf16.vlgmr.msra.gmra.mrb[156].mxu0 %vm1081_vm5, %v12391_v16  ;;  %v10795_v16 = vld [vmem:[#allocation15 + $0x520] ss:$16 sps:$4 sm:$0xff]  }
 0x500   :  { %5669 = vmatpush1.bf16.msra.mxu0 %v10783_v43  ;;  %5700 = vmatprep.mubr.bf16.mxu0 %v11443_v61  ;;  %v10804_v43 = vld [vmem:[#allocation15 + $0x548] ss:$16 sps:$4 sm:$0xff]  }
 0x501   :  { %5670 = vmatprep.subr.bf16.mxu0 %v10788_v50 }
 0x502   :  { %v2743_v58 = vpop.f32.mrb[52].mxu0 }
 0x503   :  { %v2759_v53 = vadd.f32 %v2743_v58, %v2655_v3  ;;  %v10357_v62 = vpop.f32.mrb[53].mxu0  ;;  %v9411_v3 = vld [vmem:[#allocation13] ss:$0 sm:$0xff]  ;;  %v10809_v58 = vld [vmem:[#allocation15 + $0x564] ss:$16 sps:$4 sm:$0xff]  }
 0x504   :  { %v2746_v7 = vpop.f32.mrb[54].mxu0  ;;  %5671 = vmatpush1.bf16.msra.mxu0 %v10786_v9 }
 0x505   :  { %v2760_v23 = vadd.f32 %v2746_v7, %v2658_v46  ;;  %v10358_v54 = vpop.f32.mrb[55].mxu0  ;;  %5807 = vmatprep.subr.bf16.mxu0 %v10791_v41 }
 0x507   :  { %9610 = vmatmul.mubr.msk.bf16.vlgmr.msra.gmra.mrb[160].mxu0 %vm1081_vm5, %v12404_v11 }
 0x508   :  { %5808 = vmatpush1.bf16.msra.mxu0 %v10789_v30  ;;  %5839 = vmatprep.mubr.bf16.mxu0 %v11443_v61 }
 0x509   :  { %5809 = vmatprep.subr.bf16.mxu0 %v10797_v47 }
 0x50a   :  { %v2751_v51 = vpop.f32.mrb[56].mxu0 }
 0x50b   :  { %v2761_v60 = vadd.f32 %v2751_v51, %v2663_v13  ;;  %v10361_v63 = vpop.f32.mrb[57].mxu0  ;;  %v10815_v51 = vld [vmem:[#allocation15 + $0x584] ss:$16 sps:$4 sm:$0xff]  }
 0x50c   :  { %v2754_v0 = vpop.f32.mrb[58].mxu0  ;;  %5810 = vmatpush1.bf16.msra.mxu0 %v10795_v16  ;;  %v10807_v16 = vld [vmem:[#allocation15 + $0x560] ss:$16 sps:$4 sm:$0xff]  }
 0x50d   :  { %v10362_v6 = vpop.f32.mrb[59].mxu0  ;;  %5946 = vmatprep.subr.bf16.mxu0 %v10803_v48  ;;  %v10810_v48 = vld [vmem:[#allocation15 + $0x568] ss:$16 sps:$4 sm:$0xff]  }
 0x512   :  { %v2829_v52 = vpop.f32.mrb[60].mxu0 }
 0x513   :  { %v2851_v34 = vadd.f32 %v2829_v52, %v2757_v22  ;;  %v10369_v56 = vpop.f32.mrb[61].mxu0  ;;  %v10813_v52 = vld [vmem:[#allocation15 + $0x580] ss:$16 sps:$4 sm:$0xff]  }
 0x514   :  { %v2832_v55 = vpop.f32.mrb[62].mxu0 }
 0x515   :  { %v2852_v8 = vadd.f32 %v2832_v55, %v2758_v44  ;;  %v10370_v31 = vpop.f32.mrb[63].mxu0 }
 0x516   :  { %v10824_v31 = vld [vmem:[#allocation15 + $0x5ac] ss:$16 sps:$4 sm:$0xff]  }
 0x51a   :  { %v2837_v11 = vpop.f32.mrb[64].mxu0 }
 0x51b   :  { %v2853_v10 = vadd.f32 %v2837_v11, %v2759_v53  ;;  %v10373_v12 = vpop.f32.mrb[65].mxu0  ;;  %v10812_v53 = vld [vmem:[#allocation15 + $0x56c] ss:$16 sps:$4 sm:$0xff]  }
 0x51c   :  { %v2840_v14 = vpop.f32.mrb[66].mxu0 }
 0x51d   :  { %v2854_v15 = vadd.f32 %v2840_v14, %v2760_v23  ;;  %v10374_v17 = vpop.f32.mrb[67].mxu0  ;;  %v10819_v14 = vld [vmem:[#allocation15 + $0x5a0] ss:$16 sps:$4 sm:$0xff]  }
 0x51e   :  { %v10827_v17 = vld [vmem:[#allocation15 + $0x5c4] ss:$16 sps:$4 sm:$0xff]  }
 0x522   :  { %v2845_v1 = vpop.f32.mrb[68].mxu0 }
 0x523   :  { %v2855_v19 = vadd.f32 %v2845_v1, %v2761_v60  ;;  %v10377_v5 = vpop.f32.mrb[69].mxu0  ;;  %v10818_v60 = vld [vmem:[#allocation15 + $0x58c] ss:$16 sps:$4 sm:$0xff]  }
 0x524   :  { %v2848_v36 = vpop.f32.mrb[70].mxu0  ;;  %v10830_v1 = vld [vmem:[#allocation15 + $0x5cc] ss:$16 sps:$4 sm:$0xff]   ;;  %v10825_v5 = vld [vmem:[#allocation15 + $0x5c0] ss:$16 sps:$4 sm:$0xff]  }
 0x525   :  { %v10378_v39 = vpop.f32.mrb[71].mxu0  ;;  %v10828_v36 = vld [vmem:[#allocation15 + $0x5c8] ss:$16 sps:$4 sm:$0xff]  }
 0x52a   :  { %v2923_v20 = vpop.f32.mrb[72].mxu0 }
 0x52b   :  { %v2945_v4 = vadd.f32 %v2923_v20, %v2851_v34  ;;  %v10385_v24 = vpop.f32.mrb[73].mxu0  ;;  %v10816_v34 = vld [vmem:[#allocation15 + $0x588] ss:$16 sps:$4 sm:$0xff]  }
 0x52c   :  { %v2926_v25 = vpop.f32.mrb[74].mxu0 }
 0x52d   :  { %v2957_v46 = vadd.f32 %v9411_v3, %v2945_v4  ;;  %v2946_v26 = vadd.f32 %v2926_v25, %v2852_v8  ;;  %v10386_v29 = vpop.f32.mrb[75].mxu0  ;;  %v10821_v8 = vld [vmem:[#allocation15 + $0x5a4] ss:$16 sps:$4 sm:$0xff]   ;;  %v10836_v4 = vld [vmem:[#allocation15 + $0x5ec] ss:$16 sps:$4 sm:$0xff]  }
 0x52f   :  { %vm2962_vm3 = vcmp.gt.f32.partialorder %v2957_v46, 0.0  ;;  %v2967_v42 = vmul.f32 0.01, %v2957_v46  ;;  %v2958_v28 = vadd.f32 %v9411_v3, %v2946_v26 }
 0x531   :  { %v2972_v45 = vsel %vm2962_vm3, %v2957_v46, %v2967_v42  ;;  %vm2963_vm12 = vcmp.gt.f32.partialorder %v2958_v28, 0.0  ;;  %v2968_v13 = vmul.f32 0.01, %v2958_v28  ;;  %v10831_v42 = vld [vmem:[#allocation15 + $0x5e0] ss:$16 sps:$4 sm:$0xff]  }
 0x532   :  { %2977 = vst.msk [vmem:[#allocation3 + $0x28] sm:$0xff] %vm1081_vm5, %v2972_v45  ;;  %v2931_v32 = vpop.f32.mrb[76].mxu0  ;;  %v10839_v45 = vld [vmem:[#allocation15 + $0x604] ss:$16 sps:$4 sm:$0xff]  }
 0x533   :  { %v2973_v33 = vsel %vm2963_vm12, %v2958_v28, %v2968_v13  ;;  %v2947_v27 = vadd.f32 %v2931_v32, %v2853_v10  ;;  %v10389_v35 = vpop.f32.mrb[77].mxu0  ;;  %v10834_v28 = vld [vmem:[#allocation15 + $0x5e8] ss:$16 sps:$4 sm:$0xff]   ;;  %v10842_v13 = vld [vmem:[#allocation15 + $0x60c] ss:$16 sps:$4 sm:$0xff]  }
 0x534   :  { %2978 = vst.msk [vmem:[#allocation3 + $0x30] sm:$0xff] %vm1081_vm5, %v2973_v33  ;;  %v2934_v2 = vpop.f32.mrb[78].mxu0  ;;  %v10837_v33 = vld [vmem:[#allocation15 + $0x600] ss:$16 sps:$4 sm:$0xff]  }
 0x535   :  { %v2959_v59 = vadd.f32 %v9411_v3, %v2947_v27  ;;  %v2948_v38 = vadd.f32 %v2934_v2, %v2854_v15  ;;  %v10390_v40 = vpop.f32.mrb[79].mxu0  ;;  %v10822_v15 = vld [vmem:[#allocation15 + $0x5a8] ss:$16 sps:$4 sm:$0xff]  }
 0x536   :  { %v10840_v27 = vld [vmem:[#allocation15 + $0x608] ss:$16 sps:$4 sm:$0xff]  }
 0x537   :  { %vm2964_vm13 = vcmp.gt.f32.partialorder %v2959_v59, 0.0  ;;  %v2969_v22 = vmul.f32 0.01, %v2959_v59  ;;  %v2960_v21 = vadd.f32 %v9411_v3, %v2948_v38  ;;  %v10848_v38 = vld [vmem:[#allocation15 + $0x62c] ss:$16 sps:$4 sm:$0xff]  }
 0x539   :  { %v2974_v44 = vsel %vm2964_vm13, %v2959_v59, %v2969_v22  ;;  %vm2965_vm14 = vcmp.gt.f32.partialorder %v2960_v21, 0.0  ;;  %v2970_v49 = vmul.f32 0.01, %v2960_v21  ;;  %v5754_v50 = vld [vmem:[#allocation3 + $0x28] sm:$0x3] }
 0x53a   :  { %2979 = vst.msk [vmem:[#allocation3 + $0x38] sm:$0xff] %vm1081_vm5, %v2974_v44  ;;  %v2939_v9 = vpop.f32.mrb[80].mxu0  ;;  %v5755_v41 = vpack.c.bf16 %v5754_v50, %v5754_v50  ;;  %v5893_v0 = vld [vmem:[#allocation3 + $0x2a] sm:$0x3]  ;;  %v6171_v32 = vld [vmem:[#allocation3 + $0x2e] sm:$0x3] }
 0x53b   :  { %v2975_v62 = vsel %vm2965_vm14, %v2960_v21, %v2970_v49  ;;  %v2949_v7 = vadd.f32 %v2939_v9, %v2855_v19  ;;  %v10393_v30 = vpop.f32.mrb[81].mxu0  ;;  %v5894_v55 = vpack.c.bf16 %v5893_v0, %v5893_v0  ;;  %v6032_v19 = vld [vmem:[#allocation3 + $0x2c] sm:$0x3]  ;;  %v6172_v2 = vpack.c.bf16 %v6171_v32, %v6171_v32  ;;  %v10843_v44 = vld [vmem:[#allocation15 + $0x620] ss:$16 sps:$4 sm:$0xff]  }
 0x53c   :  { %2980 = vst.msk [vmem:[#allocation3 + $0x40] sm:$0xff] %vm1081_vm5, %v2975_v62  ;;  %v2942_v23 = vpop.f32.mrb[82].mxu0  ;;  %9620 = vmatmul.mubr.msk.bf16.vlgmr.msra.gmra.mrb[164].mxu0 %vm1081_vm5, %v5755_v41  ;;  %9621 = vmatmul.mubr.msk.bf16.vlgmr.msra.gmra.mrb[192].mxu1 %vm1081_vm5, %v5755_v41  ;;  %v6033_v20 = vpack.c.bf16 %v6032_v19, %v6032_v19  ;;  %v10845_v59 = vld [vmem:[#allocation15 + $0x624] ss:$16 sps:$4 sm:$0xff]   ;;  %v10846_v49 = vld [vmem:[#allocation15 + $0x628] ss:$16 sps:$4 sm:$0xff]  }
 0x53d   :  { %v2961_v54 = vadd.f32 %v9411_v3, %v2949_v7  ;;  %v10394_v47 = vpop.f32.mrb[83].mxu0  ;;  %5947 = vmatpush1.bf16.msra.mxu0 %v10801_v57  ;;  %5988 = vmatpush1.bf16.msra.mxu1 %v10804_v43  ;;  %v10833_v3 = vld [vmem:[#allocation15 + $0x5e4] ss:$16 sps:$4 sm:$0xff]   ;;  %v10854_v9 = vld [vmem:[#allocation15 + $0x64c] ss:$16 sps:$4 sm:$0xff]  }
 0x53e   :  { %5948 = vmatprep.subr.bf16.mxu0 %v10809_v58  ;;  %5989 = vmatprep.subr.bf16.mxu1 %v10812_v53  ;;  %v10851_v50 = vld [vmem:[#allocation15 + $0x644] ss:$16 sps:$4 sm:$0xff]   ;;  %v6310_v41 = vld [vmem:[#allocation3 + $0x30] sm:$0x3]  ;;  %v10849_v58 = vld [vmem:[#allocation15 + $0x640] ss:$16 sps:$4 sm:$0xff]  }
 0x53f   :  { %vm2966_vm15 = vcmp.gt.f32.partialorder %v2961_v54, 0.0  ;;  %v2971_v63 = vmul.f32 0.01, %v2961_v54  ;;  %5978 = vmatprep.mubr.bf16.mxu0 %v11443_v61  ;;  %6019 = vmatprep.mubr.bf16.mxu1 %v11443_v61  ;;  %v10852_v53 = vld [vmem:[#allocation15 + $0x648] ss:$16 sps:$4 sm:$0xff]   ;;  %v6311_v7 = vpack.c.bf16 %v6310_v41, %v6310_v41 }
 0x540   :  { %v10857_v30 = vld [vmem:[#allocation15 + $0x664] ss:$16 sps:$4 sm:$0xff]   ;;  %v10860_v23 = vld [vmem:[#allocation15 + $0x66c] ss:$16 sps:$4 sm:$0xff]   ;;  %v10870_v19 = vld [vmem:[#allocation15 + $0x6a8] ss:$16 sps:$4 sm:$0xff]  }
 0x541   :  { %v2976_v6 = vsel %vm2966_vm15, %v2961_v54, %v2971_v63  ;;  %5949 = vmatpush1.bf16.msra.mxu0 %v10807_v16  ;;  %5990 = vmatpush1.bf16.msra.mxu1 %v10810_v48  ;;  %v10858_v63 = vld [vmem:[#allocation15 + $0x668] ss:$16 sps:$4 sm:$0xff]   ;;  %v10863_v0 = vld [vmem:[#allocation15 + $0x684] ss:$16 sps:$4 sm:$0xff]  }
 0x542   :  { %2981 = vst.msk [vmem:[#allocation3 + $0x48] sm:$0xff] %vm1081_vm5, %v2976_v6  ;;  %v3079_v56 = vpop.f32.mrb[84].mxu0  ;;  %6085 = vmatprep.subr.bf16.mxu0 %v10815_v51  ;;  %6126 = vmatprep.subr.bf16.mxu1 %v10818_v60  ;;  %v10855_v60 = vld [vmem:[#allocation15 + $0x660] ss:$16 sps:$4 sm:$0xff]   ;;  %v10866_v6 = vld [vmem:[#allocation15 + $0x68c] ss:$16 sps:$4 sm:$0xff]  }
 0x543   :  { %v3081_v11 = vpop.f32.mrb[85].mxu0  ;;  %v10882_v32 = vld [vmem:[#allocation15 + $0x6e8] ss:$16 sps:$4 sm:$0xff]  }
 0x544   :  { %v3083_v10 = vpop.f32.mrb[86].mxu0  ;;  %9630 = vmatmul.mubr.msk.bf16.vlgmr.msra.gmra.mrb[168].mxu0 %vm1081_vm5, %v5894_v55  ;;  %9631 = vmatmul.mubr.msk.bf16.vlgmr.msra.gmra.mrb[196].mxu1 %vm1081_vm5, %v5894_v55  ;;  %v10894_v41 = vld [vmem:[#allocation15 + $0x728] ss:$16 sps:$4 sm:$0xff]  }
 0x545   :  { %v3084_v12 = vpop.f32.mrb[87].mxu0  ;;  %6086 = vmatpush1.bf16.msra.mxu0 %v10813_v52  ;;  %6127 = vmatpush1.bf16.msra.mxu1 %v10816_v34  ;;  %v6449_v52 = vld [vmem:[#allocation3 + $0x32] sm:$0x3]  ;;  %v10861_v34 = vld [vmem:[#allocation15 + $0x680] ss:$16 sps:$4 sm:$0xff]  }
 0x546   :  { %6087 = vmatprep.subr.bf16.mxu0 %v10821_v8  ;;  %6128 = vmatprep.subr.bf16.mxu1 %v10824_v31  ;;  %v6450_v8 = vpack.c.bf16 %v6449_v52, %v6449_v52  ;;  %v10869_v31 = vld [vmem:[#allocation15 + $0x6a4] ss:$16 sps:$4 sm:$0xff]   ;;  %v10906_v52 = vld [vmem:[#allocation15 + $0x768] ss:$16 sps:$4 sm:$0xff]  }
 0x547   :  { %6117 = vmatprep.mubr.bf16.mxu0 %v11443_v61  ;;  %6158 = vmatprep.mubr.bf16.mxu1 %v11443_v61 }
 0x549   :  { %6088 = vmatpush1.bf16.msra.mxu0 %v10819_v14  ;;  %6129 = vmatpush1.bf16.msra.mxu1 %v10822_v15 }
 0x54a   :  { %v3204_v39 = vpop.f32.mrb[88].mxu0  ;;  %6224 = vmatprep.subr.bf16.mxu0 %v10827_v17  ;;  %6265 = vmatprep.subr.bf16.mxu1 %v10830_v1  ;;  %v10867_v1 = vld [vmem:[#allocation15 + $0x6a0] ss:$16 sps:$4 sm:$0xff]  }
 0x54b   :  { %v3205_v24 = vadd.f32 %v3204_v39, %v3079_v56  ;;  %v3206_v25 = vpop.f32.mrb[89].mxu0  ;;  %v10864_v56 = vld [vmem:[#allocation15 + $0x688] ss:$16 sps:$4 sm:$0xff]   ;;  %v6588_v39 = vld [vmem:[#allocation3 + $0x34] sm:$0x3] }
 0x54c   :  { %v3207_v46 = vadd.f32 %v3206_v25, %v3081_v11  ;;  %v3208_v26 = vpop.f32.mrb[90].mxu0  ;;  %9640 = vmatmul.mubr.msk.bf16.vlgmr.msra.gmra.mrb[172].mxu0 %vm1081_vm5, %v6033_v20  ;;  %9641 = vmatmul.mubr.msk.bf16.vlgmr.msra.gmra.mrb[200].mxu1 %vm1081_vm5, %v6033_v20  ;;  %v10872_v11 = vld [vmem:[#allocation15 + $0x6ac] ss:$16 sps:$4 sm:$0xff]   ;;  %v10873_v20 = vld [vmem:[#allocation15 + $0x6c0] ss:$16 sps:$4 sm:$0xff]  }
 0x54d   :  { %v3209_v29 = vpop.f32.mrb[91].mxu0  ;;  %6225 = vmatpush1.bf16.msra.mxu0 %v10825_v5  ;;  %6266 = vmatpush1.bf16.msra.mxu1 %v10828_v36  ;;  %v10875_v5 = vld [vmem:[#allocation15 + $0x6c4] ss:$16 sps:$4 sm:$0xff]   ;;  %v10878_v36 = vld [vmem:[#allocation15 + $0x6cc] ss:$16 sps:$4 sm:$0xff]  }
 0x54e   :  { %6226 = vmatprep.subr.bf16.mxu0 %v10833_v3  ;;  %6267 = vmatprep.subr.bf16.mxu1 %v10836_v4  ;;  %v10876_v3 = vld [vmem:[#allocation15 + $0x6c8] ss:$16 sps:$4 sm:$0xff]   ;;  %v10881_v25 = vld [vmem:[#allocation15 + $0x6e4] ss:$16 sps:$4 sm:$0xff]  }
 0x54f   :  { %6256 = vmatprep.mubr.bf16.mxu0 %v11443_v61  ;;  %6297 = vmatprep.mubr.bf16.mxu1 %v11443_v61 }
 0x551   :  { %6227 = vmatpush1.bf16.msra.mxu0 %v10831_v42  ;;  %6268 = vmatpush1.bf16.msra.mxu1 %v10834_v28 }
 0x552   :  { %v3339_v35 = vpop.f32.mrb[92].mxu0  ;;  %6363 = vmatprep.subr.bf16.mxu0 %v10839_v45  ;;  %6404 = vmatprep.subr.bf16.mxu1 %v10842_v13  ;;  %v10879_v13 = vld [vmem:[#allocation15 + $0x6e0] ss:$16 sps:$4 sm:$0xff]  }
 0x553   :  { %v3387_v40 = vadd.f32 %v3339_v35, %v3205_v24  ;;  %v3341_v22 = vpop.f32.mrb[93].mxu0  ;;  %v6589_v24 = vpack.c.bf16 %v6588_v39, %v6588_v39  ;;  %v6727_v35 = vld [vmem:[#allocation3 + $0x36] sm:$0x3]  ;;  %v10918_v39 = vld [vmem:[#allocation15 + $0x7a8] ss:$16 sps:$4 sm:$0xff]  }
 0x554   :  { %v3388_v21 = vadd.f32 %v3341_v22, %v3207_v46  ;;  %v3343_v57 = vpop.f32.mrb[94].mxu0  ;;  %9650 = vmatmul.mubr.msk.bf16.vlgmr.msra.gmra.mrb[176].mxu0 %vm1081_vm5, %v6172_v2  ;;  %9651 = vmatmul.mubr.msk.bf16.vlgmr.msra.gmra.mrb[204].mxu1 %vm1081_vm5, %v6172_v2  ;;  %v10884_v46 = vld [vmem:[#allocation15 + $0x6ec] ss:$16 sps:$4 sm:$0xff]   ;;  %v10885_v2 = vld [vmem:[#allocation15 + $0x700] ss:$16 sps:$4 sm:$0xff]  }
 0x555   :  { %v3344_v43 = vpop.f32.mrb[95].mxu0  ;;  %6364 = vmatpush1.bf16.msra.mxu0 %v10837_v33  ;;  %6405 = vmatpush1.bf16.msra.mxu1 %v10840_v27  ;;  %v10887_v33 = vld [vmem:[#allocation15 + $0x704] ss:$16 sps:$4 sm:$0xff]   ;;  %v10890_v27 = vld [vmem:[#allocation15 + $0x70c] ss:$16 sps:$4 sm:$0xff]  }
 0x556   :  { %6365 = vmatprep.subr.bf16.mxu0 %v10845_v59  ;;  %6406 = vmatprep.subr.bf16.mxu1 %v10848_v38  ;;  %v10888_v59 = vld [vmem:[#allocation15 + $0x708] ss:$16 sps:$4 sm:$0xff]   ;;  %v10893_v22 = vld [vmem:[#allocation15 + $0x724] ss:$16 sps:$4 sm:$0xff]  }
 0x557   :  { %6395 = vmatprep.mubr.bf16.mxu0 %v11443_v61  ;;  %6436 = vmatprep.mubr.bf16.mxu1 %v11443_v61 }
 0x559   :  { %6366 = vmatpush1.bf16.msra.mxu0 %v10843_v44  ;;  %6407 = vmatpush1.bf16.msra.mxu1 %v10846_v49 }
 0x55a   :  { %v3478_v62 = vpop.f32.mrb[96].mxu0  ;;  %6502 = vmatprep.subr.bf16.mxu0 %v10851_v50  ;;  %6543 = vmatprep.subr.bf16.mxu1 %v10854_v9  ;;  %v10891_v9 = vld [vmem:[#allocation15 + $0x720] ss:$16 sps:$4 sm:$0xff]  }
 0x55b   :  { %v3526_v54 = vadd.f32 %v3478_v62, %v3387_v40  ;;  %v3480_v47 = vpop.f32.mrb[97].mxu0  ;;  %v6728_v40 = vpack.c.bf16 %v6727_v35, %v6727_v35  ;;  %v6866_v62 = vld [vmem:[#allocation3 + $0x38] sm:$0x3]  ;;  %v10930_v35 = vld [vmem:[#allocation15 + $0x7e8] ss:$16 sps:$4 sm:$0xff]  }
 0x55c   :  { %v3527_v16 = vadd.f32 %v3480_v47, %v3388_v21  ;;  %v3482_v48 = vpop.f32.mrb[98].mxu0  ;;  %9660 = vmatmul.mubr.msk.bf16.vlgmr.msra.gmra.mrb[180].mxu0 %vm1081_vm5, %v6311_v7  ;;  %9661 = vmatmul.mubr.msk.bf16.vlgmr.msra.gmra.mrb[208].mxu1 %vm1081_vm5, %v6311_v7  ;;  %v10896_v21 = vld [vmem:[#allocation15 + $0x72c] ss:$16 sps:$4 sm:$0xff]   ;;  %v10897_v7 = vld [vmem:[#allocation15 + $0x740] ss:$16 sps:$4 sm:$0xff]  }
 0x55d   :  { %v3483_v51 = vpop.f32.mrb[99].mxu0  ;;  %6503 = vmatpush1.bf16.msra.mxu0 %v10849_v58  ;;  %6544 = vmatpush1.bf16.msra.mxu1 %v10852_v53  ;;  %v10899_v58 = vld [vmem:[#allocation15 + $0x744] ss:$16 sps:$4 sm:$0xff]   ;;  %v10902_v53 = vld [vmem:[#allocation15 + $0x74c] ss:$16 sps:$4 sm:$0xff]  }
 0x55e   :  { %6504 = vmatprep.subr.bf16.mxu0 %v10857_v30  ;;  %6545 = vmatprep.subr.bf16.mxu1 %v10860_v23  ;;  %v10900_v30 = vld [vmem:[#allocation15 + $0x748] ss:$16 sps:$4 sm:$0xff]   ;;  %v10905_v47 = vld [vmem:[#allocation15 + $0x764] ss:$16 sps:$4 sm:$0xff]  }
 0x55f   :  { %6534 = vmatprep.mubr.bf16.mxu0 %v11443_v61  ;;  %6575 = vmatprep.mubr.bf16.mxu1 %v11443_v61 }
 0x561   :  { %6505 = vmatpush1.bf16.msra.mxu0 %v10855_v60  ;;  %6546 = vmatpush1.bf16.msra.mxu1 %v10858_v63 }
 0x562   :  { %v3617_v55 = vpop.f32.mrb[100].mxu0  ;;  %6641 = vmatprep.subr.bf16.mxu0 %v10863_v0  ;;  %6682 = vmatprep.subr.bf16.mxu1 %v10866_v6  ;;  %v10903_v6 = vld [vmem:[#allocation15 + $0x760] ss:$16 sps:$4 sm:$0xff]  }
 0x563   :  { %v3665_v10 = vadd.f32 %v3617_v55, %v3526_v54  ;;  %v3619_v12 = vpop.f32.mrb[101].mxu0  ;;  %v6867_v54 = vpack.c.bf16 %v6866_v62, %v6866_v62  ;;  %v7005_v55 = vld [vmem:[#allocation3 + $0x3a] sm:$0x3]  ;;  %v10942_v62 = vld [vmem:[#allocation15 + $0x828] ss:$16 sps:$4 sm:$0xff]  }
 0x564   :  { %v3666_v14 = vadd.f32 %v3619_v12, %v3527_v16  ;;  %v3621_v15 = vpop.f32.mrb[102].mxu0  ;;  %9670 = vmatmul.mubr.msk.bf16.vlgmr.msra.gmra.mrb[184].mxu0 %vm1081_vm5, %v6450_v8  ;;  %9671 = vmatmul.mubr.msk.bf16.vlgmr.msra.gmra.mrb[212].mxu1 %vm1081_vm5, %v6450_v8  ;;  %v10908_v16 = vld [vmem:[#allocation15 + $0x76c] ss:$16 sps:$4 sm:$0xff]   ;;  %v10909_v8 = vld [vmem:[#allocation15 + $0x780] ss:$16 sps:$4 sm:$0xff]  }
 0x565   :  { %v3622_v17 = vpop.f32.mrb[103].mxu0  ;;  %6642 = vmatpush1.bf16.msra.mxu0 %v10861_v34  ;;  %6683 = vmatpush1.bf16.msra.mxu1 %v10864_v56  ;;  %v10911_v34 = vld [vmem:[#allocation15 + $0x784] ss:$16 sps:$4 sm:$0xff]   ;;  %v10914_v56 = vld [vmem:[#allocation15 + $0x78c] ss:$16 sps:$4 sm:$0xff]  }
 0x566   :  { %6643 = vmatprep.subr.bf16.mxu0 %v10869_v31  ;;  %6684 = vmatprep.subr.bf16.mxu1 %v10872_v11  ;;  %v10912_v31 = vld [vmem:[#allocation15 + $0x788] ss:$16 sps:$4 sm:$0xff]   ;;  %v10917_v12 = vld [vmem:[#allocation15 + $0x7a4] ss:$16 sps:$4 sm:$0xff]  }
 0x567   :  { %6673 = vmatprep.mubr.bf16.mxu0 %v11443_v61  ;;  %6714 = vmatprep.mubr.bf16.mxu1 %v11443_v61 }
 0x569   :  { %6644 = vmatpush1.bf16.msra.mxu0 %v10867_v1  ;;  %6685 = vmatpush1.bf16.msra.mxu1 %v10870_v19 }
 0x56a   :  { %v3756_v4 = vpop.f32.mrb[104].mxu0  ;;  %6780 = vmatprep.subr.bf16.mxu0 %v10875_v5  ;;  %6821 = vmatprep.subr.bf16.mxu1 %v10878_v36  ;;  %v10915_v36 = vld [vmem:[#allocation15 + $0x7a0] ss:$16 sps:$4 sm:$0xff]  }
 0x56b   :  { %v3804_v26 = vadd.f32 %v3756_v4, %v3665_v10  ;;  %v3758_v29 = vpop.f32.mrb[105].mxu0  ;;  %v7006_v10 = vpack.c.bf16 %v7005_v55, %v7005_v55  ;;  %v7144_v4 = vld [vmem:[#allocation3 + $0x3c] sm:$0x3]  ;;  %v10954_v55 = vld [vmem:[#allocation15 + $0x868] ss:$16 sps:$4 sm:$0xff]  }
 0x56c   :  { %v3805_v42 = vadd.f32 %v3758_v29, %v3666_v14  ;;  %v3760_v28 = vpop.f32.mrb[106].mxu0  ;;  %9680 = vmatmul.mubr.msk.bf16.vlgmr.msra.gmra.mrb[188].mxu0 %vm1081_vm5, %v6589_v24  ;;  %9681 = vmatmul.mubr.msk.bf16.vlgmr.msra.gmra.mrb[216].mxu1 %vm1081_vm5, %v6589_v24  ;;  %v10920_v14 = vld [vmem:[#allocation15 + $0x7ac] ss:$16 sps:$4 sm:$0xff]   ;;  %v10921_v24 = vld [vmem:[#allocation15 + $0x7c0] ss:$16 sps:$4 sm:$0xff]  }
 0x56d   :  { %v3761_v45 = vpop.f32.mrb[107].mxu0  ;;  %6781 = vmatpush1.bf16.msra.mxu0 %v10873_v20  ;;  %6822 = vmatpush1.bf16.msra.mxu1 %v10876_v3  ;;  %v10923_v20 = vld [vmem:[#allocation15 + $0x7c4] ss:$16 sps:$4 sm:$0xff]   ;;  %v10926_v3 = vld [vmem:[#allocation15 + $0x7cc] ss:$16 sps:$4 sm:$0xff]  }
 0x56e   :  { %6782 = vmatprep.subr.bf16.mxu0 %v10881_v25  ;;  %6823 = vmatprep.subr.bf16.mxu1 %v10884_v46  ;;  %v10924_v25 = vld [vmem:[#allocation15 + $0x7c8] ss:$16 sps:$4 sm:$0xff]   ;;  %v10929_v29 = vld [vmem:[#allocation15 + $0x7e4] ss:$16 sps:$4 sm:$0xff]  }
 0x56f   :  { %6812 = vmatprep.mubr.bf16.mxu0 %v11443_v61  ;;  %6853 = vmatprep.mubr.bf16.mxu1 %v11443_v61 }
 0x571   :  { %6783 = vmatpush1.bf16.msra.mxu0 %v10879_v13  ;;  %6824 = vmatpush1.bf16.msra.mxu1 %v10882_v32 }
 0x572   :  { %v3895_v38 = vpop.f32.mrb[108].mxu0  ;;  %6919 = vmatprep.subr.bf16.mxu0 %v10887_v33  ;;  %6960 = vmatprep.subr.bf16.mxu1 %v10890_v27  ;;  %v10927_v27 = vld [vmem:[#allocation15 + $0x7e0] ss:$16 sps:$4 sm:$0xff]  }
 0x573   :  { %v3943_v57 = vadd.f32 %v3895_v38, %v3804_v26  ;;  %v3897_v43 = vpop.f32.mrb[109].mxu0  ;;  %v7145_v26 = vpack.c.bf16 %v7144_v4, %v7144_v4  ;;  %v7283_v38 = vld [vmem:[#allocation3 + $0x3e] sm:$0x3]  ;;  %v10966_v4 = vld [vmem:[#allocation15 + $0x8a8] ss:$16 sps:$4 sm:$0xff]  }
 0x574   :  { %v3944_v44 = vadd.f32 %v3897_v43, %v3805_v42  ;;  %v3899_v49 = vpop.f32.mrb[110].mxu0  ;;  %9690 = vmatmul.mubr.msk.bf16.vlgmr.msra.gmra.mrb[192].mxu0 %vm1081_vm5, %v6728_v40  ;;  %9691 = vmatmul.mubr.msk.bf16.vlgmr.msra.gmra.mrb[220].mxu1 %vm1081_vm5, %v6728_v40  ;;  %v10932_v42 = vld [vmem:[#allocation15 + $0x7ec] ss:$16 sps:$4 sm:$0xff]   ;;  %v10933_v40 = vld [vmem:[#allocation15 + $0x800] ss:$16 sps:$4 sm:$0xff]  }
 0x575   :  { %v3900_v50 = vpop.f32.mrb[111].mxu0  ;;  %6920 = vmatpush1.bf16.msra.mxu0 %v10885_v2  ;;  %6961 = vmatpush1.bf16.msra.mxu1 %v10888_v59  ;;  %v10935_v2 = vld [vmem:[#allocation15 + $0x804] ss:$16 sps:$4 sm:$0xff]   ;;  %v10938_v59 = vld [vmem:[#allocation15 + $0x80c] ss:$16 sps:$4 sm:$0xff]  }
 0x576   :  { %6921 = vmatprep.subr.bf16.mxu0 %v10893_v22  ;;  %6962 = vmatprep.subr.bf16.mxu1 %v10896_v21  ;;  %v10936_v22 = vld [vmem:[#allocation15 + $0x808] ss:$16 sps:$4 sm:$0xff]   ;;  %v10941_v43 = vld [vmem:[#allocation15 + $0x824] ss:$16 sps:$4 sm:$0xff]  }
 0x577   :  { %6951 = vmatprep.mubr.bf16.mxu0 %v11443_v61  ;;  %6992 = vmatprep.mubr.bf16.mxu1 %v11443_v61 }
 0x579   :  { %6922 = vmatpush1.bf16.msra.mxu0 %v10891_v9  ;;  %6963 = vmatpush1.bf16.msra.mxu1 %v10894_v41 }
 0x57a   :  { %v4034_v23 = vpop.f32.mrb[112].mxu0  ;;  %7058 = vmatprep.subr.bf16.mxu0 %v10899_v58  ;;  %7099 = vmatprep.subr.bf16.mxu1 %v10902_v53  ;;  %v10939_v53 = vld [vmem:[#allocation15 + $0x820] ss:$16 sps:$4 sm:$0xff]  }
 0x57b   :  { %v4082_v48 = vadd.f32 %v4034_v23, %v3943_v57  ;;  %v4036_v51 = vpop.f32.mrb[113].mxu0  ;;  %v7284_v57 = vpack.c.bf16 %v7283_v38, %v7283_v38  ;;  %v7422_v23 = vld [vmem:[#allocation3 + $0x40] sm:$0x3] }
 0x57c   :  { %v4083_v60 = vadd.f32 %v4036_v51, %v3944_v44  ;;  %v4038_v63 = vpop.f32.mrb[114].mxu0  ;;  %9700 = vmatmul.mubr.msk.bf16.vlgmr.msra.gmra.mrb[196].mxu0 %vm1081_vm5, %v6867_v54  ;;  %9701 = vmatmul.mubr.msk.bf16.vlgmr.msra.gmra.mrb[224].mxu1 %vm1081_vm5, %v6867_v54  ;;  %v10944_v44 = vld [vmem:[#allocation15 + $0x82c] ss:$16 sps:$4 sm:$0xff]   ;;  %v10945_v54 = vld [vmem:[#allocation15 + $0x840] ss:$16 sps:$4 sm:$0xff]  }
 0x57d   :  { %v4039_v0 = vpop.f32.mrb[115].mxu0  ;;  %7059 = vmatpush1.bf16.msra.mxu0 %v10897_v7  ;;  %7100 = vmatpush1.bf16.msra.mxu1 %v10900_v30  ;;  %v10947_v7 = vld [vmem:[#allocation15 + $0x844] ss:$16 sps:$4 sm:$0xff]   ;;  %v10950_v30 = vld [vmem:[#allocation15 + $0x84c] ss:$16 sps:$4 sm:$0xff]  }
 0x57e   :  { %7060 = vmatprep.subr.bf16.mxu0 %v10905_v47  ;;  %7101 = vmatprep.subr.bf16.mxu1 %v10908_v16  ;;  %v10948_v47 = vld [vmem:[#allocation15 + $0x848] ss:$16 sps:$4 sm:$0xff]   ;;  %v10953_v51 = vld [vmem:[#allocation15 + $0x864] ss:$16 sps:$4 sm:$0xff]  }
 0x57f   :  { %7090 = vmatprep.mubr.bf16.mxu0 %v11443_v61  ;;  %7131 = vmatprep.mubr.bf16.mxu1 %v11443_v61  ;;  %v10978_v38 = vld [vmem:[#allocation15 + $0x8e8] ss:$16 sps:$4 sm:$0xff]  }
 0x581   :  { %7061 = vmatpush1.bf16.msra.mxu0 %v10903_v6  ;;  %7102 = vmatpush1.bf16.msra.mxu1 %v10906_v52 }
 0x582   :  { %v4173_v11 = vpop.f32.mrb[116].mxu0  ;;  %7197 = vmatprep.subr.bf16.mxu0 %v10911_v34  ;;  %7238 = vmatprep.subr.bf16.mxu1 %v10914_v56  ;;  %v10951_v56 = vld [vmem:[#allocation15 + $0x860] ss:$16 sps:$4 sm:$0xff]  }
 0x583   :  { %v4221_v15 = vadd.f32 %v4173_v11, %v4082_v48  ;;  %v4175_v17 = vpop.f32.mrb[117].mxu0  ;;  %v7423_v48 = vpack.c.bf16 %v7422_v23, %v7422_v23  ;;  %v7561_v11 = vld [vmem:[#allocation3 + $0x42] sm:$0x3] }
 0x584   :  { %v4222_v1 = vadd.f32 %v4175_v17, %v4083_v60  ;;  %v4177_v19 = vpop.f32.mrb[118].mxu0  ;;  %9710 = vmatmul.mubr.msk.bf16.vlgmr.msra.gmra.mrb[200].mxu0 %vm1081_vm5, %v7006_v10  ;;  %9711 = vmatmul.mubr.msk.bf16.vlgmr.msra.gmra.mrb[228].mxu1 %vm1081_vm5, %v7006_v10  ;;  %v10956_v60 = vld [vmem:[#allocation15 + $0x86c] ss:$16 sps:$4 sm:$0xff]   ;;  %v10957_v10 = vld [vmem:[#allocation15 + $0x880] ss:$16 sps:$4 sm:$0xff]  }
 0x585   :  { %v4178_v5 = vpop.f32.mrb[119].mxu0  ;;  %7198 = vmatpush1.bf16.msra.mxu0 %v10909_v8  ;;  %7239 = vmatpush1.bf16.msra.mxu1 %v10912_v31  ;;  %v10959_v8 = vld [vmem:[#allocation15 + $0x884] ss:$16 sps:$4 sm:$0xff]   ;;  %v10962_v31 = vld [vmem:[#allocation15 + $0x88c] ss:$16 sps:$4 sm:$0xff]  }
 0x586   :  { %7199 = vmatprep.subr.bf16.mxu0 %v10917_v12  ;;  %7240 = vmatprep.subr.bf16.mxu1 %v10920_v14  ;;  %v10960_v12 = vld [vmem:[#allocation15 + $0x888] ss:$16 sps:$4 sm:$0xff]   ;;  %v10965_v17 = vld [vmem:[#allocation15 + $0x8a4] ss:$16 sps:$4 sm:$0xff]  }
 0x587   :  { %7229 = vmatprep.mubr.bf16.mxu0 %v11443_v61  ;;  %7270 = vmatprep.mubr.bf16.mxu1 %v11443_v61  ;;  %v10990_v23 = vld [vmem:[#allocation15 + $0x928] ss:$16 sps:$4 sm:$0xff]  }
 0x589   :  { %7200 = vmatpush1.bf16.msra.mxu0 %v10915_v36  ;;  %7241 = vmatpush1.bf16.msra.mxu1 %v10918_v39 }
 0x58a   :  { %v4312_v46 = vpop.f32.mrb[120].mxu0  ;;  %7336 = vmatprep.subr.bf16.mxu0 %v10923_v20  ;;  %7377 = vmatprep.subr.bf16.mxu1 %v10926_v3  ;;  %v10963_v3 = vld [vmem:[#allocation15 + $0x8a0] ss:$16 sps:$4 sm:$0xff]  }
 0x58b   :  { %v4360_v28 = vadd.f32 %v4312_v46, %v4221_v15  ;;  %v4314_v45 = vpop.f32.mrb[121].mxu0  ;;  %v7562_v15 = vpack.c.bf16 %v7561_v11, %v7561_v11  ;;  %v7700_v46 = vld [vmem:[#allocation3 + $0x44] sm:$0x3]  ;;  %v11002_v11 = vld [vmem:[#allocation15 + $0x968] ss:$16 sps:$4 sm:$0xff]  }
 0x58c   :  { %v4361_v13 = vadd.f32 %v4314_v45, %v4222_v1  ;;  %v4316_v32 = vpop.f32.mrb[122].mxu0  ;;  %9720 = vmatmul.mubr.msk.bf16.vlgmr.msra.gmra.mrb[204].mxu0 %vm1081_vm5, %v7145_v26  ;;  %9721 = vmatmul.mubr.msk.bf16.vlgmr.msra.gmra.mrb[232].mxu1 %vm1081_vm5, %v7145_v26  ;;  %v10968_v1 = vld [vmem:[#allocation15 + $0x8ac] ss:$16 sps:$4 sm:$0xff]   ;;  %v10969_v26 = vld [vmem:[#allocation15 + $0x8c0] ss:$16 sps:$4 sm:$0xff]  }
 0x58d   :  { %v4317_v33 = vpop.f32.mrb[123].mxu0  ;;  %7337 = vmatpush1.bf16.msra.mxu0 %v10921_v24  ;;  %7378 = vmatpush1.bf16.msra.mxu1 %v10924_v25  ;;  %v10971_v24 = vld [vmem:[#allocation15 + $0x8c4] ss:$16 sps:$4 sm:$0xff]   ;;  %v10974_v25 = vld [vmem:[#allocation15 + $0x8cc] ss:$16 sps:$4 sm:$0xff]  }
 0x58e   :  { %7338 = vmatprep.subr.bf16.mxu0 %v10929_v29  ;;  %7379 = vmatprep.subr.bf16.mxu1 %v10932_v42  ;;  %v10972_v29 = vld [vmem:[#allocation15 + $0x8c8] ss:$16 sps:$4 sm:$0xff]   ;;  %v10977_v45 = vld [vmem:[#allocation15 + $0x8e4] ss:$16 sps:$4 sm:$0xff]  }
 0x58f   :  { %7368 = vmatprep.mubr.bf16.mxu0 %v11443_v61  ;;  %7409 = vmatprep.mubr.bf16.mxu1 %v11443_v61 }
 0x591   :  { %7339 = vmatpush1.bf16.msra.mxu0 %v10927_v27  ;;  %7380 = vmatpush1.bf16.msra.mxu1 %v10930_v35 }
 0x592   :  { %v4451_v21 = vpop.f32.mrb[124].mxu0  ;;  %7475 = vmatprep.subr.bf16.mxu0 %v10935_v2  ;;  %7516 = vmatprep.subr.bf16.mxu1 %v10938_v59  ;;  %v10975_v59 = vld [vmem:[#allocation15 + $0x8e0] ss:$16 sps:$4 sm:$0xff]  }
 0x593   :  { %v4499_v49 = vadd.f32 %v4451_v21, %v4360_v28  ;;  %v4453_v50 = vpop.f32.mrb[125].mxu0  ;;  %v7701_v28 = vpack.c.bf16 %v7700_v46, %v7700_v46  ;;  %v7839_v21 = vld [vmem:[#allocation3 + $0x46] sm:$0x3]  ;;  %v11014_v46 = vld [vmem:[#allocation15 + $0x9a8] ss:$16 sps:$4 sm:$0xff]  }
 0x594   :  { %v4500_v9 = vadd.f32 %v4453_v50, %v4361_v13  ;;  %v4455_v41 = vpop.f32.mrb[126].mxu0  ;;  %9730 = vmatmul.mubr.msk.bf16.vlgmr.msra.gmra.mrb[208].mxu0 %vm1081_vm5, %v7284_v57  ;;  %9731 = vmatmul.mubr.msk.bf16.vlgmr.msra.gmra.mrb[236].mxu1 %vm1081_vm5, %v7284_v57  ;;  %v10980_v13 = vld [vmem:[#allocation15 + $0x8ec] ss:$16 sps:$4 sm:$0xff]   ;;  %v10981_v57 = vld [vmem:[#allocation15 + $0x900] ss:$16 sps:$4 sm:$0xff]  }
 0x595   :  { %v4456_v58 = vpop.f32.mrb[127].mxu0  ;;  %7476 = vmatpush1.bf16.msra.mxu0 %v10933_v40  ;;  %7517 = vmatpush1.bf16.msra.mxu1 %v10936_v22  ;;  %v10983_v40 = vld [vmem:[#allocation15 + $0x904] ss:$16 sps:$4 sm:$0xff]   ;;  %v10986_v22 = vld [vmem:[#allocation15 + $0x90c] ss:$16 sps:$4 sm:$0xff]  }
 0x596   :  { %7477 = vmatprep.subr.bf16.mxu0 %v10941_v43  ;;  %7518 = vmatprep.subr.bf16.mxu1 %v10944_v44  ;;  %v10984_v43 = vld [vmem:[#allocation15 + $0x908] ss:$16 sps:$4 sm:$0xff]   ;;  %v10989_v50 = vld [vmem:[#allocation15 + $0x924] ss:$16 sps:$4 sm:$0xff]  }
 0x597   :  { %7507 = vmatprep.mubr.bf16.mxu0 %v11443_v61  ;;  %7548 = vmatprep.mubr.bf16.mxu1 %v11443_v61 }
 0x599   :  { %7478 = vmatpush1.bf16.msra.mxu0 %v10939_v53  ;;  %7519 = vmatpush1.bf16.msra.mxu1 %v10942_v62 }
 0x59a   :  { %v4590_v16 = vpop.f32.mrb[128].mxu0  ;;  %7614 = vmatprep.subr.bf16.mxu0 %v10947_v7  ;;  %7655 = vmatprep.subr.bf16.mxu1 %v10950_v30  ;;  %v10987_v30 = vld [vmem:[#allocation15 + $0x920] ss:$16 sps:$4 sm:$0xff]  }
 0x59b   :  { %v4638_v63 = vadd.f32 %v4590_v16, %v4499_v49  ;;  %v4592_v0 = vpop.f32.mrb[129].mxu0  ;;  %v7840_v49 = vpack.c.bf16 %v7839_v21, %v7839_v21  ;;  %v7978_v16 = vld [vmem:[#allocation3 + $0x48] sm:$0x3]  ;;  %v11026_v21 = vld [vmem:[#allocation15 + $0x9e8] ss:$16 sps:$4 sm:$0xff]  }
 0x59c   :  { %v4639_v6 = vadd.f32 %v4592_v0, %v4500_v9  ;;  %v4594_v52 = vpop.f32.mrb[130].mxu0  ;;  %9740 = vmatmul.mubr.msk.bf16.vlgmr.msra.gmra.mrb[212].mxu0 %vm1081_vm5, %v7423_v48  ;;  %9741 = vmatmul.mubr.msk.bf16.vlgmr.msra.gmra.mrb[240].mxu1 %vm1081_vm5, %v7423_v48  ;;  %v10992_v9 = vld [vmem:[#allocation15 + $0x92c] ss:$16 sps:$4 sm:$0xff]   ;;  %v10993_v48 = vld [vmem:[#allocation15 + $0x940] ss:$16 sps:$4 sm:$0xff]  }
 0x59d   :  { %v4595_v34 = vpop.f32.mrb[131].mxu0  ;;  %7615 = vmatpush1.bf16.msra.mxu0 %v10945_v54  ;;  %7656 = vmatpush1.bf16.msra.mxu1 %v10948_v47  ;;  %v10995_v54 = vld [vmem:[#allocation15 + $0x944] ss:$16 sps:$4 sm:$0xff]   ;;  %v10998_v47 = vld [vmem:[#allocation15 + $0x94c] ss:$16 sps:$4 sm:$0xff]  }
 0x59e   :  { %7616 = vmatprep.subr.bf16.mxu0 %v10953_v51  ;;  %7657 = vmatprep.subr.bf16.mxu1 %v10956_v60  ;;  %v10996_v51 = vld [vmem:[#allocation15 + $0x948] ss:$16 sps:$4 sm:$0xff]   ;;  %v11001_v0 = vld [vmem:[#allocation15 + $0x964] ss:$16 sps:$4 sm:$0xff]  }
 0x59f   :  { %7646 = vmatprep.mubr.bf16.mxu0 %v11443_v61  ;;  %7687 = vmatprep.mubr.bf16.mxu1 %v11443_v61 }
 0x5a1   :  { %7617 = vmatpush1.bf16.msra.mxu0 %v10951_v56  ;;  %7658 = vmatpush1.bf16.msra.mxu1 %v10954_v55 }
 0x5a2   :  { %v4729_v14 = vpop.f32.mrb[132].mxu0  ;;  %7753 = vmatprep.subr.bf16.mxu0 %v10959_v8  ;;  %7794 = vmatprep.subr.bf16.mxu1 %v10962_v31  ;;  %v10999_v31 = vld [vmem:[#allocation15 + $0x960] ss:$16 sps:$4 sm:$0xff]  }
 0x5a3   :  { %v4777_v19 = vadd.f32 %v4729_v14, %v4638_v63  ;;  %v4731_v5 = vpop.f32.mrb[133].mxu0  ;;  %v7979_v63 = vpack.c.bf16 %v7978_v16, %v7978_v16  ;;  %v8117_v14 = vld [vmem:[#allocation3 + $0x4a] sm:$0x3]  ;;  %v11034_v16 = vld [vmem:[#allocation18 + $0x14] ss:$8 sps:$4 sm:$0xff]  }
 0x5a4   :  { %v4778_v36 = vadd.f32 %v4731_v5, %v4639_v6  ;;  %v4733_v39 = vpop.f32.mrb[134].mxu0  ;;  %9750 = vmatmul.mubr.msk.bf16.vlgmr.msra.gmra.mrb[216].mxu0 %vm1081_vm5, %v7562_v15  ;;  %9751 = vmatmul.mubr.msk.bf16.vlgmr.msra.gmra.mrb[244].mxu1 %vm1081_vm5, %v7562_v15  ;;  %v11004_v6 = vld [vmem:[#allocation15 + $0x96c] ss:$16 sps:$4 sm:$0xff]   ;;  %v11005_v15 = vld [vmem:[#allocation15 + $0x980] ss:$16 sps:$4 sm:$0xff]  }
 0x5a5   :  { %v4734_v20 = vpop.f32.mrb[135].mxu0  ;;  %7754 = vmatpush1.bf16.msra.mxu0 %v10957_v10  ;;  %7795 = vmatpush1.bf16.msra.mxu1 %v10960_v12  ;;  %v11007_v10 = vld [vmem:[#allocation15 + $0x984] ss:$16 sps:$4 sm:$0xff]   ;;  %v11010_v12 = vld [vmem:[#allocation15 + $0x98c] ss:$16 sps:$4 sm:$0xff]  }
 0x5a6   :  { %7755 = vmatprep.subr.bf16.mxu0 %v10965_v17  ;;  %7796 = vmatprep.subr.bf16.mxu1 %v10968_v1  ;;  %v11008_v17 = vld [vmem:[#allocation15 + $0x988] ss:$16 sps:$4 sm:$0xff]   ;;  %v11013_v5 = vld [vmem:[#allocation15 + $0x9a4] ss:$16 sps:$4 sm:$0xff]  }
 0x5a7   :  { %7785 = vmatprep.mubr.bf16.mxu0 %v11443_v61  ;;  %7826 = vmatprep.mubr.bf16.mxu1 %v11443_v61 }
 0x5a9   :  { %7756 = vmatpush1.bf16.msra.mxu0 %v10963_v3  ;;  %7797 = vmatpush1.bf16.msra.mxu1 %v10966_v4 }
 0x5aa   :  { %v4868_v42 = vpop.f32.mrb[136].mxu0  ;;  %7892 = vmatprep.subr.bf16.mxu0 %v10971_v24  ;;  %7933 = vmatprep.subr.bf16.mxu1 %v10974_v25  ;;  %v11011_v25 = vld [vmem:[#allocation15 + $0x9a0] ss:$16 sps:$4 sm:$0xff]  }
 0x5ab   :  { %v4916_v32 = vadd.f32 %v4868_v42, %v4777_v19  ;;  %v4870_v33 = vpop.f32.mrb[137].mxu0  ;;  %v8118_v19 = vpack.c.bf16 %v8117_v14, %v8117_v14  ;;  %v8256_v42 = vld [vmem:[#allocation3 + $0x4c] sm:$0x3] }
 0x5ac   :  { %v4917_v27 = vadd.f32 %v4870_v33, %v4778_v36  ;;  %v4872_v35 = vpop.f32.mrb[138].mxu0  ;;  %9760 = vmatmul.mubr.msk.bf16.vlgmr.msra.gmra.mrb[220].mxu0 %vm1081_vm5, %v7701_v28  ;;  %9761 = vmatmul.mubr.msk.bf16.vlgmr.msra.gmra.mrb[248].mxu1 %vm1081_vm5, %v7701_v28  ;;  %v11016_v36 = vld [vmem:[#allocation15 + $0x9ac] ss:$16 sps:$4 sm:$0xff]   ;;  %v11017_v28 = vld [vmem:[#allocation15 + $0x9c0] ss:$16 sps:$4 sm:$0xff]  }
 0x5ad   :  { %v4873_v2 = vpop.f32.mrb[139].mxu0  ;;  %7893 = vmatpush1.bf16.msra.mxu0 %v10969_v26  ;;  %7934 = vmatpush1.bf16.msra.mxu1 %v10972_v29  ;;  %v11019_v26 = vld [vmem:[#allocation15 + $0x9c4] ss:$16 sps:$4 sm:$0xff]   ;;  %v11022_v29 = vld [vmem:[#allocation15 + $0x9cc] ss:$16 sps:$4 sm:$0xff]  }
 0x5ae   :  { %7894 = vmatprep.subr.bf16.mxu0 %v10977_v45  ;;  %7935 = vmatprep.subr.bf16.mxu1 %v10980_v13  ;;  %v11020_v45 = vld [vmem:[#allocation15 + $0x9c8] ss:$16 sps:$4 sm:$0xff]   ;;  %v11025_v33 = vld [vmem:[#allocation15 + $0x9e4] ss:$16 sps:$4 sm:$0xff]  }
 0x5af   :  { %7924 = vmatprep.mubr.bf16.mxu0 %v11443_v61  ;;  %7965 = vmatprep.mubr.bf16.mxu1 %v11443_v61 }
 0x5b1   :  { %7895 = vmatpush1.bf16.msra.mxu0 %v10975_v59  ;;  %7936 = vmatpush1.bf16.msra.mxu1 %v10978_v38 }
 0x5b2   :  { %v5007_v44 = vpop.f32.mrb[140].mxu0  ;;  %8031 = vmatprep.subr.bf16.mxu0 %v10983_v40  ;;  %8072 = vmatprep.subr.bf16.mxu1 %v10986_v22  ;;  %v11023_v22 = vld [vmem:[#allocation15 + $0x9e0] ss:$16 sps:$4 sm:$0xff]  }
 0x5b3   :  { %v5055_v41 = vadd.f32 %v5007_v44, %v4916_v32  ;;  %v5009_v58 = vpop.f32.mrb[141].mxu0  ;;  %v8257_v32 = vpack.c.bf16 %v8256_v42, %v8256_v42 }
 0x5b4   :  { %v5056_v53 = vadd.f32 %v5009_v58, %v4917_v27  ;;  %v5011_v62 = vpop.f32.mrb[142].mxu0  ;;  %9770 = vmatmul.mubr.msk.bf16.vlgmr.msra.gmra.mrb[224].mxu0 %vm1081_vm5, %v7840_v49  ;;  %9771 = vmatmul.mubr.msk.bf16.vlgmr.msra.gmra.mrb[252].mxu1 %vm1081_vm5, %v7840_v49  ;;  %v11028_v27 = vld [vmem:[#allocation15 + $0x9ec] ss:$16 sps:$4 sm:$0xff]  }
 0x5b5   :  { %v5012_v7 = vpop.f32.mrb[143].mxu0  ;;  %8032 = vmatpush1.bf16.msra.mxu0 %v10981_v57  ;;  %8073 = vmatpush1.bf16.msra.mxu1 %v10984_v43  ;;  %v8395_v57 = vld [vmem:[#allocation3 + $0x4e] sm:$0x3] }
 0x5b6   :  { %8033 = vmatprep.subr.bf16.mxu0 %v10989_v50  ;;  %8074 = vmatprep.subr.bf16.mxu1 %v10992_v9  ;;  %v8396_v44 = vpack.c.bf16 %v8395_v57, %v8395_v57 }
 0x5b7   :  { %8063 = vmatprep.mubr.bf16.mxu0 %v11443_v61  ;;  %8104 = vmatprep.mubr.bf16.mxu1 %v11443_v61 }
 0x5b9   :  { %8034 = vmatpush1.bf16.msra.mxu0 %v10987_v30  ;;  %8075 = vmatpush1.bf16.msra.mxu1 %v10990_v23 }
 0x5ba   :  { %v5146_v60 = vpop.f32.mrb[144].mxu0  ;;  %8170 = vmatprep.subr.bf16.mxu0 %v10995_v54  ;;  %8211 = vmatprep.subr.bf16.mxu1 %v10998_v47  ;;  %v11029_v54 = vld [vmem:[#allocation18] ss:$8 sps:$4 sm:$0xff]   ;;  %v11031_v47 = vld [vmem:[#allocation18 + $0x4] ss:$8 sps:$4 sm:$0xff]  }
 0x5bb   :  { %v5194_v52 = vadd.f32 %v5146_v60, %v5055_v41  ;;  %v5148_v34 = vpop.f32.mrb[145].mxu0  ;;  %v11037_v60 = vld [vmem:[#allocation18 + $0x24] ss:$8 sps:$4 sm:$0xff]  }
 0x5bc   :  { %v5195_v56 = vadd.f32 %v5148_v34, %v5056_v53  ;;  %v5150_v55 = vpop.f32.mrb[146].mxu0  ;;  %9780 = vmatmul.mubr.msk.bf16.vlgmr.msra.gmra.mrb[228].mxu0 %vm1081_vm5, %v7979_v63  ;;  %9781 = vmatmul.mubr.msk.bf16.vlgmr.msra.gmra.mrb[0].mxu1 %vm1081_vm5, %v7979_v63  ;;  %v11040_v63 = vld [vmem:[#allocation18 + $0x34] ss:$8 sps:$4 sm:$0xff]  }
 0x5bd   :  { %v5151_v8 = vpop.f32.mrb[147].mxu0  ;;  %8171 = vmatpush1.bf16.msra.mxu0 %v10993_v48  ;;  %8212 = vmatpush1.bf16.msra.mxu1 %v10996_v51  ;;  %v11032_v48 = vld [vmem:[#allocation18 + $0x10] ss:$8 sps:$4 sm:$0xff]   ;;  %v11035_v51 = vld [vmem:[#allocation18 + $0x20] ss:$8 sps:$4 sm:$0xff]  }
 0x5be   :  { %8172 = vmatprep.subr.bf16.mxu0 %v11001_v0  ;;  %8213 = vmatprep.subr.bf16.mxu1 %v11004_v6  ;;  %v11038_v0 = vld [vmem:[#allocation18 + $0x30] ss:$8 sps:$4 sm:$0xff]   ;;  %v11041_v6 = vld [vmem:[#allocation18 + $0x40] ss:$8 sps:$4 sm:$0xff]   ;;  %v11046_v34 = vld [vmem:[#allocation18 + $0x54] ss:$8 sps:$4 sm:$0xff]  }
 0x5bf   :  { %8202 = vmatprep.mubr.bf16.mxu0 %v11443_v61  ;;  %8243 = vmatprep.mubr.bf16.mxu1 %v11443_v61  ;;  %v11047_v55 = vld [vmem:[#allocation18 + $0x60] ss:$8 sps:$4 sm:$0xff]   ;;  %v11049_v8 = vld [vmem:[#allocation18 + $0x64] ss:$8 sps:$4 sm:$0xff]  }
 0x5c1   :  { %8173 = vmatpush1.bf16.msra.mxu0 %v10999_v31  ;;  %8214 = vmatpush1.bf16.msra.mxu1 %v11002_v11  ;;  %v11052_v31 = vld [vmem:[#allocation18 + $0x74] ss:$8 sps:$4 sm:$0xff]   ;;  %v11050_v11 = vld [vmem:[#allocation18 + $0x70] ss:$8 sps:$4 sm:$0xff]  }
 0x5c2   :  { %v5285_v1 = vpop.f32.mrb[148].mxu0  ;;  %8309 = vmatprep.subr.bf16.mxu0 %v11007_v10  ;;  %8350 = vmatprep.subr.bf16.mxu1 %v11010_v12 }
 0x5c3   :  { %v5333_v39 = vadd.f32 %v5285_v1, %v5194_v52  ;;  %v5287_v20 = vpop.f32.mrb[149].mxu0  ;;  %v11043_v52 = vld [vmem:[#allocation18 + $0x44] ss:$8 sps:$4 sm:$0xff]  }
 0x5c4   :  { %v5334_v3 = vadd.f32 %v5287_v20, %v5195_v56  ;;  %v5289_v4 = vpop.f32.mrb[150].mxu0  ;;  %9790 = vmatmul.mubr.msk.bf16.vlgmr.msra.gmra.mrb[232].mxu0 %vm1081_vm5, %v8118_v19  ;;  %9791 = vmatmul.mubr.msk.bf16.vlgmr.msra.gmra.mrb[12].mxu1 %vm1081_vm5, %v8118_v19  ;;  %v11044_v56 = vld [vmem:[#allocation18 + $0x50] ss:$8 sps:$4 sm:$0xff]  }
 0x5c5   :  { %v5290_v24 = vpop.f32.mrb[151].mxu0  ;;  %8310 = vmatpush1.bf16.msra.mxu0 %v11005_v15  ;;  %8351 = vmatpush1.bf16.msra.mxu1 %v11008_v17  ;;  %v11053_v4 = vld [vmem:[#allocation18 + $0x80] ss:$8 sps:$4 sm:$0xff]  }
 0x5c6   :  { %8311 = vmatprep.subr.bf16.mxu0 %v11013_v5  ;;  %8352 = vmatprep.subr.bf16.mxu1 %v11016_v36  ;;  %v11055_v24 = vld [vmem:[#allocation18 + $0x84] ss:$8 sps:$4 sm:$0xff]  }
 0x5c7   :  { %8341 = vmatprep.mubr.bf16.mxu0 %v11443_v61  ;;  %8382 = vmatprep.mubr.bf16.mxu1 %v11443_v61 }
 0x5c9   :  { %8312 = vmatpush1.bf16.msra.mxu0 %v11011_v25  ;;  %8353 = vmatpush1.bf16.msra.mxu1 %v11014_v46  ;;  %v11058_v25 = vld [vmem:[#allocation18 + $0x94] ss:$8 sps:$4 sm:$0xff]   ;;  %v11056_v46 = vld [vmem:[#allocation18 + $0x90] ss:$8 sps:$4 sm:$0xff]  }
 0x5ca   :  { %v5424_v13 = vpop.f32.mrb[152].mxu0  ;;  %8448 = vmatprep.subr.bf16.mxu0 %v11019_v26  ;;  %8489 = vmatprep.subr.bf16.mxu1 %v11022_v29 }
 0x5cb   :  { %v5472_v35 = vadd.f32 %v5424_v13, %v5333_v39  ;;  %v5426_v2 = vpop.f32.mrb[153].mxu0 }
 0x5cc   :  { %v5473_v59 = vadd.f32 %v5426_v2, %v5334_v3  ;;  %v5428_v38 = vpop.f32.mrb[154].mxu0  ;;  %9800 = vmatmul.mubr.msk.bf16.vlgmr.msra.gmra.mrb[236].mxu0 %vm1081_vm5, %v8257_v32  ;;  %9801 = vmatmul.mubr.msk.bf16.vlgmr.msra.gmra.mrb[4].mxu1 %vm1081_vm5, %v8257_v32  ;;  %v11059_v2 = vld [vmem:[#allocation18 + $0xa0] ss:$8 sps:$4 sm:$0xff]  }
 0x5cd   :  { %v5429_v40 = vpop.f32.mrb[155].mxu0  ;;  %8449 = vmatpush1.bf16.msra.mxu0 %v11017_v28  ;;  %8490 = vmatpush1.bf16.msra.mxu1 %v11020_v45  ;;  %v11064_v38 = vld [vmem:[#allocation18 + $0xb4] ss:$8 sps:$4 sm:$0xff]  }
 0x5ce   :  { %8450 = vmatprep.subr.bf16.mxu0 %v11025_v33  ;;  %8491 = vmatprep.subr.bf16.mxu1 %v11028_v27  ;;  %v11062_v40 = vld [vmem:[#allocation18 + $0xb0] ss:$8 sps:$4 sm:$0xff]  }
 0x5cf   :  { %8480 = vmatprep.mubr.bf16.mxu0 %v11443_v61  ;;  %8521 = vmatprep.mubr.bf16.mxu1 %v11443_v61 }
 0x5d1   :  { %8451 = vmatpush1.bf16.msra.mxu0 %v11023_v22  ;;  %8492 = vmatpush1.bf16.msra.mxu1 %v11026_v21 }
 0x5d2   :  { %v5563_v43 = vpop.f32.mrb[156].mxu0  ;;  %8972 = vmatprep.subr.bf16.mxu0 %v11031_v47 }
 0x5d3   :  { %v5611_v49 = vadd.f32 %v5563_v43, %v5472_v35  ;;  %v5565_v50 = vpop.f32.mrb[157].mxu0 }
 0x5d4   :  { %v5612_v9 = vadd.f32 %v5565_v50, %v5473_v59  ;;  %v5567_v41 = vpop.f32.mrb[158].mxu0  ;;  %9810 = vmatmul.mubr.msk.bf16.vlgmr.msra.gmra.mrb[240].mxu0 %vm1081_vm5, %v8396_v44  ;;  %9811 = vmatmul.mubr.msk.bf16.vlgmr.msra.gmra.mrb[16].mxu1 %vm1081_vm5, %v8396_v44  ;;  %v11061_v59 = vld [vmem:[#allocation18 + $0xa4] ss:$8 sps:$4 sm:$0xff]  }
 0x5d5   :  { %v5568_v58 = vpop.f32.mrb[159].mxu0  ;;  %8973 = vmatpush1.bf16.msra.mxu0 %v11029_v54  ;;  %v8536_v54 = vlaneseq }
 0x5d6   :  { %8974 = vmatprep.subr.bf16.mxu0 %v11034_v16 }
 0x5d9   :  { %8975 = vmatpush1.bf16.msra.mxu0 %v11032_v48  ;;  %v12651_v48 = vshrl.u32 %v8536_v54, 7 }
 0x5da   :  { %v5702_v53 = vpop.f32.mrb[160].mxu0  ;;  %8976 = vmatprep.subr.bf16.mxu0 %v11037_v60 }
 0x5db   :  { %v5750_v62 = vadd.f32 %v5702_v53, %v5611_v49  ;;  %v5704_v7 = vpop.f32.mrb[161].mxu0 }
 0x5dc   :  { %v5751_v30 = vadd.f32 %v5704_v7, %v5612_v9  ;;  %v5706_v23 = vpop.f32.mrb[162].mxu0  ;;  %v11065_v7 = vld [vmem:[#allocation18 + $0xc0] ss:$8 sps:$4 sm:$0xff]  }
 0x5dd   :  { %v5707_v61 = vpop.f32.mrb[163].mxu0  ;;  %8977 = vmatpush1.bf16.msra.mxu0 %v11035_v51  ;;  %v11070_v23 = vld [vmem:[#allocation18 + $0xd4] ss:$8 sps:$4 sm:$0xff]  }
 0x5de   :  { %8978 = vmatprep.subr.bf16.mxu0 %v11040_v63  ;;  %v11068_v61 = vld [vmem:[#allocation18 + $0xd0] ss:$8 sps:$4 sm:$0xff]  }
 0x5e1   :  { %8979 = vmatpush1.bf16.msra.mxu0 %v11038_v0 }
 0x5e2   :  { %8980 = vmatprep.subr.bf16.mxu0 %v11043_v52 }
 0x5e5   :  { %8981 = vmatpush1.bf16.msra.mxu0 %v11041_v6  ;;  %v12653_v6 = vld [vmem:[#allocation16] sm:$0xf] }
 0x5e6   :  { %8982 = vmatprep.subr.bf16.mxu0 %v11046_v34 }
 0x5e9   :  { %8983 = vmatpush1.bf16.msra.mxu0 %v11044_v56 }
 0x5ea   :  { %8984 = vmatprep.subr.bf16.mxu0 %v11049_v8  ;;  %v8546_v8 = vsub.s32 2, %v12651_v48 }
 0x5ed   :  { %8985 = vmatpush1.bf16.msra.mxu0 %v11047_v55 }
 0x5ee   :  { %8986 = vmatprep.subr.bf16.mxu0 %v11052_v31 }
 0x5f1   :  { %8987 = vmatpush1.bf16.msra.mxu0 %v11050_v11 }
 0x5f2   :  { %8988 = vmatprep.subr.bf16.mxu0 %v11055_v24 }
 0x5f5   :  { %8989 = vmatpush1.bf16.msra.mxu0 %v11053_v4 }
 0x5f6   :  { %8990 = vmatprep.subr.bf16.mxu0 %v11058_v25 }
 0x5f9   :  { %8991 = vmatpush1.bf16.msra.mxu0 %v11056_v46 }
 0x5fa   :  { %8992 = vmatprep.subr.bf16.mxu0 %v11061_v59 }
 0x5fd   :  { %8993 = vmatpush1.bf16.msra.mxu0 %v11059_v2 }
 0x5fe   :  { %8994 = vmatprep.subr.bf16.mxu0 %v11064_v38 }
 0x601   :  { %8995 = vmatpush1.bf16.msra.mxu0 %v11062_v40 }
 0x60f   :  { %v5841_v10 = vpop.f32.mrb[164].mxu0  ;;  %v5882_v12 = vpop.f32.mrb[192].mxu1 }
 0x610   :  { %v5889_v14 = vadd.f32 %v5841_v10, %v5750_v62  ;;  %v5891_v15 = vadd.f32 %v5882_v12, %v12535_v37  ;;  %v5843_v17 = vpop.f32.mrb[165].mxu0  ;;  %v5884_v1 = vpop.f32.mrb[193].mxu1  ;;  %v12657_v10 = vrot.slane %v12653_v6, %v8546_v8  ;;  %v11073_v12 = vld [vmem:[#allocation18 + $0xe4] ss:$8 sps:$4 sm:$0xff]  }
 0x611   :  { %v5890_v19 = vadd.f32 %v5843_v17, %v5751_v30  ;;  %v5892_v5 = vadd.f32 %v5884_v1, %v12537_v18  ;;  %v5845_v36 = vpop.f32.mrb[166].mxu0  ;;  %v5886_v39 = vpop.f32.mrb[194].mxu1  ;;  %v11067_v30 = vld [vmem:[#allocation18 + $0xc4] ss:$8 sps:$4 sm:$0xff]   ;;  %v11074_v1 = vld [vmem:[#allocation18 + $0xf0] ss:$8 sps:$4 sm:$0xff]  }
 0x612   :  { %v5846_v20 = vpop.f32.mrb[167].mxu0  ;;  %v5887_v3 = vpop.f32.mrb[195].mxu1  ;;  %8996 = vmatprep.subr.bf16.mxu0 %v11067_v30 }
 0x613   :  { %8997 = vmatpush1.bf16.msra.mxu0 %v11065_v7 }
 0x614   :  { %8998 = vmatprep.subr.bf16.mxu0 %v11070_v23 }
 0x617   :  { %v5980_v26 = vpop.f32.mrb[168].mxu0  ;;  %v6021_v29 = vpop.f32.mrb[196].mxu1  ;;  %8999 = vmatpush1.bf16.msra.mxu0 %v11068_v61 }
 0x618   :  { %v6028_v37 = vadd.f32 %v5980_v26, %v5889_v14  ;;  %v6030_v42 = vadd.f32 %v6021_v29, %v5891_v15  ;;  %v5982_v28 = vpop.f32.mrb[169].mxu0  ;;  %v6023_v45 = vpop.f32.mrb[197].mxu1  ;;  %v11071_v14 = vld [vmem:[#allocation18 + $0xe0] ss:$8 sps:$4 sm:$0xff]   ;;  %9000 = vmatprep.subr.bf16.mxu0 %v11073_v12  ;;  %v11079_v29 = vld [vmem:[#allocation18 + $0x104] ss:$8 sps:$4 sm:$0xff]  }
 0x619   :  { %v6029_v13 = vadd.f32 %v5982_v28, %v5890_v19  ;;  %v6031_v18 = vadd.f32 %v6023_v45, %v5892_v5  ;;  %v5984_v32 = vpop.f32.mrb[170].mxu0  ;;  %v6025_v33 = vpop.f32.mrb[198].mxu1  ;;  %v11076_v19 = vld [vmem:[#allocation18 + $0xf4] ss:$8 sps:$4 sm:$0xff]  }
 0x61a   :  { %v5985_v27 = vpop.f32.mrb[171].mxu0  ;;  %v6026_v35 = vpop.f32.mrb[199].mxu1 }
 0x61b   :  { %9001 = vmatpush1.bf16.msra.mxu0 %v11071_v14 }
 0x61c   :  { %9002 = vmatprep.subr.bf16.mxu0 %v11076_v19 }
 0x61f   :  { %v6119_v22 = vpop.f32.mrb[172].mxu0  ;;  %v6160_v21 = vpop.f32.mrb[200].mxu1  ;;  %9003 = vmatpush1.bf16.msra.mxu0 %v11074_v1 }
 0x620   :  { %v6167_v57 = vadd.f32 %v6119_v22, %v6028_v37  ;;  %v6169_v43 = vadd.f32 %v6160_v21, %v6030_v42  ;;  %v6121_v44 = vpop.f32.mrb[173].mxu0  ;;  %v6162_v49 = vpop.f32.mrb[201].mxu1  ;;  %9013 = vmatprep.subr.bf16.mxu0 %v11079_v29 }
 0x621   :  { %v6168_v50 = vadd.f32 %v6121_v44, %v6029_v13  ;;  %v6170_v9 = vadd.f32 %v6162_v49, %v6031_v18  ;;  %v6123_v41 = vpop.f32.mrb[174].mxu0  ;;  %v6164_v58 = vpop.f32.mrb[202].mxu1 }
 0x622   :  { %v6124_v53 = vpop.f32.mrb[175].mxu0  ;;  %v6165_v62 = vpop.f32.mrb[203].mxu1 }
 0x627   :  { %v6258_v47 = vpop.f32.mrb[176].mxu0  ;;  %v6299_v16 = vpop.f32.mrb[204].mxu1 }
 0x628   :  { %v6306_v51 = vadd.f32 %v6258_v47, %v6167_v57  ;;  %v6308_v60 = vadd.f32 %v6299_v16, %v6169_v43  ;;  %v6260_v63 = vpop.f32.mrb[177].mxu0  ;;  %v6301_v0 = vpop.f32.mrb[205].mxu1 }
 0x629   :  { %v6307_v52 = vadd.f32 %v6260_v63, %v6168_v50  ;;  %v6309_v34 = vadd.f32 %v6301_v0, %v6170_v9  ;;  %v6262_v56 = vpop.f32.mrb[178].mxu0  ;;  %v6303_v55 = vpop.f32.mrb[206].mxu1 }
 0x62a   :  { %v6263_v31 = vpop.f32.mrb[179].mxu0  ;;  %v6304_v11 = vpop.f32.mrb[207].mxu1 }
 0x62f   :  { %v6397_v15 = vpop.f32.mrb[180].mxu0  ;;  %v6438_v17 = vpop.f32.mrb[208].mxu1 }
 0x630   :  { %v6445_v5 = vadd.f32 %v6397_v15, %v6306_v51  ;;  %v6447_v36 = vadd.f32 %v6438_v17, %v6308_v60  ;;  %v6399_v39 = vpop.f32.mrb[181].mxu0  ;;  %v6440_v20 = vpop.f32.mrb[209].mxu1 }
 0x631   :  { %v6446_v3 = vadd.f32 %v6399_v39, %v6307_v52  ;;  %v6448_v4 = vadd.f32 %v6440_v20, %v6309_v34  ;;  %v6401_v24 = vpop.f32.mrb[182].mxu0  ;;  %v6442_v25 = vpop.f32.mrb[210].mxu1 }
 0x632   :  { %v6402_v46 = vpop.f32.mrb[183].mxu0  ;;  %v6443_v26 = vpop.f32.mrb[211].mxu1 }
 0x637   :  { %v6536_v37 = vpop.f32.mrb[184].mxu0  ;;  %v6577_v42 = vpop.f32.mrb[212].mxu1 }
 0x638   :  { %v6584_v28 = vadd.f32 %v6536_v37, %v6445_v5  ;;  %v6586_v45 = vadd.f32 %v6577_v42, %v6447_v36  ;;  %v6538_v13 = vpop.f32.mrb[185].mxu0  ;;  %v6579_v18 = vpop.f32.mrb[213].mxu1 }
 0x639   :  { %v6585_v32 = vadd.f32 %v6538_v13, %v6446_v3  ;;  %v6587_v33 = vadd.f32 %v6579_v18, %v6448_v4  ;;  %v6540_v27 = vpop.f32.mrb[186].mxu0  ;;  %v6581_v35 = vpop.f32.mrb[214].mxu1 }
 0x63a   :  { %v6541_v2 = vpop.f32.mrb[187].mxu0  ;;  %v6582_v59 = vpop.f32.mrb[215].mxu1 }
 0x63f   :  { %v6675_v38 = vpop.f32.mrb[188].mxu0  ;;  %v6716_v40 = vpop.f32.mrb[216].mxu1 }
 0x640   :  { %v6723_v22 = vadd.f32 %v6675_v38, %v6584_v28  ;;  %v6725_v21 = vadd.f32 %v6716_v40, %v6586_v45  ;;  %v6677_v57 = vpop.f32.mrb[189].mxu0  ;;  %v6718_v43 = vpop.f32.mrb[217].mxu1 }
 0x641   :  { %v6724_v44 = vadd.f32 %v6677_v57, %v6585_v32  ;;  %v6726_v49 = vadd.f32 %v6718_v43, %v6587_v33  ;;  %v6679_v50 = vpop.f32.mrb[190].mxu0  ;;  %v6720_v9 = vpop.f32.mrb[218].mxu1 }
 0x642   :  { %v6680_v41 = vpop.f32.mrb[191].mxu0  ;;  %v6721_v58 = vpop.f32.mrb[219].mxu1 }
 0x647   :  { %v6814_v53 = vpop.f32.mrb[192].mxu0  ;;  %v6855_v62 = vpop.f32.mrb[220].mxu1 }
 0x648   :  { %v6862_v7 = vadd.f32 %v6814_v53, %v6723_v22  ;;  %v6864_v30 = vadd.f32 %v6855_v62, %v6725_v21  ;;  %v6816_v23 = vpop.f32.mrb[193].mxu0  ;;  %v6857_v61 = vpop.f32.mrb[221].mxu1 }
 0x649   :  { %v6863_v54 = vadd.f32 %v6816_v23, %v6724_v44  ;;  %v6865_v47 = vadd.f32 %v6857_v61, %v6726_v49  ;;  %v6818_v16 = vpop.f32.mrb[194].mxu0  ;;  %v6859_v51 = vpop.f32.mrb[222].mxu1 }
 0x64a   :  { %v6819_v60 = vpop.f32.mrb[195].mxu0  ;;  %v6860_v63 = vpop.f32.mrb[223].mxu1 }
 0x64b   :  { %v11125_v63 = vld [vmem:[%s12756_s14 + $0x40] sm:$0xff]  }
 0x64c   :  { %10033 = vmatprep.subr.bf16.mxu1 %v11125_v63 }
 0x64f   :  { %v6953_v0 = vpop.f32.mrb[196].mxu0  ;;  %v6994_v52 = vpop.f32.mrb[224].mxu1 }
 0x650   :  { %v7001_v34 = vadd.f32 %v6953_v0, %v6862_v7  ;;  %v7003_v56 = vadd.f32 %v6994_v52, %v6864_v30  ;;  %v6955_v55 = vpop.f32.mrb[197].mxu0  ;;  %v6996_v8 = vpop.f32.mrb[225].mxu1  ;;  %v11126_v0 = vld [vmem:[%s12756_s14] sm:$0xff]   ;;  %v11127_v52 = vld [vmem:[%s12756_s14 + $0x48] sm:$0xff]  }
 0x651   :  { %v7002_v31 = vadd.f32 %v6955_v55, %v6863_v54  ;;  %v7004_v11 = vadd.f32 %v6996_v8, %v6865_v47  ;;  %v6957_v12 = vpop.f32.mrb[198].mxu0  ;;  %v6998_v14 = vpop.f32.mrb[226].mxu1  ;;  %10034 = vmatpush3.bf16.msra.mxu1 %v11126_v0  ;;  %v11129_v8 = vld [vmem:[%s12756_s14 + $0x50] sm:$0xff]  }
 0x652   :  { %v6958_v15 = vpop.f32.mrb[199].mxu0  ;;  %v6999_v17 = vpop.f32.mrb[227].mxu1  ;;  %10035 = vmatprep.subr.bf16.mxu1 %v11127_v52 }
 0x657   :  { %v7092_v1 = vpop.f32.mrb[200].mxu0  ;;  %v7133_v19 = vpop.f32.mrb[228].mxu1 }
 0x658   :  { %v7140_v5 = vadd.f32 %v7092_v1, %v7001_v34  ;;  %v7142_v36 = vadd.f32 %v7133_v19, %v7003_v56  ;;  %v7094_v39 = vpop.f32.mrb[201].mxu0  ;;  %v7135_v20 = vpop.f32.mrb[229].mxu1  ;;  %v11128_v34 = vld [vmem:[%s12756_s14 + $0x8] sm:$0xff]  }
 0x659   :  { %v7141_v3 = vadd.f32 %v7094_v39, %v7002_v31  ;;  %v7143_v4 = vadd.f32 %v7135_v20, %v7004_v11  ;;  %v7096_v24 = vpop.f32.mrb[202].mxu0  ;;  %v7137_v25 = vpop.f32.mrb[230].mxu1  ;;  %10036 = vmatpush3.bf16.msra.mxu1 %v11128_v34  ;;  %v11130_v39 = vld [vmem:[%s12756_s14 + $0x10] sm:$0xff]   ;;  %v11131_v20 = vld [vmem:[%s12756_s14 + $0x58] sm:$0xff]  }
 0x65a   :  { %v7097_v46 = vpop.f32.mrb[203].mxu0  ;;  %v7138_v26 = vpop.f32.mrb[231].mxu1  ;;  %10037 = vmatprep.subr.bf16.mxu1 %v11129_v8  ;;  %v11133_v25 = vld [vmem:[%s12756_s14 + $0x60] sm:$0xff]  }
 0x65d   :  { %10038 = vmatpush3.bf16.msra.mxu1 %v11130_v39 }
 0x65e   :  { %10039 = vmatprep.subr.bf16.mxu1 %v11131_v20 }
 0x65f   :  { %v7231_v29 = vpop.f32.mrb[204].mxu0  ;;  %v7272_v37 = vpop.f32.mrb[232].mxu1 }
 0x660   :  { %v7279_v42 = vadd.f32 %v7231_v29, %v7140_v5  ;;  %v7281_v28 = vadd.f32 %v7272_v37, %v7142_v36  ;;  %v7233_v45 = vpop.f32.mrb[205].mxu0  ;;  %v7274_v13 = vpop.f32.mrb[233].mxu1 }
 0x661   :  { %v7280_v18 = vadd.f32 %v7233_v45, %v7141_v3  ;;  %v7282_v32 = vadd.f32 %v7274_v13, %v7143_v4  ;;  %v7235_v33 = vpop.f32.mrb[206].mxu0  ;;  %v7276_v27 = vpop.f32.mrb[234].mxu1  ;;  %v11132_v3 = vld [vmem:[%s12756_s14 + $0x18] sm:$0xff]  }
 0x662   :  { %v7236_v35 = vpop.f32.mrb[207].mxu0  ;;  %v7277_v2 = vpop.f32.mrb[235].mxu1  ;;  %10040 = vmatpush3.bf16.msra.mxu1 %v11132_v3  ;;  %v11134_v33 = vld [vmem:[%s12756_s14 + $0x20] sm:$0xff]   ;;  %v11135_v27 = vld [vmem:[%s12756_s14 + $0x68] sm:$0xff]  }
 0x663   :  { %10041 = vmatprep.subr.bf16.mxu1 %v11133_v25  ;;  %v11136_v35 = vld [vmem:[%s12756_s14 + $0x28] sm:$0xff]  }
 0x666   :  { %10042 = vmatpush3.bf16.msra.mxu1 %v11134_v33 }
 0x667   :  { %v7370_v59 = vpop.f32.mrb[208].mxu0  ;;  %v7411_v38 = vpop.f32.mrb[236].mxu1  ;;  %10043 = vmatprep.subr.bf16.mxu1 %v11135_v27 }
 0x668   :  { %v7418_v40 = vadd.f32 %v7370_v59, %v7279_v42  ;;  %v7420_v22 = vadd.f32 %v7411_v38, %v7281_v28  ;;  %v7372_v21 = vpop.f32.mrb[209].mxu0  ;;  %v7413_v57 = vpop.f32.mrb[237].mxu1 }
 0x669   :  { %v7419_v43 = vadd.f32 %v7372_v21, %v7280_v18  ;;  %v7421_v44 = vadd.f32 %v7413_v57, %v7282_v32  ;;  %v7374_v49 = vpop.f32.mrb[210].mxu0  ;;  %v7415_v50 = vpop.f32.mrb[238].mxu1 }
 0x66a   :  { %v7375_v9 = vpop.f32.mrb[211].mxu0  ;;  %v7416_v41 = vpop.f32.mrb[239].mxu1  ;;  %10044 = vmatpush3.bf16.msra.mxu1 %v11136_v35 }
 0x66f   :  { %v7509_v58 = vpop.f32.mrb[212].mxu0  ;;  %v7550_v53 = vpop.f32.mrb[240].mxu1 }
 0x670   :  { %v7557_v62 = vadd.f32 %v7509_v58, %v7418_v40  ;;  %v7559_v7 = vadd.f32 %v7550_v53, %v7420_v22  ;;  %v7511_v30 = vpop.f32.mrb[213].mxu0  ;;  %v7552_v23 = vpop.f32.mrb[241].mxu1 }
 0x671   :  { %v7558_v61 = vadd.f32 %v7511_v30, %v7419_v43  ;;  %v7560_v54 = vadd.f32 %v7552_v23, %v7421_v44  ;;  %v7513_v47 = vpop.f32.mrb[214].mxu0  ;;  %v7554_v16 = vpop.f32.mrb[242].mxu1 }
 0x672   :  { %v7514_v51 = vpop.f32.mrb[215].mxu0  ;;  %v7555_v60 = vpop.f32.mrb[243].mxu1 }
 0x677   :  { %v7648_v56 = vpop.f32.mrb[216].mxu0  ;;  %v7689_v55 = vpop.f32.mrb[244].mxu1 }
 0x678   :  { %v7696_v31 = vadd.f32 %v7648_v56, %v7557_v62  ;;  %v7698_v11 = vadd.f32 %v7689_v55, %v7559_v7  ;;  %v7650_v12 = vpop.f32.mrb[217].mxu0  ;;  %v7691_v14 = vpop.f32.mrb[245].mxu1 }
 0x679   :  { %v7697_v15 = vadd.f32 %v7650_v12, %v7558_v61  ;;  %v7699_v17 = vadd.f32 %v7691_v14, %v7560_v54  ;;  %v7652_v1 = vpop.f32.mrb[218].mxu0  ;;  %v7693_v19 = vpop.f32.mrb[246].mxu1 }
 0x67a   :  { %v7653_v5 = vpop.f32.mrb[219].mxu0  ;;  %v7694_v36 = vpop.f32.mrb[247].mxu1 }
 0x67f   :  { %v7787_v4 = vpop.f32.mrb[220].mxu0  ;;  %v7828_v24 = vpop.f32.mrb[248].mxu1 }
 0x680   :  { %v7835_v46 = vadd.f32 %v7787_v4, %v7696_v31  ;;  %v7837_v26 = vadd.f32 %v7828_v24, %v7698_v11  ;;  %v7789_v29 = vpop.f32.mrb[221].mxu0  ;;  %v7830_v37 = vpop.f32.mrb[249].mxu1 }
 0x681   :  { %v7836_v42 = vadd.f32 %v7789_v29, %v7697_v15  ;;  %v7838_v28 = vadd.f32 %v7830_v37, %v7699_v17  ;;  %v7791_v45 = vpop.f32.mrb[222].mxu0  ;;  %v7832_v13 = vpop.f32.mrb[250].mxu1  ;;  %v8550_v29 = vsub.s32 3, %v12651_v48 }
 0x682   :  { %v7792_v18 = vpop.f32.mrb[223].mxu0  ;;  %v7833_v32 = vpop.f32.mrb[251].mxu1 }
 0x683   :  { %v8551_v13 = vrot.slane %v12653_v6, %v8550_v29 }
 0x687   :  { %v7926_v2 = vpop.f32.mrb[224].mxu0  ;;  %v7967_v59 = vpop.f32.mrb[252].mxu1 }
 0x688   :  { %v7974_v38 = vadd.f32 %v7926_v2, %v7835_v46  ;;  %v7976_v40 = vadd.f32 %v7967_v59, %v7837_v26  ;;  %v7928_v22 = vpop.f32.mrb[225].mxu0  ;;  %v7969_v21 = vpop.f32.mrb[253].mxu1  ;;  %v8538_v46 = vsub.s32 0, %v12651_v48  ;;  %v8542_v26 = vsub.s32 1, %v12651_v48  ;;  %v9876_v48 = vld [vmem:[#allocation21] ss:$0 sm:$0xff] }
 0x689   :  { %v7975_v57 = vadd.f32 %v7928_v22, %v7836_v42  ;;  %v7977_v43 = vadd.f32 %v7969_v21, %v7838_v28  ;;  %v7930_v44 = vpop.f32.mrb[226].mxu0  ;;  %v7971_v49 = vpop.f32.mrb[254].mxu1 }
 0x68a   :  { %v7931_v50 = vpop.f32.mrb[227].mxu0  ;;  %v7972_v9 = vpop.f32.mrb[255].mxu1  ;;  %v8539_v37 = vrot.slane %v12653_v6, %v8538_v46  ;;  %v8543_v45 = vrot.slane %v12653_v6, %v8542_v26 }
 0x68f   :  { %v8065_v41 = vpop.f32.mrb[228].mxu0  ;;  %v8106_v58 = vpop.f32.mrb[0].mxu1 }
 0x690   :  { %v8113_v53 = vadd.f32 %v8065_v41, %v7974_v38  ;;  %v8115_v62 = vadd.f32 %v8106_v58, %v7976_v40  ;;  %v8067_v7 = vpop.f32.mrb[229].mxu0  ;;  %v8108_v30 = vpop.f32.mrb[1].mxu1 }
 0x691   :  { %v8114_v23 = vadd.f32 %v8067_v7, %v7975_v57  ;;  %v8116_v61 = vadd.f32 %v8108_v30, %v7977_v43  ;;  %v8069_v54 = vpop.f32.mrb[230].mxu0  ;;  %v8110_v47 = vpop.f32.mrb[2].mxu1  ;;  %v11082_v30 = vld [vmem:[#allocation18 + $0x114] ss:$8 sps:$4 sm:$0xff]  }
 0x692   :  { %v8070_v16 = vpop.f32.mrb[231].mxu0  ;;  %v8111_v51 = vpop.f32.mrb[3].mxu1  ;;  %v11083_v54 = vld [vmem:[#allocation18 + $0x120] ss:$8 sps:$4 sm:$0xff]   ;;  %v11088_v47 = vld [vmem:[#allocation18 + $0x134] ss:$8 sps:$4 sm:$0xff]  }
 0x693   :  { %v11086_v16 = vld [vmem:[#allocation18 + $0x130] ss:$8 sps:$4 sm:$0xff]   ;;  %v11091_v51 = vld [vmem:[#allocation18 + $0x144] ss:$8 sps:$4 sm:$0xff]  }
 0x697   :  { %v8204_v60 = vpop.f32.mrb[232].mxu0  ;;  %v8245_v63 = vpop.f32.mrb[12].mxu1 }
 0x698   :  { %v8252_v0 = vadd.f32 %v8204_v60, %v8113_v53  ;;  %v8254_v52 = vadd.f32 %v8245_v63, %v8115_v62  ;;  %v8206_v34 = vpop.f32.mrb[233].mxu0  ;;  %v8247_v56 = vpop.f32.mrb[13].mxu1  ;;  %v11077_v62 = vld [vmem:[#allocation18 + $0x100] ss:$8 sps:$4 sm:$0xff]   ;;  %v11094_v63 = vld [vmem:[#allocation18 + $0x154] ss:$8 sps:$4 sm:$0xff]  }
 0x699   :  { %v8253_v55 = vadd.f32 %v8206_v34, %v8114_v23  ;;  %v8255_v8 = vadd.f32 %v8247_v56, %v8116_v61  ;;  %v8208_v31 = vpop.f32.mrb[234].mxu0  ;;  %v8249_v11 = vpop.f32.mrb[14].mxu1  ;;  %v11080_v23 = vld [vmem:[#allocation18 + $0x110] ss:$8 sps:$4 sm:$0xff]   ;;  %v11085_v61 = vld [vmem:[#allocation18 + $0x124] ss:$8 sps:$4 sm:$0xff]  }
 0x69a   :  { %v8209_v12 = vpop.f32.mrb[235].mxu0  ;;  %v8250_v14 = vpop.f32.mrb[15].mxu1  ;;  %v11089_v60 = vld [vmem:[#allocation18 + $0x140] ss:$8 sps:$4 sm:$0xff]   ;;  %v11100_v56 = vld [vmem:[#allocation18 + $0x174] ss:$8 sps:$4 sm:$0xff]  }
 0x69b   :  { %v11095_v34 = vld [vmem:[#allocation18 + $0x160] ss:$8 sps:$4 sm:$0xff]   ;;  %v11106_v11 = vld [vmem:[#allocation18 + $0x194] ss:$8 sps:$4 sm:$0xff]   ;;  %v11104_v12 = vld [vmem:[#allocation18 + $0x190] ss:$8 sps:$4 sm:$0xff]  }
 0x69c   :  { %v11101_v31 = vld [vmem:[#allocation18 + $0x180] ss:$8 sps:$4 sm:$0xff]   ;;  %v11109_v14 = vld [vmem:[#allocation18 + $0x1a4] ss:$8 sps:$4 sm:$0xff]  }
 0x69f   :  { %v8343_v15 = vpop.f32.mrb[236].mxu0  ;;  %v8384_v17 = vpop.f32.mrb[4].mxu1 }
 0x6a0   :  { %v8391_v1 = vadd.f32 %v8343_v15, %v8252_v0  ;;  %v8393_v19 = vadd.f32 %v8384_v17, %v8254_v52  ;;  %v8345_v5 = vpop.f32.mrb[237].mxu0  ;;  %v8386_v36 = vpop.f32.mrb[5].mxu1  ;;  %v11092_v0 = vld [vmem:[#allocation18 + $0x150] ss:$8 sps:$4 sm:$0xff]   ;;  %v11097_v52 = vld [vmem:[#allocation18 + $0x164] ss:$8 sps:$4 sm:$0xff]  }
 0x6a1   :  { %v8392_v39 = vadd.f32 %v8345_v5, %v8253_v55  ;;  %v8394_v20 = vadd.f32 %v8386_v36, %v8255_v8  ;;  %v8347_v3 = vpop.f32.mrb[238].mxu0  ;;  %v8388_v4 = vpop.f32.mrb[6].mxu1  ;;  %v11098_v55 = vld [vmem:[#allocation18 + $0x170] ss:$8 sps:$4 sm:$0xff]   ;;  %v11103_v8 = vld [vmem:[#allocation18 + $0x184] ss:$8 sps:$4 sm:$0xff]  }
 0x6a2   :  { %v8348_v24 = vpop.f32.mrb[239].mxu0  ;;  %v8389_v25 = vpop.f32.mrb[7].mxu1  ;;  %v11107_v15 = vld [vmem:[#allocation18 + $0x1a0] ss:$8 sps:$4 sm:$0xff]   ;;  %v11112_v17 = vld [vmem:[#allocation18 + $0x1b4] ss:$8 sps:$4 sm:$0xff]  }
 0x6a3   :  { %v11113_v5 = vld [vmem:[#allocation18 + $0x1c0] ss:$8 sps:$4 sm:$0xff]   ;;  %v11118_v36 = vld [vmem:[#allocation18 + $0x1d4] ss:$8 sps:$4 sm:$0xff]   ;;  %v11122_v25 = vld [vmem:[#allocation18 + $0x1f0] ss:$8 sps:$4 sm:$0xff]  }
 0x6a4   :  { %v11119_v3 = vld [vmem:[#allocation18 + $0x1e0] ss:$8 sps:$4 sm:$0xff]   ;;  %v11124_v4 = vld [vmem:[#allocation18 + $0x1f4] ss:$8 sps:$4 sm:$0xff]  }
 0x6a7   :  { %v8482_v42 = vpop.f32.mrb[240].mxu0  ;;  %v8523_v28 = vpop.f32.mrb[16].mxu1 }
 0x6a8   :  { %v8530_v18 = vadd.f32 %v8482_v42, %v8391_v1  ;;  %v8532_v32 = vadd.f32 %v8523_v28, %v8393_v19  ;;  %v8484_v33 = vpop.f32.mrb[241].mxu0  ;;  %v8525_v27 = vpop.f32.mrb[17].mxu1  ;;  %v11110_v1 = vld [vmem:[#allocation18 + $0x1b0] ss:$8 sps:$4 sm:$0xff]   ;;  %v11115_v19 = vld [vmem:[#allocation18 + $0x1c4] ss:$8 sps:$4 sm:$0xff]  }
 0x6a9   :  { %v8531_v35 = vadd.f32 %v8484_v33, %v8392_v39  ;;  %v8533_v2 = vadd.f32 %v8525_v27, %v8394_v20  ;;  %v8486_v59 = vpop.f32.mrb[242].mxu0  ;;  %v8527_v38 = vpop.f32.mrb[18].mxu1  ;;  %v11116_v39 = vld [vmem:[#allocation18 + $0x1d0] ss:$8 sps:$4 sm:$0xff]   ;;  %v11121_v20 = vld [vmem:[#allocation18 + $0x1e4] ss:$8 sps:$4 sm:$0xff]  }
 0x6aa   :  { %v8556_v40 = vadd.f32 %v8539_v37, %v8530_v18  ;;  %v12706_v22 = vadd.f32 %v12657_v10, %v8532_v32  ;;  %v8487_v21 = vpop.f32.mrb[243].mxu0  ;;  %v8528_v57 = vpop.f32.mrb[19].mxu1  ;;  %v11137_v42 = vld [vmem:[%s12756_s14 + $0x70] sm:$0xff]  }
 0x6ab   :  { %v8557_v43 = vadd.f32 %v8543_v45, %v8531_v35  ;;  %v8559_v44 = vadd.f32 %v8551_v13, %v8533_v2  ;;  %v11138_v28 = vld [vmem:[%s12756_s14 + $0x30] sm:$0xff]   ;;  %10045 = vmatprep.subr.bf16.mxu1 %v11137_v42  ;;  %v11139_v45 = vld [vmem:[%s12756_s14 + $0x78] sm:$0xff]  }
 0x6ac   :  { %vm8560_vm5 = vcmp.gt.f32.partialorder %v8556_v40, 0.0  ;;  %v8564_v49 = vmul.f32 0.01, %v8556_v40  ;;  %v8566_v24 = vmul.f32 0.01, %v12706_v22  ;;  %vm8562_vm4 = vcmp.gt.f32.partialorder %v12706_v22, 0.0  ;;  %10046 = vmatpush3.bf16.msra.mxu1 %v11138_v28 }
 0x6ad   :  { %v8565_v50 = vmul.f32 0.01, %v8557_v43  ;;  %v8567_v6 = vmul.f32 0.01, %v8559_v44  ;;  %vm8561_vm0 = vcmp.gt.f32.partialorder %v8557_v43, 0.0  ;;  %vm8563_vm1 = vcmp.gt.f32.partialorder %v8559_v44, 0.0  ;;  %10047 = vmatprep.subr.bf16.mxu1 %v11139_v45 }
 0x6ae   :  { %v8568_v9 = vsel %vm8560_vm5, %v8556_v40, %v8564_v49  ;;  %v8570_v29 = vsel %vm8562_vm4, %v12706_v22, %v8566_v24  ;;  %v11140_v13 = vld [vmem:[%s12756_s14 + $0x38] sm:$0xff]   ;;  %v8640_v18 = vld [vmem:[#allocation19] sm:$0x3]  ;;  %s11444_s14 = smov [#allocation22]  }
 0x6af   :  { %v8569_v41 = vsel %vm8561_vm0, %v8557_v43, %v8565_v50  ;;  %v8571_v58 = vsel %vm8563_vm1, %v8559_v44, %v8567_v6  ;;  %v8572_v7 = vpack.c.bf16 %v8568_v9, %v8568_v9  ;;  %v8574_v37 = vpack.c.bf16 %v8570_v29, %v8570_v29  ;;  %s9256_s29 = sshll.u32 %s11444_s14, 4  ;;  %s9257_s29 = int_to_ptr.vmem [resolvable:$true] %s9256_s29 }
 0x6b0   :  { %v8573_v53 = vpack.c.bf16 %v8569_v41, %v8569_v41  ;;  %v8575_v10 = vpack.c.bf16 %v8571_v58, %v8571_v58  ;;  %10048 = vmatpush3.bf16.msra.mxu1 %v11140_v13  ;;  %v8645_v32 = vrot.slane %v8640_v18, %v8538_v46  ;;  %v8649_v33 = vrot.slane %v8640_v18, %v8542_v26  ;;  %s11387_s23 = scalar_lea.vmem %s9257_s29, 32  ;;  %p11392_p5 = scmp.lt.s32.totalorder %s9257_s29, %s9257_s29 }
 0x6b1   :  { %p11388_p4 = scmp.ne.s32.totalorder %s9257_s29, %s11387_s23  ;;  %p11393_p6 = scmp.lt.s32.totalorder %s11387_s23, %s11387_s23 }
 0x6b2   :  { %9004 = vmatprep.mubr.bf16.mxu0 %v8573_v53 }
 0x6b3   :  { %9005 = vmatmul.mubr.bf16.vlgmr.msra.gmra.mrb[244].mxu0 %v8572_v7  ;;  %p11394_p7 = por %p11393_p6, %p11392_p5 }
 0x6b4   :  { %9014 = vmatpush1.bf16.msra.mxu0 %v11077_v62  ;;  %9045 = vmatprep.mubr.bf16.mxu0 %v8575_v10 }
 0x6b5   :  { %9015 = vmatprep.subr.bf16.mxu0 %v11082_v30  ;;  %p11395_p8 = pnand %p11394_p7, %p11388_p4 }
 0x6b8   :  { %9016 = vmatpush1.bf16.msra.mxu0 %v11080_v23 }
 0x6b9   :  { %9017 = vmatprep.subr.bf16.mxu0 %v11085_v61 }
 0x6bc   :  { %9018 = vmatpush1.bf16.msra.mxu0 %v11083_v54 }
 0x6bd   :  { %9019 = vmatprep.subr.bf16.mxu0 %v11088_v47 }
 0x6c0   :  { %9020 = vmatpush1.bf16.msra.mxu0 %v11086_v16 }
 0x6c1   :  { %9021 = vmatprep.subr.bf16.mxu0 %v11091_v51 }
 0x6c4   :  { %9022 = vmatpush1.bf16.msra.mxu0 %v11089_v60 }
 0x6c5   :  { %9023 = vmatprep.subr.bf16.mxu0 %v11094_v63 }
 0x6c8   :  { %9024 = vmatpush1.bf16.msra.mxu0 %v11092_v0 }
 0x6c9   :  { %9025 = vmatprep.subr.bf16.mxu0 %v11097_v52 }
 0x6cc   :  { %9026 = vmatpush1.bf16.msra.mxu0 %v11095_v34 }
 0x6cd   :  { %9027 = vmatprep.subr.bf16.mxu0 %v11100_v56 }
 0x6d0   :  { %9028 = vmatpush1.bf16.msra.mxu0 %v11098_v55 }
 0x6d1   :  { %9029 = vmatprep.subr.bf16.mxu0 %v11103_v8 }
 0x6d4   :  { %9030 = vmatpush1.bf16.msra.mxu0 %v11101_v31 }
 0x6d5   :  { %9031 = vmatprep.subr.bf16.mxu0 %v11106_v11 }
 0x6d8   :  { %9032 = vmatpush1.bf16.msra.mxu0 %v11104_v12 }
 0x6d9   :  { %9033 = vmatprep.subr.bf16.mxu0 %v11109_v14 }
 0x6dc   :  { %9034 = vmatpush1.bf16.msra.mxu0 %v11107_v15 }
 0x6dd   :  { %9035 = vmatprep.subr.bf16.mxu0 %v11112_v17 }
 0x6e0   :  { %9036 = vmatpush1.bf16.msra.mxu0 %v11110_v1 }
 0x6e1   :  { %9037 = vmatprep.subr.bf16.mxu0 %v11115_v19 }
 0x6e4   :  { %9038 = vmatpush1.bf16.msra.mxu0 %v11113_v5 }
 0x6e5   :  { %9039 = vmatprep.subr.bf16.mxu0 %v11118_v36 }
 0x6e8   :  { %9040 = vmatpush1.bf16.msra.mxu0 %v11116_v39 }
 0x6e9   :  { %9041 = vmatprep.subr.bf16.mxu0 %v11121_v20 }
 0x6ec   :  { %9042 = vmatpush1.bf16.msra.mxu0 %v11119_v3 }
 0x6ed   :  { %9043 = vmatprep.subr.bf16.mxu0 %v11124_v4 }
 0x6f0   :  { %9044 = vmatpush1.bf16.msra.mxu0 %v11122_v25 }
 0x6f3   :  { %9046 = vmatmul.mubr.bf16.vlgmr.msra.gmra.mrb[244].mxu0 %v8574_v37 }
 0x7c6   :  { %v9047_v27 = vpop.f32.mrb[244].mxu0 }
 0x7c7   :  { %v10409_v35 = vadd.f32 %v9047_v27, %v8645_v32  ;;  %v9049_v2 = vpop.f32.mrb[245].mxu0 }
 0x7c8   :  { %v10410_v59 = vadd.f32 %v9049_v2, %v8649_v33  ;;  %v9051_v38 = vpop.f32.mrb[246].mxu0 }
 0x7c9   :  { %vm9054_vm6 = vcmp.gt.f32.partialorder %v10409_v35, 0.0  ;;  %v9056_v40 = vmul.f32 0.01, %v10409_v35  ;;  %v9052_v22 = vpop.f32.mrb[247].mxu0 }
 0x7ca   :  { %vm9055_vm2 = vcmp.gt.f32.partialorder %v10410_v59, 0.0  ;;  %v9057_v21 = vmul.f32 0.01, %v10410_v59 }
 0x7cb   :  { %v9058_v57 = vsel %vm9054_vm6, %v10409_v35, %v9056_v40 }
 0x7cc   :  { %v9059_v43 = vsel %vm9055_vm2, %v10410_v59, %v9057_v21  ;;  %v9060_v49 = vpack.c.bf16 %v9058_v57, %v9058_v57 }
 0x7cd   :  { %v9061_v44 = vpack.c.bf16 %v9059_v43, %v9059_v43 }
 0x7cf   :  { %9229 = vmatprep.mubr.bf16.mxu1 %v9061_v44 }
 0x7d0   :  { %9230 = vmatmul.mubr.bf16.vlgmr.msra.gmra.mrb[8].mxu1 %v9060_v49 }
 0x8a3   :  { %v10049_v46 = vpop.f32.mrb[8].mxu1 }
 0x8a4   :  { %v10050_v50 = vpop.f32.mrb[9].mxu1 }
 0x8a5   :  { %v10051_v26 = vadd.f32 %v10050_v50, %v10049_v46  ;;  %v10052_v6 = vpop.f32.mrb[10].mxu1 }
 0x8a6   :  { %v10053_v9 = vpop.f32.mrb[11].mxu1 }
 0x8a7   :  { %v9232_v41 = vadd.f32 %v10051_v26, %v9876_v48 }
 0x8a9   :  { %v9238_v58 = vsel %vm9237_vm7, %v9232_v41, -inf }
 0x8aa   :  { %9239 = vmax.xlane.f32.xlu0 %v9238_v58 }
 0x937   :  { %v9240_v53 = vpop.xlane.xlu0 %9239 }
 0x938   :  { %v9241_v62 = vsub.f32 %v9232_v41, %v9240_v53 }
 0x93a   :  { %v9242_v7 = vmul.f32 1.442695, %v9241_v62 }
 0x93c   :  { %11141 = vpow2.f32 %v9242_v7 }
 0x946   :  { %v11142_v30 = vpop.eup %11141 }
 0x947   :  { %v9244_v10 = vsel %vm9237_vm7, %v11142_v30, 0.0 }
 0x948   :  { %9245 = vadd.xlane.f32.xlu0 %v9244_v10 }
 0x9d5   :  { %v9246_v23 = vpop.xlane.xlu0 %9245 }
 0x9d6   :  { %11143 = vrcp.f32 %v9246_v23 }
 0x9e0   :  { %v11144_v61 = vpop.eup %11143 }
 0x9e1   :  { %v9248_v54 = vmul.f32 %v11144_v61, %v11142_v30 }
 0x9e3   :  { %9249 = vst.msk [vmem:[#allocation22] sm:$0x3] %vm9237_vm7, %v9248_v54 }
 0x9e4   :  { %11398 = shalt.err (!%p11395_p8)
}
 0x9e5   :  { %s11399_s2 = scalar_lea.hbm %s12758_s16, 32 }
 0x9e6   :  { %p11400_p9 = scmp.ne.s32.totalorder %s12758_s16, %s11399_s2  ;;  %p11403_p10 = scmp.lt.u32.totalorder %s11399_s2, %s12758_s16 }
 0x9e8   :  { %p11405_p11 = pnand %p11403_p10, %p11400_p9 }
 0x9ea   :  { %11408 = shalt.err (!%p11405_p11)
}
 0x9eb   :  { %9259 = dma.vmem_to_hbm [thread:$0]  %s9257_s29, 32, %s12758_s16, [#allocation6]  }
 0x9ec   :  { %11421 = dma.done.wait [#allocation6], 32  }
 0x9ed   :  { %11422 = vsyncadd [#allocation6], 4294967264 }
 0x9ee   :  { %9263 = vsyncpa [#allocation5], 1 }
 0x9ef   :  { %9264 = vsyncpa [#allocation8], 1 }
 0x9f0   :  { %9265 = vsyncpa [#allocation11], 1 }
 0x9f1   :  { %9266 = vsyncpa [#allocation14], 1 }
 0x9f2   :  { %9267 = vsyncpa [#allocation17], 1 }
 0x9f3   :  { %9268 = vsyncpa [#allocation20], 1 }
 0x9f4   :  { %9269 = vsyncpa [#allocation6], 1 }

</bundles_post_ra>
